<compile_context>
chip_gen: v5e
topology: v5e:2x2
jax: 0.10.0
libtpu: 0.0.40
codegen_flags: <defaults>
</compile_context>

<pallas_src>
import functools

import jax
import jax.numpy as jnp
from jax.experimental import pallas as pl
from jax.experimental.pallas import tpu as pltpu


# --------------------------------------------------------------------------
# Generation-aware scoped-VMEM limit.
# --------------------------------------------------------------------------
@functools.lru_cache(maxsize=1)
def _vmem_limit_bytes():
    cap = 64 * 1024 * 1024
    try:
        info = pltpu.get_tpu_info()
        c = int(getattr(info, "vmem_capacity_bytes", 0))
        if c > 0:
            cap = c
    except Exception:
        pass
    # ~half of physical per core: 32 MiB on v7x (64 MiB), 64 MiB on v5e/v6e (128 MiB).
    return int(min(max(cap // 2, 32 * 1024 * 1024), 96 * 1024 * 1024))


# --------------------------------------------------------------------------
# Tile-size helpers.
# --------------------------------------------------------------------------
def _pick_conv_row_tile(Ho, Wo, target_rows):
    """Largest divisor of Ho such that the matmul M dim (tr*Wo) stays ~target_rows."""
    start = min(Ho, max(1, target_rows // max(Wo, 1)))
    for t in range(start, 0, -1):
        if Ho % t == 0:
            return t
    return 1


def _pick_pool_row_tile(Ph, Pw, C, target_bytes=4 << 20):
    """Largest divisor of Ph whose per-step VMEM footprint stays under target_bytes."""
    per_row = Pw * C * 24        # rough: bf16 input rows + f32 temps + f32 output
    best = 1
    for t in range(1, Ph + 1):
        if Ph % t == 0 and t * per_row <= target_bytes:
            best = t
    return best


# --------------------------------------------------------------------------
# Kernel 1: conv0 with im2col fused into the matmul + fused BN statistics.
#
# The padded input is phase-decomposed (space-to-depth by the stride 2) and the 4 qx
# taps are pre-expanded into the channel dim, turning the 7x7/s2 conv into a 4x1/s1
# conv over a (Ho+3, Wo, 16*Cin) image.  Each grid step assembles its im2col block
# from 4 shifted row slices, runs one MXU matmul (bf16 operands, f32 accumulate),
# stores the bf16 activation tile and emits per-channel partial sum / sum-of-squares.
# --------------------------------------------------------------------------
def _conv0_fused_kernel(xqe_ref, w_ref, o_ref, s_ref, q_ref, *, tr, Wo, KQ):
    # xqe_ref: (Hph, Wo, 16*Cin) bf16, resident for all row tiles of this batch element.
    # w_ref:   (KQ*16*Cin, Cout) bf16
    # o_ref:   (tr, Wo, Cout) bf16
    # s_ref/q_ref: (1, Cout) f32 partial stats for this grid step
    r = pl.program_id(1)
    row0 = pl.multiple_of(r * tr, tr)
    band = xqe_ref[pl.ds(row0, tr + KQ - 1), :, :]            # (tr+3, Wo, 16*Cin)
    cols = [band[qy:qy + tr] for qy in range(KQ)]             # 4 x (tr, Wo, 16*Cin)
    patches = jnp.concatenate(cols, axis=-1)                  # (tr, Wo, 64*Cin)
    k = patches.shape[-1]
    acc = jnp.dot(patches.reshape(tr * Wo, k), w_ref[...],
                  preferred_element_type=jnp.float32)          # (tr*Wo, Cout) f32
    o_ref[...] = acc.reshape(o_ref.shape).astype(o_ref.dtype)  # bf16 store
    s_ref[...] = jnp.sum(acc, axis=0, keepdims=True)           # f32 partial sum
    q_ref[...] = jnp.sum(acc * acc, axis=0, keepdims=True)     # f32 partial sum of sq


def conv0_pallas(xqe, w_flat, *, Ho, Wo, Cout, tr, vmem):
    N, Hph, _, Cq = xqe.shape
    KQ = 4
    n_rt = Ho // tr
    return pl.pallas_call(
        functools.partial(_conv0_fused_kernel, tr=tr, Wo=Wo, KQ=KQ),
        out_shape=(
            jax.ShapeDtypeStruct((N, Ho, Wo, Cout), jnp.bfloat16),
            jax.ShapeDtypeStruct((N, n_rt, 1, Cout), jnp.float32),
            jax.ShapeDtypeStruct((N, n_rt, 1, Cout), jnp.float32),
        ),
        grid=(N, n_rt),
        in_specs=[
            # same block for every row tile -> fetched once per batch element
            pl.BlockSpec((None, Hph, Wo, Cq), lambda n, r: (n, 0, 0, 0)),
            pl.BlockSpec((w_flat.shape[0], Cout), lambda n, r: (0, 0)),
        ],
        out_specs=(
            pl.BlockSpec((None, tr, Wo, Cout), lambda n, r: (n, r, 0, 0)),
            pl.BlockSpec((None, None, 1, Cout), lambda n, r: (n, r, 0, 0)),
            pl.BlockSpec((None, None, 1, Cout), lambda n, r: (n, r, 0, 0)),
        ),
        compiler_params=pltpu.CompilerParams(
            dimension_semantics=("parallel", "parallel"),
            vmem_limit_bytes=vmem),
    )(xqe, w_flat)


# --------------------------------------------------------------------------
# Kernel 2: fused BatchNorm affine + ReLU + MaxPool 3x3 / stride 2 / pad 1,
# row-tiled over pooled rows with a 1-row top halo fetched via a second BlockSpec.
# (Pad fill of 0 is equivalent to -inf because pooled values are post-ReLU >= 0;
#  clamping the halo index to 0 at the first tile is exact for the same reason.)
# --------------------------------------------------------------------------
def _bn_relu_maxpool_kernel(x_ref, h_ref, a_ref, b_ref, o_ref, *, tp):
    a = a_ref[...][0]                                          # (C,) f32
    b = b_ref[...][0]                                          # (C,) f32
    x = x_ref[...].astype(jnp.float32)                         # (2*tp, Wo, C)
    y = jnp.maximum(x * a + b, 0.0)
    h = h_ref[...].astype(jnp.float32)                         # (1, Wo, C) halo row
    hy = jnp.maximum(h * a + b, 0.0)

    def wpool(z):                                              # width: cols {2pw-1,2pw,2pw+1}
        Rr, Wf, C = z.shape
        Pw = Wf // 2
        zw = z.reshape(Rr, Pw, 2, C)
        even, odd = zw[:, :, 0, :], zw[:, :, 1, :]
        if Pw > 1:
            prev = jnp.concatenate(
                [jnp.zeros((Rr, 1, C), z.dtype), odd[:, :Pw - 1, :]], axis=1)
        else:
            prev = jnp.zeros_like(even)
        return jnp.maximum(jnp.maximum(prev, even), odd)       # (Rr, Pw, C)

    cmax = wpool(y)                                            # (2*tp, Pw, C)
    hcol = wpool(hy)                                           # (1, Pw, C)
    Pw, C = cmax.shape[1], cmax.shape[2]
    ch = cmax.reshape(tp, 2, Pw, C)                            # height: rows {2p-1,2p,2p+1}
    reven, rodd = ch[:, 0, :, :], ch[:, 1, :, :]
    if tp > 1:
        rprev = jnp.concatenate([hcol, rodd[:tp - 1, :, :]], axis=0)
    else:
        rprev = hcol
    o_ref[...] = jnp.maximum(jnp.maximum(rprev, reven), rodd).astype(o_ref.dtype)


def bn_relu_maxpool(x, a, b, *, vmem):
    N, Ho, Wo, C = x.shape
    Ph, Pw = Ho // 2, Wo // 2
    tp = _pick_pool_row_tile(Ph, Pw, C)
    return pl.pallas_call(
        functools.partial(_bn_relu_maxpool_kernel, tp=tp),
        out_shape=jax.ShapeDtypeStruct((N, Ph, Pw, C), jnp.float32),
        grid=(N, Ph // tp),
        in_specs=[
            # main block: input rows [2*tp*p, 2*tp*(p+1))
            pl.BlockSpec((None, 2 * tp, Wo, C), lambda n, p: (n, p, 0, 0)),
            # 1-row top halo: input row 2*tp*p - 1 (clamped to 0 on the first tile)
            pl.BlockSpec((None, 1, Wo, C),
                         lambda n, p: (n, jnp.maximum(2 * tp * p - 1, 0), 0, 0)),
            pl.BlockSpec((1, C), lambda n, p: (0, 0)),
            pl.BlockSpec((1, C), lambda n, p: (0, 0)),
        ],
        out_specs=pl.BlockSpec((None, tp, Pw, C), lambda n, p: (n, p, 0, 0)),
        compiler_params=pltpu.CompilerParams(
            dimension_semantics=("parallel", "parallel"),
            vmem_limit_bytes=vmem),
    )(x, x, a, b)


# --------------------------------------------------------------------------
# Weight packing: (7,7,Cin,Cout) -> effective 4x4 phase kernel, flattened to
# (4*4*2*2*Cin, Cout) in (qy, qx, py, px, ci) order -- the exact order of the
# pre-expanded phase channels + the in-kernel qy concat.
# --------------------------------------------------------------------------
def _pack_conv0_weight(w_hwio):
    KH, KW, Cin, Cout = w_hwio.shape
    assert KH == 7 and KW == 7
    w_pad = jnp.pad(w_hwio, ((0, 1), (0, 1), (0, 0), (0, 0)))            # 8x8, extra taps = 0
    w_r = w_pad.reshape(4, 2, 4, 2, Cin, Cout).transpose(0, 2, 1, 3, 4, 5)  # (qy,qx,py,px,ci,co)
    return w_r.reshape(4 * 4 * 2 * 2 * Cin, Cout)


# --------------------------------------------------------------------------
# FirstLayer forward.
# --------------------------------------------------------------------------
def first_layer_fwd(x_nchw, params, *, eps=1e-5):
    w_hwio, gamma, beta = params["conv0_w"], params["gamma"], params["beta"]
    N, Cin, H, W = x_nchw.shape
    assert H % 4 == 0 and W % 4 == 0, "kernel assumes H, W divisible by 4"
    Cout = w_hwio.shape[-1]
    Ho, Wo = H // 2, W // 2
    vmem = _vmem_limit_bytes()

    # NCHW -> NHWC, zero-pad by 3, 2x2 space-to-depth (stride-2 phase decomposition),
    # then pre-expand the 4 qx width taps into the channel dim (order qx, py, px, c).
    x = jnp.transpose(x_nchw, (0, 2, 3, 1)).astype(jnp.float32)
    xp = jnp.pad(x, ((0, 0), (3, 3), (3, 3), (0, 0)))
    Hph, Wph = Ho + 3, Wo + 3
    xph = xp.reshape(N, Hph, 2, Wph, 2, Cin).transpose(0, 1, 3, 2, 4, 5)
    xph = xph.reshape(N, Hph, Wph, 4 * Cin)
    xqe = jnp.concatenate([xph[:, :, qx:qx + Wo, :] for qx in range(4)],
                          axis=-1).astype(jnp.bfloat16)                 # (N,Hph,Wo,16*Cin)

    w_flat = _pack_conv0_weight(w_hwio).astype(jnp.bfloat16)

    # conv0 (bias=False) + fused BN partial statistics (from the f32 accumulator).
    tr = _pick_conv_row_tile(Ho, Wo, target_rows=2048 if vmem >= (64 << 20) else 1024)
    conv_bf16, s_part, q_part = conv0_pallas(
        xqe, w_flat, Ho=Ho, Wo=Wo, Cout=Cout, tr=tr, vmem=vmem)          # bf16 feature map

    # norm0: training-mode BatchNorm (batch stats, biased variance).
    R = N * Ho * Wo
    mean = jnp.sum(s_part, axis=(0, 1, 2)) / R
    var = jnp.maximum(jnp.sum(q_part, axis=(0, 1, 2)) / R - mean * mean, 0.0)
    a = (gamma * jax.lax.rsqrt(var + eps)).astype(jnp.float32)
    b = (beta - mean * a).astype(jnp.float32)

    # relu0 + pool0, fused with the BN affine (single HBM read of the bf16 feature map).
    pooled = bn_relu_maxpool(conv_bf16, a.reshape(1, Cout), b.reshape(1, Cout), vmem=vmem)
    return jnp.transpose(pooled, (0, 3, 1, 2))                           # NHWC -> NCHW


# --------------------------------------------------------------------------
# Pure-JAX reference (loose numerical cross-check; bf16 matmul/store tolerance).
# --------------------------------------------------------------------------
def first_layer_ref(x_nchw, w_hwio, gamma, beta, eps=1e-5):
    x = jnp.transpose(x_nchw, (0, 2, 3, 1)).astype(jnp.float32)
    conv = jax.lax.conv_general_dilated(
        x, w_hwio.astype(jnp.float32), window_strides=(2, 2),
        padding=((3, 3), (3, 3)),
        dimension_numbers=("NHWC", "HWIO", "NHWC"))
    mean = jnp.mean(conv, axis=(0, 1, 2))
    var = jnp.mean((conv - mean) ** 2, axis=(0, 1, 2))
    y = jnp.maximum((conv - mean) * jax.lax.rsqrt(var + eps) * gamma + beta, 0.0)
    pooled = jax.lax.reduce_window(
        y, -jnp.inf, jax.lax.max, (1, 3, 3, 1), (1, 2, 2, 1),
        ((0, 0), (1, 1), (1, 1), (0, 0)))
    return jnp.transpose(pooled, (0, 3, 1, 2))


if __name__ == "__main__":
    key = jax.random.PRNGKey(0)
    kw, kg, kb, kx = jax.random.split(key, 4)
    N, Cin, H, W = 2, 1, 32, 32           # module defaults: in_channel=1
    Cout = 64                             # num_init_features=64 (module default)

    w_hwio = jax.random.normal(kw, (7, 7, Cin, Cout), jnp.float32) / jnp.sqrt(49.0 * Cin)
    gamma = 1.0 + 0.1 * jax.random.normal(kg, (Cout,), jnp.float32)
    beta = 0.1 * jax.random.normal(kb, (Cout,), jnp.float32)
    x = jax.random.normal(kx, (N, Cin, H, W), jnp.float32)
    params = {"conv0_w": w_hwio, "gamma": gamma, "beta": beta}

    fwd = jax.jit(lambda xx: first_layer_fwd(xx, params))
    out = fwd(x)
    jax.block_until_ready(out)
    assert out.shape == (N, Cout, H // 4, W // 4), out.shape

    ref = jax.jit(lambda xx: first_layer_ref(xx, w_hwio, gamma, beta))(x)
    jax.block_until_ready(ref)
    err = float(jnp.max(jnp.abs(out - ref)))
    assert err < 1e-1, f"max abs error {err}"

    print("KERNEL_OK")
</pallas_src>

<mosaic_0001>
module attributes {stable_mosaic.version = 11 : i64} {
  func.func @_conv0_fused_kernel(%arg0: i32, %arg1: i32, %arg2: memref<1x19x16x16xbf16, #tpu.memory_space<vmem>>, %arg3: memref<64x64xbf16, #tpu.memory_space<vmem>>, %arg4: memref<1x16x16x64xbf16, #tpu.memory_space<vmem>>, %arg5: memref<1x1x1x64xf32, #tpu.memory_space<vmem>>, %arg6: memref<1x1x1x64xf32, #tpu.memory_space<vmem>>) attributes {dimension_semantics = [#tpu.dimension_semantics<parallel>, #tpu.dimension_semantics<parallel>], iteration_bounds = array<i64: 2, 1>, scalar_prefetch = 0 : i64, scratch_operands = 0 : i64, tpu.core_type = #tpu.core_type<tc>, window_params = [{transform_indices = @transform_0, window_bounds = array<i64: 1, 19, 16, 16>}, {pipeline_mode = #tpu.pipeline_mode<synchronous>, transform_indices = @transform_1, window_bounds = array<i64: 64, 64>}, {transform_indices = @transform_2, window_bounds = array<i64: 1, 16, 16, 64>}, {transform_indices = @transform_3, window_bounds = array<i64: 1, 1, 1, 64>}, {transform_indices = @transform_4, window_bounds = array<i64: 1, 1, 1, 64>}]} {
    %c16_i32 = arith.constant 16 : i32
    %0 = arith.muli %arg1, %c16_i32 : i32
    %1 = tpu.assume_multiple %0, 16 : i32
    %c0 = arith.constant 0 : index
    %2 = arith.index_cast %1 : i32 to index
    %c0_0 = arith.constant 0 : index
    %c0_1 = arith.constant 0 : index
    %3 = vector.load %arg2[%c0, %2, %c0_0, %c0_1] : memref<1x19x16x16xbf16, #tpu.memory_space<vmem>>, vector<1x19x16x16xbf16>
    %4 = vector.shape_cast %3 : vector<1x19x16x16xbf16> to vector<19x16x16xbf16>
    %5 = vector.extract_strided_slice %4 {offsets = [0, 0, 0], sizes = [16, 16, 16], strides = [1, 1, 1]} : vector<19x16x16xbf16> to vector<16x16x16xbf16>
    %6 = vector.extract_strided_slice %4 {offsets = [1, 0, 0], sizes = [16, 16, 16], strides = [1, 1, 1]} : vector<19x16x16xbf16> to vector<16x16x16xbf16>
    %7 = vector.extract_strided_slice %4 {offsets = [2, 0, 0], sizes = [16, 16, 16], strides = [1, 1, 1]} : vector<19x16x16xbf16> to vector<16x16x16xbf16>
    %8 = vector.extract_strided_slice %4 {offsets = [3, 0, 0], sizes = [16, 16, 16], strides = [1, 1, 1]} : vector<19x16x16xbf16> to vector<16x16x16xbf16>
    %9 = tpu.concatenate %5, %6, %7, %8 in 2 : vector<16x16x16xbf16>, vector<16x16x16xbf16>, vector<16x16x16xbf16>, vector<16x16x16xbf16> -> vector<16x16x64xbf16>
    %10 = vector.shape_cast %9 : vector<16x16x64xbf16> to vector<256x64xbf16>
    %c0_2 = arith.constant 0 : index
    %c0_3 = arith.constant 0 : index
    %11 = vector.load %arg3[%c0_2, %c0_3] : memref<64x64xbf16, #tpu.memory_space<vmem>>, vector<64x64xbf16>
    %cst = arith.constant dense<0.000000e+00> : vector<256x64xf32>
    %12 = tpu.matmul %10, %11, %cst {dimension_numbers = #tpu.dot_dimension_numbers<[1], [0], [0], [1], [0, 0, 1, 1], [], []>} : vector<256x64xbf16>, vector<64x64xbf16>, vector<256x64xf32> -> vector<256x64xf32>
    %13 = vector.shape_cast %12 : vector<256x64xf32> to vector<16x16x64xf32>
    %14 = arith.truncf %13 : vector<16x16x64xf32> to vector<16x16x64xbf16>
    %c0_4 = arith.constant 0 : index
    %c0_5 = arith.constant 0 : index
    %c0_6 = arith.constant 0 : index
    %c0_7 = arith.constant 0 : index
    %15 = vector.load %arg4[%c0_4, %c0_5, %c0_6, %c0_7] : memref<1x16x16x64xbf16, #tpu.memory_space<vmem>>, vector<1x16x16x64xbf16>
    %16 = vector.shape_cast %15 : vector<1x16x16x64xbf16> to vector<16x16x64xbf16>
    %17 = vector.shape_cast %14 : vector<16x16x64xbf16> to vector<1x16x16x64xbf16>
    tpu.vector_store %arg4[%c0_4, %c0_5, %c0_6, %c0_7], %17 {strides = array<i32>} : memref<1x16x16x64xbf16, #tpu.memory_space<vmem>>, vector<1x16x16x64xbf16>,
    %cst_8 = arith.constant dense<0.000000e+00> : vector<64xf32>
    %18 = vector.multi_reduction <add>, %12, %cst_8 [0] : vector<256x64xf32> to vector<64xf32>
    %19 = vector.shape_cast %18 : vector<64xf32> to vector<1x64xf32>
    %c0_9 = arith.constant 0 : index
    %c0_10 = arith.constant 0 : index
    %c0_11 = arith.constant 0 : index
    %c0_12 = arith.constant 0 : index
    %20 = vector.load %arg5[%c0_9, %c0_10, %c0_11, %c0_12] : memref<1x1x1x64xf32, #tpu.memory_space<vmem>>, vector<1x1x1x64xf32>
    %21 = vector.shape_cast %20 : vector<1x1x1x64xf32> to vector<1x64xf32>
    %22 = vector.shape_cast %19 : vector<1x64xf32> to vector<1x1x1x64xf32>
    tpu.vector_store %arg5[%c0_9, %c0_10, %c0_11, %c0_12], %22 {strides = array<i32>} : memref<1x1x1x64xf32, #tpu.memory_space<vmem>>, vector<1x1x1x64xf32>,
    %23 = arith.mulf %12, %12 : vector<256x64xf32>
    %cst_13 = arith.constant dense<0.000000e+00> : vector<64xf32>
    %24 = vector.multi_reduction <add>, %23, %cst_13 [0] : vector<256x64xf32> to vector<64xf32>
    %25 = vector.shape_cast %24 : vector<64xf32> to vector<1x64xf32>
    %c0_14 = arith.constant 0 : index
    %c0_15 = arith.constant 0 : index
    %c0_16 = arith.constant 0 : index
    %c0_17 = arith.constant 0 : index
    %26 = vector.load %arg6[%c0_14, %c0_15, %c0_16, %c0_17] : memref<1x1x1x64xf32, #tpu.memory_space<vmem>>, vector<1x1x1x64xf32>
    %27 = vector.shape_cast %26 : vector<1x1x1x64xf32> to vector<1x64xf32>
    %28 = vector.shape_cast %25 : vector<1x64xf32> to vector<1x1x1x64xf32>
    tpu.vector_store %arg6[%c0_14, %c0_15, %c0_16, %c0_17], %28 {strides = array<i32>} : memref<1x1x1x64xf32, #tpu.memory_space<vmem>>, vector<1x1x1x64xf32>,
    return
  }
  func.func @transform_0(%arg0: i32, %arg1: i32) -> (i32, i32, i32, i32) {
    %c0_i32 = arith.constant 0 : i32
    %c0_i32_0 = arith.constant 0 : i32
    %c0_i32_1 = arith.constant 0 : i32
    %c0_i32_2 = arith.constant 0 : i32
    return %arg0, %c0_i32, %c0_i32_0, %c0_i32_1 : i32, i32, i32, i32
  }
  func.func @transform_1(%arg0: i32, %arg1: i32) -> (i32, i32) {
    %c0_i32 = arith.constant 0 : i32
    %c0_i32_0 = arith.constant 0 : i32
    %c0_i32_1 = arith.constant 0 : i32
    return %c0_i32, %c0_i32_0 : i32, i32
  }
  func.func @transform_2(%arg0: i32, %arg1: i32) -> (i32, i32, i32, i32) {
    %c0_i32 = arith.constant 0 : i32
    %c0_i32_0 = arith.constant 0 : i32
    %c0_i32_1 = arith.constant 0 : i32
    return %arg0, %arg1, %c0_i32, %c0_i32_0 : i32, i32, i32, i32
  }
  func.func @transform_3(%arg0: i32, %arg1: i32) -> (i32, i32, i32, i32) {
    %c0_i32 = arith.constant 0 : i32
    %c0_i32_0 = arith.constant 0 : i32
    %c0_i32_1 = arith.constant 0 : i32
    return %arg0, %arg1, %c0_i32, %c0_i32_0 : i32, i32, i32, i32
  }
  func.func @transform_4(%arg0: i32, %arg1: i32) -> (i32, i32, i32, i32) {
    %c0_i32 = arith.constant 0 : i32
    %c0_i32_0 = arith.constant 0 : i32
    %c0_i32_1 = arith.constant 0 : i32
    return %arg0, %arg1, %c0_i32, %c0_i32_0 : i32, i32, i32, i32
  }
}

module attributes {stable_mosaic.version = 11 : i64} {
  func.func @_bn_relu_maxpool_kernel(%arg0: i32, %arg1: i32, %arg2: memref<1x16x16x64xbf16, #tpu.memory_space<vmem>>, %arg3: memref<1x1x16x64xbf16, #tpu.memory_space<vmem>>, %arg4: memref<1x64xf32, #tpu.memory_space<vmem>>, %arg5: memref<1x64xf32, #tpu.memory_space<vmem>>, %arg6: memref<1x8x8x64xf32, #tpu.memory_space<vmem>>) attributes {dimension_semantics = [#tpu.dimension_semantics<parallel>, #tpu.dimension_semantics<parallel>], iteration_bounds = array<i64: 2, 1>, scalar_prefetch = 0 : i64, scratch_operands = 0 : i64, tpu.core_type = #tpu.core_type<tc>, window_params = [{transform_indices = @transform_0, window_bounds = array<i64: 1, 16, 16, 64>}, {transform_indices = @transform_1, window_bounds = array<i64: 1, 1, 16, 64>}, {pipeline_mode = #tpu.pipeline_mode<synchronous>, transform_indices = @transform_2, window_bounds = array<i64: 1, 64>}, {pipeline_mode = #tpu.pipeline_mode<synchronous>, transform_indices = @transform_3, window_bounds = array<i64: 1, 64>}, {transform_indices = @transform_4, window_bounds = array<i64: 1, 8, 8, 64>}]} {
    %c0 = arith.constant 0 : index
    %c0_0 = arith.constant 0 : index
    %0 = vector.load %arg4[%c0, %c0_0] : memref<1x64xf32, #tpu.memory_space<vmem>>, vector<1x64xf32>
    %1 = vector.shape_cast %0 : vector<1x64xf32> to vector<64xf32>
    %c0_1 = arith.constant 0 : index
    %c0_2 = arith.constant 0 : index
    %2 = vector.load %arg5[%c0_1, %c0_2] : memref<1x64xf32, #tpu.memory_space<vmem>>, vector<1x64xf32>
    %3 = vector.shape_cast %2 : vector<1x64xf32> to vector<64xf32>
    %c0_3 = arith.constant 0 : index
    %c0_4 = arith.constant 0 : index
    %c0_5 = arith.constant 0 : index
    %c0_6 = arith.constant 0 : index
    %4 = vector.load %arg2[%c0_3, %c0_4, %c0_5, %c0_6] : memref<1x16x16x64xbf16, #tpu.memory_space<vmem>>, vector<1x16x16x64xbf16>
    %5 = vector.shape_cast %4 : vector<1x16x16x64xbf16> to vector<16x16x64xbf16>
    %6 = arith.extf %5 : vector<16x16x64xbf16> to vector<16x16x64xf32>
    %7 = vector.shape_cast %1 : vector<64xf32> to vector<1x1x64xf32>
    %8 = vector.broadcast %7 : vector<1x1x64xf32> to vector<16x16x64xf32>
    %9 = arith.mulf %6, %8 : vector<16x16x64xf32>
    %10 = vector.shape_cast %3 : vector<64xf32> to vector<1x1x64xf32>
    %11 = vector.broadcast %10 : vector<1x1x64xf32> to vector<16x16x64xf32>
    %12 = arith.addf %9, %11 : vector<16x16x64xf32>
    %cst = arith.constant 0.000000e+00 : f32
    %13 = vector.broadcast %cst : f32 to vector<16x16x64xf32>
    %14 = arith.maximumf %12, %13 : vector<16x16x64xf32>
    %c0_7 = arith.constant 0 : index
    %c0_8 = arith.constant 0 : index
    %c0_9 = arith.constant 0 : index
    %c0_10 = arith.constant 0 : index
    %15 = vector.load %arg3[%c0_7, %c0_8, %c0_9, %c0_10] : memref<1x1x16x64xbf16, #tpu.memory_space<vmem>>, vector<1x1x16x64xbf16>
    %16 = vector.shape_cast %15 : vector<1x1x16x64xbf16> to vector<1x16x64xbf16>
    %17 = arith.extf %16 : vector<1x16x64xbf16> to vector<1x16x64xf32>
    %18 = vector.shape_cast %1 : vector<64xf32> to vector<1x1x64xf32>
    %19 = vector.broadcast %18 : vector<1x1x64xf32> to vector<1x16x64xf32>
    %20 = arith.mulf %17, %19 : vector<1x16x64xf32>
    %21 = vector.shape_cast %3 : vector<64xf32> to vector<1x1x64xf32>
    %22 = vector.broadcast %21 : vector<1x1x64xf32> to vector<1x16x64xf32>
    %23 = arith.addf %20, %22 : vector<1x16x64xf32>
    %cst_11 = arith.constant 0.000000e+00 : f32
    %24 = vector.broadcast %cst_11 : f32 to vector<1x16x64xf32>
    %25 = arith.maximumf %23, %24 : vector<1x16x64xf32>
    %26 = vector.shape_cast %14 : vector<16x16x64xf32> to vector<16x8x2x64xf32>
    %27 = vector.extract_strided_slice %26 {offsets = [0, 0, 0, 0], sizes = [16, 8, 1, 64], strides = [1, 1, 1, 1]} : vector<16x8x2x64xf32> to vector<16x8x1x64xf32>
    %28 = vector.shape_cast %27 : vector<16x8x1x64xf32> to vector<16x8x64xf32>
    %29 = vector.extract_strided_slice %26 {offsets = [0, 0, 1, 0], sizes = [16, 8, 1, 64], strides = [1, 1, 1, 1]} : vector<16x8x2x64xf32> to vector<16x8x1x64xf32>
    %30 = vector.shape_cast %29 : vector<16x8x1x64xf32> to vector<16x8x64xf32>
    %cst_12 = arith.constant 0.000000e+00 : f32
    %31 = vector.broadcast %cst_12 : f32 to vector<16x1x64xf32>
    %32 = vector.extract_strided_slice %30 {offsets = [0, 0, 0], sizes = [16, 7, 64], strides = [1, 1, 1]} : vector<16x8x64xf32> to vector<16x7x64xf32>
    %33 = tpu.concatenate %31, %32 in 1 : vector<16x1x64xf32>, vector<16x7x64xf32> -> vector<16x8x64xf32>
    %34 = arith.maximumf %33, %28 : vector<16x8x64xf32>
    %35 = arith.maximumf %34, %30 : vector<16x8x64xf32>
    %36 = vector.shape_cast %25 : vector<1x16x64xf32> to vector<1x8x2x64xf32>
    %37 = vector.extract_strided_slice %36 {offsets = [0, 0, 0, 0], sizes = [1, 8, 1, 64], strides = [1, 1, 1, 1]} : vector<1x8x2x64xf32> to vector<1x8x1x64xf32>
    %38 = vector.shape_cast %37 : vector<1x8x1x64xf32> to vector<1x8x64xf32>
    %39 = vector.extract_strided_slice %36 {offsets = [0, 0, 1, 0], sizes = [1, 8, 1, 64], strides = [1, 1, 1, 1]} : vector<1x8x2x64xf32> to vector<1x8x1x64xf32>
    %40 = vector.shape_cast %39 : vector<1x8x1x64xf32> to vector<1x8x64xf32>
    %cst_13 = arith.constant 0.000000e+00 : f32
    %41 = vector.broadcast %cst_13 : f32 to vector<1x1x64xf32>
    %42 = vector.extract_strided_slice %40 {offsets = [0, 0, 0], sizes = [1, 7, 64], strides = [1, 1, 1]} : vector<1x8x64xf32> to vector<1x7x64xf32>
    %43 = tpu.concatenate %41, %42 in 1 : vector<1x1x64xf32>, vector<1x7x64xf32> -> vector<1x8x64xf32>
    %44 = arith.maximumf %43, %38 : vector<1x8x64xf32>
    %45 = arith.maximumf %44, %40 : vector<1x8x64xf32>
    %46 = vector.shape_cast %35 : vector<16x8x64xf32> to vector<8x2x8x64xf32>
    %47 = vector.extract_strided_slice %46 {offsets = [0, 0, 0, 0], sizes = [8, 1, 8, 64], strides = [1, 1, 1, 1]} : vector<8x2x8x64xf32> to vector<8x1x8x64xf32>
    %48 = vector.shape_cast %47 : vector<8x1x8x64xf32> to vector<8x8x64xf32>
    %49 = vector.extract_strided_slice %46 {offsets = [0, 1, 0, 0], sizes = [8, 1, 8, 64], strides = [1, 1, 1, 1]} : vector<8x2x8x64xf32> to vector<8x1x8x64xf32>
    %50 = vector.shape_cast %49 : vector<8x1x8x64xf32> to vector<8x8x64xf32>
    %51 = vector.extract_strided_slice %50 {offsets = [0, 0, 0], sizes = [7, 8, 64], strides = [1, 1, 1]} : vector<8x8x64xf32> to vector<7x8x64xf32>
    %52 = tpu.concatenate %45, %51 in 0 : vector<1x8x64xf32>, vector<7x8x64xf32> -> vector<8x8x64xf32>
    %53 = arith.maximumf %52, %48 : vector<8x8x64xf32>
    %54 = arith.maximumf %53, %50 : vector<8x8x64xf32>
    %c0_14 = arith.constant 0 : index
    %c0_15 = arith.constant 0 : index
    %c0_16 = arith.constant 0 : index
    %c0_17 = arith.constant 0 : index
    %55 = vector.load %arg6[%c0_14, %c0_15, %c0_16, %c0_17] : memref<1x8x8x64xf32, #tpu.memory_space<vmem>>, vector<1x8x8x64xf32>
    %56 = vector.shape_cast %55 : vector<1x8x8x64xf32> to vector<8x8x64xf32>
    %57 = vector.shape_cast %54 : vector<8x8x64xf32> to vector<1x8x8x64xf32>
    tpu.vector_store %arg6[%c0_14, %c0_15, %c0_16, %c0_17], %57 {strides = array<i32>} : memref<1x8x8x64xf32, #tpu.memory_space<vmem>>, vector<1x8x8x64xf32>,
    return
  }
  func.func @transform_0(%arg0: i32, %arg1: i32) -> (i32, i32, i32, i32) {
    %c0_i32 = arith.constant 0 : i32
    %c0_i32_0 = arith.constant 0 : i32
    %c0_i32_1 = arith.constant 0 : i32
    return %arg0, %arg1, %c0_i32, %c0_i32_0 : i32, i32, i32, i32
  }
  func.func @transform_1(%arg0: i32, %arg1: i32) -> (i32, i32, i32, i32) {
    %c16_i32 = arith.constant 16 : i32
    %0 = arith.muli %c16_i32, %arg1 : i32
    %c1_i32 = arith.constant 1 : i32
    %1 = arith.subi %0, %c1_i32 : i32
    %c0_i32 = arith.constant 0 : i32
    %2 = arith.maxsi %1, %c0_i32 : i32
    %c0_i32_0 = arith.constant 0 : i32
    %c0_i32_1 = arith.constant 0 : i32
    %c0_i32_2 = arith.constant 0 : i32
    return %arg0, %2, %c0_i32_0, %c0_i32_1 : i32, i32, i32, i32
  }
  func.func @transform_2(%arg0: i32, %arg1: i32) -> (i32, i32) {
    %c0_i32 = arith.constant 0 : i32
    %c0_i32_0 = arith.constant 0 : i32
    %c0_i32_1 = arith.constant 0 : i32
    return %c0_i32, %c0_i32_0 : i32, i32
  }
  func.func @transform_3(%arg0: i32, %arg1: i32) -> (i32, i32) {
    %c0_i32 = arith.constant 0 : i32
    %c0_i32_0 = arith.constant 0 : i32
    %c0_i32_1 = arith.constant 0 : i32
    return %c0_i32, %c0_i32_0 : i32, i32
  }
  func.func @transform_4(%arg0: i32, %arg1: i32) -> (i32, i32, i32, i32) {
    %c0_i32 = arith.constant 0 : i32
    %c0_i32_0 = arith.constant 0 : i32
    %c0_i32_1 = arith.constant 0 : i32
    return %arg0, %arg1, %c0_i32, %c0_i32_0 : i32, i32, i32, i32
  }
}

</mosaic_0001>

<bundles_post_ra>
// kernel: _lambda_.2
= control target key start
LH: loop header
LB: loop body
LE: loop exit
PB: predicated region body
PF: predicated region fallthrough
CT: control target
= control target key end

     0   :  { %s1390_s15 = smov 0   ;;  %s1392_s16 = smov 0   ;;  %s1881_s0 = inlined_call_operand.vmem [shape: bf16[2,19,16,16], index: 0, kind: input, shape index: {}]   ;;  %s1882_s1 = inlined_call_operand.vmem [shape: bf16[64,64], index: 1, kind: input, shape index: {}]   ;;  %s1883_s2 = inlined_call_operand.vmem [shape: bf16[2,16,16,64], index: 2, kind: output, shape index: {0}]   ;;  %s1884_s3 = inlined_call_operand.vmem [shape: f32[2,1,1,64], index: 3, kind: output, shape index: {1}]   ;;  %s1885_s4 = inlined_call_operand.vmem [shape: f32[2,1,1,64], index: 4, kind: output, shape index: {2}]  }
   0x1   :  { %s1394_s17 = smov 0  }
   0x2 LB: > { %s27_s18 = sadd.s32 1, %s1356_s16  ;;  %p1160_p0 = scmp.ge.s32.totalorder %s1360_s17, 1  ;;  %s1360_s17 = sphi %s1394_s17, %s15_s17   ;;  %s1356_s16 = sphi %s1392_s16, %s1887_s16   ;;  %s1352_s15 = sphi %s1390_s15, %s1886_s15  }
   0x3   : > { %p29_p1 = scmp.ge.s32.totalorder %s27_s18, 2  ;;  %p185_p2 = scmp.lt.s32.totalorder %s1360_s17, 3 }
   0x5   : > { %s1889_s18 = smov (%p29_p1, %s27_s18), 0  ;;  %p186_p3 = pnand %p1160_p0, %p185_p2 }
   0x6   : > { %p228_p4 = scmp.lt.s32.totalorder (!%p186_p3), %s1352_s15, 1  ;;  %s1362_s23 = smov (!%p186_p3), 48  }
   0x7   : > { %189 = sbr.rel (%p186_p3) target bundleno = 420 (0x1a4), region = 28  ;;  %s1363_s24 = smov (!%p186_p3), 16  }
   0x8   : > { %s1364_s25 = smov (!%p186_p3), 32  }
   0xc   : > { %s1891_s15 = smov (!%p228_p4, %s1352_s15), 1  ;;  %v1297_v15 = vld [vmem:[%s1882_s1 + $0x18] sm:$0xff]  ;;  %v1296_v16 = vld [vmem:[%s1882_s1 + $0x10] sm:$0xff]  ;;  %v1295_v17 = vld [vmem:[%s1882_s1 + $0x8] sm:$0xff]  ;;  %vm490_vm0 = vcmask 130048   ;;  %vm539_vm1 = vcmask 261120  }
   0xd   : > { %s1310_s19 = smul.u32 152, %s1891_s15  ;;  %674 = vmatpush.bf16.msra.mxu0 %v1297_v15  ;;  %1298 = vmatpush.bf16.msra.mxu1 %v1297_v15  ;;  %v1294_v19 = vld [vmem:[%s1882_s1] sm:$0xff]  ;;  %vm572_vm2 = vcmask 392192   ;;  %vm637_vm3 = vcmask 523264   ;;  %s1274_s8 = sshll.u32 %s1891_s15, 7  ;;  %vm791_vm4 = vcmask 519168  }
   0xe   : > { %1299 = vmatpush.bf16.msra.mxu2 %v1297_v15  ;;  %1300 = vmatpush.bf16.msra.mxu3 %v1297_v15  ;;  %s1650_s11 = scalar_lea.vmem %s1883_s2, %s1274_s8  ;;  %s249_s14 = scalar_lea.vmem %s1884_s3, %s1891_s15  ;;  %vm893_vm5 = vcmask 516096  }
   0xf   : > { %s1414_s22 = scalar_lea.vmem %s1881_s0, %s1310_s19  ;;  %s255_s21 = scalar_lea.vmem %s1885_s4, %s1891_s15 }
  0x10   : > { %v1417_v0 = vld [vmem:[%s1414_s22 + $0x18] sm:$0xff]  ;;  %v1420_v1 = vld [vmem:[%s1414_s22 + $0x8] sm:$0xff]  ;;  %v1432_v3 = vld [vmem:[%s1414_s22 + $0x10] sm:$0xff] }
  0x11   : > { %458 = vrot.lane.b32.xlu1 %v1417_v0, %s1362_s23  ;;  %384 = vrot.lane.b32.xlu0 %v1420_v1, %s1363_s24  ;;  %v1427_v2 = vld [vmem:[%s1414_s22 + $0x28] sm:$0xff]  ;;  %v1441_v4 = vld [vmem:[%s1414_s22 + $0x20] sm:$0xff] }
  0x12   : > { %392 = vrot.lane.b32.xlu2 %v1427_v2, %s1363_s24  ;;  %v1444_v5 = vld [vmem:[%s1414_s22 + $0x30] sm:$0xff]  ;;  %v1447_v6 = vld [vmem:[%s1414_s22 + $0x38] sm:$0xff]  ;;  %v1459_v8 = vld [vmem:[%s1414_s22 + $0x48] sm:$0xff]  ;;  %675 = vmatpush.bf16.msra.mxu0 %v1296_v16 }
  0x13   : > { %v1456_v7 = vld [vmem:[%s1414_s22 + $0x50] sm:$0xff]  ;;  %v1462_v9 = vld [vmem:[%s1414_s22 + $0x58] sm:$0xff]  ;;  %v1477_v10 = vld [vmem:[%s1414_s22 + $0x40] sm:$0xff]  ;;  %1301 = vmatpush.bf16.msra.mxu1 %v1296_v16  ;;  %1302 = vmatpush.bf16.msra.mxu2 %v1296_v16 }
  0x14   : > { %v1486_v11 = vld [vmem:[%s1414_s22 + $0x68] sm:$0xff]  ;;  %v1495_v12 = vld [vmem:[%s1414_s22 + $0x60] sm:$0xff]  ;;  %v1498_v13 = vld [vmem:[%s1414_s22 + $0x70] sm:$0xff]  ;;  %1303 = vmatpush.bf16.msra.mxu3 %v1296_v16 }
  0x15   : > { %v1501_v14 = vld [vmem:[%s1414_s22 + $0x78] sm:$0xff]  ;;  %v1291_v18 = vld [vmem:[%s1414_s22 + $0x80] sm:$0xff]  ;;  %v1292_v23 = vld [vmem:[%s1414_s22 + $0x88] sm:$0xff] }
  0x16   : > { %676 = vmatpush.bf16.msra.mxu0 %v1295_v17  ;;  %v1275_v27 = vld [vmem:[%s1414_s22] sm:$0xff]  ;;  %v1293_v28 = vld [vmem:[%s1414_s22 + $0x90] sm:$0xff] }
  0x17   : > { %1304 = vmatpush.bf16.msra.mxu1 %v1295_v17  ;;  %1305 = vmatpush.bf16.msra.mxu2 %v1295_v17 }
  0x18   : > { %1306 = vmatpush.bf16.msra.mxu3 %v1295_v17 }
  0x19   : > { %386 = vrot.lane.b32.xlu1 %v1432_v3, %s1363_s24  ;;  %421 = vrot.lane.b32.xlu0 %v1432_v3, %s1364_s25 }
  0x1a   : > { %423 = vrot.lane.b32.xlu2 %v1417_v0, %s1364_s25  ;;  %677 = vmatpush.bf16.msra.mxu0 %v1294_v19 }
  0x1b   : > { %1307 = vmatpush.bf16.msra.mxu1 %v1294_v19  ;;  %1308 = vmatpush.bf16.msra.mxu2 %v1294_v19 }
  0x1c   : > { %1309 = vmatpush.bf16.msra.mxu3 %v1294_v19 }
  0x21   : > { %460 = vrot.lane.b32.xlu1 %v1441_v4, %s1362_s23  ;;  %429 = vrot.lane.b32.xlu0 %v1444_v5, %s1364_s25 }
  0x22   : > { %466 = vrot.lane.b32.xlu2 %v1447_v6, %s1362_s23 }
  0x29   : > { %437 = vrot.lane.b32.xlu1 %v1456_v7, %s1364_s25  ;;  %400 = vrot.lane.b32.xlu0 %v1459_v8, %s1363_s24 }
  0x2a   : > { %474 = vrot.lane.b32.xlu2 %v1462_v9, %s1362_s23 }
  0x31   : > { %394 = vrot.lane.b32.xlu1 %v1444_v5, %s1363_s24  ;;  %388 = vrot.lane.b32.xlu0 %v1417_v0, %s1363_s24 }
  0x32   : > { %425 = vrot.lane.b32.xlu2 %v1441_v4, %s1364_s25 }
  0x39   : > { %462 = vrot.lane.b32.xlu1 %v1427_v2, %s1362_s23  ;;  %431 = vrot.lane.b32.xlu0 %v1447_v6, %s1364_s25 }
  0x3a   : > { %468 = vrot.lane.b32.xlu2 %v1477_v10, %s1362_s23 }
  0x41   : > { %408 = vrot.lane.b32.xlu1 %v1486_v11, %s1363_s24  ;;  %402 = vrot.lane.b32.xlu0 %v1456_v7, %s1363_s24 }
  0x42   : > { %439 = vrot.lane.b32.xlu2 %v1462_v9, %s1364_s25 }
  0x49   : > { %476 = vrot.lane.b32.xlu1 %v1495_v12, %s1362_s23  ;;  %445 = vrot.lane.b32.xlu0 %v1498_v13, %s1364_s25 }
  0x4a   : > { %482 = vrot.lane.b32.xlu2 %v1501_v14, %s1362_s23 }
  0x51   : > { %396 = vrot.lane.b32.xlu1 %v1447_v6, %s1363_s24  ;;  %390 = vrot.lane.b32.xlu0 %v1441_v4, %s1363_s24 }
  0x52   : > { %427 = vrot.lane.b32.xlu2 %v1427_v2, %s1364_s25 }
  0x59   : > { %464 = vrot.lane.b32.xlu1 %v1444_v5, %s1362_s23  ;;  %433 = vrot.lane.b32.xlu0 %v1477_v10, %s1364_s25 }
  0x5a   : > { %470 = vrot.lane.b32.xlu2 %v1459_v8, %s1362_s23 }
  0x61   : > { %410 = vrot.lane.b32.xlu1 %v1498_v13, %s1363_s24  ;;  %404 = vrot.lane.b32.xlu0 %v1462_v9, %s1363_s24 }
  0x62   : > { %441 = vrot.lane.b32.xlu2 %v1495_v12, %s1364_s25 }
  0x69   : > { %478 = vrot.lane.b32.xlu1 %v1486_v11, %s1362_s23  ;;  %447 = vrot.lane.b32.xlu0 %v1501_v14, %s1364_s25 }
  0x6a   : > { %484 = vrot.lane.b32.xlu2 %v1291_v18, %s1362_s23 }
  0x6c   : > { %v393_v20 = vpop.permute.xlu2 %392 }
  0x6d   : > { %v505_v35 = vsel %vm490_vm0, %v1441_v4, %v393_v20 }
  0x71   : > { %435 = vrot.lane.b32.xlu1 %v1459_v8, %s1364_s25  ;;  %398 = vrot.lane.b32.xlu0 %v1477_v10, %s1363_s24 }
  0x72   : > { %472 = vrot.lane.b32.xlu2 %v1456_v7, %s1362_s23 }
  0x74   : > { %v424_v21 = vpop.permute.xlu2 %423 }
  0x79   : > { %412 = vrot.lane.b32.xlu1 %v1501_v14, %s1363_s24  ;;  %406 = vrot.lane.b32.xlu0 %v1495_v12, %s1363_s24 }
  0x7a   : > { %443 = vrot.lane.b32.xlu2 %v1486_v11, %s1364_s25 }
  0x7c   : > { %v467_v22 = vpop.permute.xlu2 %466 }
  0x81   : > { %480 = vrot.lane.b32.xlu1 %v1498_v13, %s1362_s23  ;;  %449 = vrot.lane.b32.xlu0 %v1291_v18, %s1364_s25 }
  0x82   : > { %486 = vrot.lane.b32.xlu2 %v1292_v23, %s1362_s23 }
  0x83   : > { %v459_v24 = vpop.permute.xlu1 %458  ;;  %v385_v25 = vpop.permute.xlu0 %384 }
  0x84   : > { %v475_v26 = vpop.permute.xlu2 %474  ;;  %v493_v29 = vsel %vm490_vm0, %v1275_v27, %v385_v25 }
  0x89   : > { %414 = vrot.lane.b32.xlu0 %v1291_v18, %s1363_s24  ;;  %451 = vrot.lane.b32.xlu1 %v1292_v23, %s1364_s25 }
  0x8a   : > { %488 = vrot.lane.b32.xlu2 %v1293_v28, %s1362_s23 }
  0x8b   : > { %v387_v30 = vpop.permute.xlu1 %386  ;;  %v422_v31 = vpop.permute.xlu0 %421 }
  0x8c   : > { %v541_v32 = vsel %vm539_vm1, %v493_v29, %v422_v31  ;;  %v426_v34 = vpop.permute.xlu2 %425  ;;  %v496_v41 = vsel %vm490_vm0, %v1420_v1, %v387_v30 }
  0x8d   : > { %v574_v33 = vsel %vm572_vm2, %v541_v32, %v459_v24  ;;  %v543_v44 = vsel %vm539_vm1, %v496_v41, %v424_v21 }
  0x8e   : > { %1256 = vmatmul.msk.bf16.vlgmr.msra.gmra.mxu0 %vm637_vm3, %v574_v33 }
  0x93   : > { %v461_v36 = vpop.permute.xlu1 %460  ;;  %v430_v37 = vpop.permute.xlu0 %429 }
  0x94   : > { %v549_v38 = vsel %vm539_vm1, %v505_v35, %v430_v37  ;;  %v469_v40 = vpop.permute.xlu2 %468  ;;  %v576_v46 = vsel %vm572_vm2, %v543_v44, %v461_v36 }
  0x95   : > { %v582_v39 = vsel %vm572_vm2, %v549_v38, %v467_v22 }
  0x96   : > { %1260 = vmatmul.msk.bf16.vlgmr.msra.gmra.mxu1 %vm637_vm3, %v582_v39 }
  0x9b   : > { %v438_v42 = vpop.permute.xlu1 %437  ;;  %v401_v43 = vpop.permute.xlu0 %400 }
  0x9c   : > { %v517_v45 = vsel %vm490_vm0, %v1477_v10, %v401_v43  ;;  %v440_v49 = vpop.permute.xlu2 %439 }
  0x9d   : > { %v557_v47 = vsel %vm539_vm1, %v517_v45, %v438_v42 }
  0x9e   : > { %1257 = vmatmul.msk.bf16.gmra.mxu0 %vm637_vm3, %v576_v46  ;;  %v590_v48 = vsel %vm572_vm2, %v557_v47, %v475_v26 }
  0x9f   : > { %1264 = vmatmul.msk.bf16.vlgmr.msra.gmra.mxu2 %vm637_vm3, %v590_v48 }
  0xa3   : > { %v395_v50 = vpop.permute.xlu1 %394  ;;  %v389_v51 = vpop.permute.xlu0 %388 }
  0xa4   : > { %v499_v52 = vsel %vm490_vm0, %v1432_v3, %v389_v51  ;;  %v508_v53 = vsel %vm490_vm0, %v1427_v2, %v395_v50  ;;  %v483_v59 = vpop.permute.xlu2 %482 }
  0xa5   : > { %v545_v54 = vsel %vm539_vm1, %v499_v52, %v426_v34 }
  0xab   : > { %v463_v55 = vpop.permute.xlu1 %462  ;;  %v432_v56 = vpop.permute.xlu0 %431 }
  0xac   : > { %v551_v57 = vsel %vm539_vm1, %v508_v53, %v432_v56  ;;  %v578_v58 = vsel %vm572_vm2, %v545_v54, %v463_v55  ;;  %v428_v63 = vpop.permute.xlu2 %427 }
  0xad   : > { %v584_v60 = vsel %vm572_vm2, %v551_v57, %v469_v40 }
  0xae   : > { %1258 = vmatmul.msk.bf16.gmra.mxu0 %vm637_vm3, %v578_v58  ;;  %1261 = vmatmul.msk.bf16.gmra.mxu1 %vm637_vm3, %v584_v60 }
  0xb3   : > { %v409_v61 = vpop.permute.xlu1 %408  ;;  %v403_v62 = vpop.permute.xlu0 %402 }
  0xb4   : > { %v520_v1 = vsel %vm490_vm0, %v1459_v8, %v403_v62  ;;  %v529_v2 = vsel %vm490_vm0, %v1495_v12, %v409_v61  ;;  %v471_v18 = vpop.permute.xlu2 %470 }
  0xb5   : > { %v559_v3 = vsel %vm539_vm1, %v520_v1, %v440_v49 }
  0xbb   : > { %v477_v4 = vpop.permute.xlu1 %476  ;;  %v446_v10 = vpop.permute.xlu0 %445 }
  0xbc   : > { %v565_v15 = vsel %vm539_vm1, %v529_v2, %v446_v10  ;;  %v592_v16 = vsel %vm572_vm2, %v559_v3, %v477_v4  ;;  %v442_v20 = vpop.permute.xlu2 %441 }
  0xbd   : > { %1265 = vmatmul.msk.bf16.gmra.mxu2 %vm637_vm3, %v592_v16  ;;  %v598_v17 = vsel %vm572_vm2, %v565_v15, %v483_v59 }
  0xbe   : > { %1268 = vmatmul.msk.bf16.vlgmr.msra.gmra.mxu3 %vm637_vm3, %v598_v17 }
  0xc3   : > { %v397_v19 = vpop.permute.xlu1 %396  ;;  %v391_v8 = vpop.permute.xlu0 %390 }
  0xc4   : > { %v502_v12 = vsel %vm490_vm0, %v1417_v0, %v391_v8  ;;  %v511_v21 = vsel %vm490_vm0, %v1444_v5, %v397_v19  ;;  %v485_v29 = vpop.permute.xlu2 %484 }
  0xc5   : > { %v547_v22 = vsel %vm539_vm1, %v502_v12, %v428_v63 }
  0xcb   : > { %v465_v23 = vpop.permute.xlu1 %464  ;;  %v434_v24 = vpop.permute.xlu0 %433 }
  0xcc   : > { %v553_v25 = vsel %vm539_vm1, %v511_v21, %v434_v24  ;;  %v580_v26 = vsel %vm572_vm2, %v547_v22, %v465_v23  ;;  %v473_v37 = vpop.permute.xlu2 %472 }
  0xcd   : > { %1259 = vmatmul.msk.bf16.gmra.mxu0 %vm637_vm3, %v580_v26  ;;  %v586_v27 = vsel %vm572_vm2, %v553_v25, %v471_v18 }
  0xce   : > { %1262 = vmatmul.msk.bf16.gmra.mxu1 %vm637_vm3, %v586_v27 }
  0xd3   : > { %v411_v28 = vpop.permute.xlu1 %410  ;;  %v405_v0 = vpop.permute.xlu0 %404 }
  0xd4   : > { %v523_v5 = vsel %vm490_vm0, %v1456_v7, %v405_v0  ;;  %v532_v30 = vsel %vm490_vm0, %v1486_v11, %v411_v28  ;;  %v444_v41 = vpop.permute.xlu2 %443 }
  0xd5   : > { %v561_v31 = vsel %vm539_vm1, %v523_v5, %v442_v20 }
  0xdb   : > { %v479_v32 = vpop.permute.xlu1 %478  ;;  %v448_v33 = vpop.permute.xlu0 %447 }
  0xdc   : > { %v567_v34 = vsel %vm539_vm1, %v532_v30, %v448_v33  ;;  %v594_v35 = vsel %vm572_vm2, %v561_v31, %v479_v32  ;;  %v487_v45 = vpop.permute.xlu2 %486 }
  0xdd   : > { %1266 = vmatmul.msk.bf16.gmra.mxu2 %vm637_vm3, %v594_v35  ;;  %v600_v36 = vsel %vm572_vm2, %v567_v34, %v485_v29 }
  0xde   : > { %1269 = vmatmul.msk.bf16.gmra.mxu3 %vm637_vm3, %v600_v36 }
  0xe3   : > { %v436_v38 = vpop.permute.xlu1 %435  ;;  %v399_v7 = vpop.permute.xlu0 %398 }
  0xe4   : > { %v514_v11 = vsel %vm490_vm0, %v1447_v6, %v399_v7  ;;  %v489_v54 = vpop.permute.xlu2 %488 }
  0xe5   : > { %v555_v39 = vsel %vm539_vm1, %v514_v11, %v436_v38 }
  0xe6   : > { %v588_v40 = vsel %vm572_vm2, %v555_v39, %v473_v37 }
  0xe7   : > { %1263 = vmatmul.msk.bf16.gmra.mxu1 %vm637_vm3, %v588_v40 }
  0xeb   : > { %v413_v42 = vpop.permute.xlu1 %412  ;;  %v407_v43 = vpop.permute.xlu0 %406 }
  0xec   : > { %v526_v44 = vsel %vm490_vm0, %v1462_v9, %v407_v43  ;;  %v535_v46 = vsel %vm490_vm0, %v1498_v13, %v413_v42 }
  0xed   : > { %v563_v47 = vsel %vm539_vm1, %v526_v44, %v444_v41 }
  0xf3   : > { %v481_v6 = vpop.permute.xlu1 %480  ;;  %v450_v48 = vpop.permute.xlu0 %449 }
  0xf4   : > { %v569_v49 = vsel %vm539_vm1, %v535_v46, %v450_v48  ;;  %v596_v50 = vsel %vm572_vm2, %v563_v47, %v481_v6 }
  0xf5   : > { %1267 = vmatmul.msk.bf16.gmra.mxu2 %vm637_vm3, %v596_v50  ;;  %v602_v51 = vsel %vm572_vm2, %v569_v49, %v487_v45 }
  0xf6   : > { %1270 = vmatmul.msk.bf16.gmra.mxu3 %vm637_vm3, %v602_v51 }
  0xfb   : > { %v415_v9 = vpop.permute.xlu0 %414  ;;  %v452_v13 = vpop.permute.xlu1 %451 }
  0xfc   : > { %v538_v52 = vsel %vm490_vm0, %v1501_v14, %v415_v9 }
  0xfd   : > { %v571_v53 = vsel %vm539_vm1, %v538_v52, %v452_v13 }
  0xfe   : > { %v604_v55 = vsel %vm572_vm2, %v571_v53, %v489_v54 }
 0x106   : > { %1271 = vmatmul.msk.bf16.gmra.mxu3 %vm637_vm3, %v604_v55 }
 0x10b   : > { %v679_v56 = vpop.f32.mrf.mxu0 }
 0x10c   : > { %v759_v14 = vpack.c.bf16 %v679_v56, %v679_v56  ;;  %v895_v57 = vmul.f32 %v679_v56, %v679_v56  ;;  %v824_v58 = vsel %vm637_vm3, %v679_v56, 0.0 }
 0x10e   : > { %792 = vst.msk [vmem:[%s1650_s11] sm:$0xf] %vm791_vm4, %v759_v14  ;;  %v927_v3 = vsel %vm637_vm3, %v895_v57, 0.0 }
 0x113   : > { %v681_v59 = vpop.f32.mrf.mxu0  ;;  %v1655_v60 = vpop.f32.mrf.mxu1 }
 0x114   : > { %v760_v61 = vpack.c.bf16 %v681_v59, %v681_v59  ;;  %v825_v62 = vsel %vm637_vm3, %v681_v59, 0.0  ;;  %v896_v63 = vmul.f32 %v681_v59, %v681_v59  ;;  %v767_v1 = vpack.c.bf16 %v1655_v60, %v1655_v60 }
 0x115   : > { %v826_v2 = vadd.f32 %v825_v62, %v824_v58 }
 0x116   : > { %793 = vst.msk [vmem:[%s1650_s11 + $0x4] sm:$0xf] %vm791_vm4, %v760_v61  ;;  %v928_v4 = vsel %vm637_vm3, %v896_v63, 0.0  ;;  %v903_v61 = vmul.f32 %v1655_v60, %v1655_v60 }
 0x117   : > { %v929_v10 = vadd.f32 %v928_v4, %v927_v3  ;;  %800 = vst.msk [vmem:[%s1650_s11 + $0x20] sm:$0xf] %vm791_vm4, %v767_v1 }
 0x11b   : > { %v684_v15 = vpop.f32.mrf.mxu0  ;;  %v1666_v16 = vpop.f32.mrf.mxu1 }
 0x11c   : > { %v761_v17 = vpack.c.bf16 %v684_v15, %v684_v15  ;;  %v768_v18 = vpack.c.bf16 %v1666_v16, %v1666_v16  ;;  %v897_v33 = vmul.f32 %v684_v15, %v684_v15  ;;  %v827_v34 = vsel %vm637_vm3, %v684_v15, 0.0 }
 0x11d   : > { %v828_v40 = vadd.f32 %v827_v34, %v826_v2  ;;  %v839_v15 = vsel %vm637_vm3, %v1655_v60, 0.0 }
 0x11e   : > { %794 = vst.msk [vmem:[%s1650_s11 + $0x8] sm:$0xf] %vm791_vm4, %v761_v17  ;;  %v930_v37 = vsel %vm637_vm3, %v897_v33, 0.0  ;;  %v904_v17 = vmul.f32 %v1666_v16, %v1666_v16 }
 0x11f   : > { %801 = vst.msk [vmem:[%s1650_s11 + $0x24] sm:$0xf] %vm791_vm4, %v768_v18  ;;  %v931_v6 = vadd.f32 %v930_v37, %v929_v10 }
 0x120   : > { %v944_v60 = vsel %vm637_vm3, %v904_v17, 0.0 }
 0x122   : > { %v1674_v19 = vpop.f32.mrf.mxu2 }
 0x123   : > { %v775_v8 = vpack.c.bf16 %v1674_v19, %v1674_v19  ;;  %v686_v12 = vpop.f32.mrf.mxu0 }
 0x124   : > { %v762_v20 = vpack.c.bf16 %v686_v12, %v686_v12  ;;  %v898_v35 = vmul.f32 %v686_v12, %v686_v12  ;;  %v829_v38 = vsel %vm637_vm3, %v686_v12, 0.0 }
 0x125   : > { %808 = vst.msk [vmem:[%s1650_s11 + $0x40] sm:$0xf] %vm791_vm4, %v775_v8  ;;  %v830_v48 = vadd.f32 %v829_v38, %v828_v40 }
 0x126   : > { %795 = vst.msk [vmem:[%s1650_s11 + $0xc] sm:$0xf] %vm791_vm4, %v762_v20  ;;  %v932_v43 = vsel %vm637_vm3, %v898_v35, 0.0  ;;  %v942_v20 = vsel %vm637_vm3, %v903_v61, 0.0 }
 0x127   : > { %v933_v52 = vadd.f32 %v932_v43, %v931_v6 }
 0x12a   : > { %v1682_v21 = vpop.f32.mrf.mxu2 }
 0x12b   : > { %v776_v22 = vpack.c.bf16 %v1682_v21, %v1682_v21  ;;  %v689_v23 = vpop.f32.mrf.mxu0  ;;  %v1686_v24 = vpop.f32.mrf.mxu1 }
 0x12c   : > { %v763_v25 = vpack.c.bf16 %v689_v23, %v689_v23  ;;  %v769_v26 = vpack.c.bf16 %v1686_v24, %v1686_v24  ;;  %v899_v7 = vmul.f32 %v689_v23, %v689_v23  ;;  %v831_v44 = vsel %vm637_vm3, %v689_v23, 0.0 }
 0x12d   : > { %809 = vst.msk [vmem:[%s1650_s11 + $0x44] sm:$0xf] %vm791_vm4, %v776_v22  ;;  %v832_v13 = vadd.f32 %v831_v44, %v830_v48  ;;  %v841_v22 = vsel %vm637_vm3, %v1666_v16, 0.0 }
 0x12e   : > { %796 = vst.msk [vmem:[%s1650_s11 + $0x10] sm:$0xf] %vm791_vm4, %v763_v25  ;;  %v934_v50 = vsel %vm637_vm3, %v899_v7, 0.0 }
 0x12f   : > { %802 = vst.msk [vmem:[%s1650_s11 + $0x28] sm:$0xf] %vm791_vm4, %v769_v26  ;;  %v935_v55 = vadd.f32 %v934_v50, %v933_v52 }
 0x133   : > { %v691_v27 = vpop.f32.mrf.mxu0  ;;  %v1696_v28 = vpop.f32.mrf.mxu1 }
 0x134   : > { %v764_v0 = vpack.c.bf16 %v691_v27, %v691_v27  ;;  %v770_v29 = vpack.c.bf16 %v1696_v28, %v1696_v28  ;;  %v900_v45 = vmul.f32 %v691_v27, %v691_v27  ;;  %v833_v51 = vsel %vm637_vm3, %v691_v27, 0.0 }
 0x135   : > { %v834_v56 = vadd.f32 %v833_v51, %v832_v13  ;;  %v905_v27 = vmul.f32 %v1686_v24, %v1686_v24  ;;  %v845_v34 = vsel %vm637_vm3, %v1696_v28, 0.0 }
 0x136   : > { %797 = vst.msk [vmem:[%s1650_s11 + $0x14] sm:$0xf] %vm791_vm4, %v764_v0  ;;  %v936_v53 = vsel %vm637_vm3, %v900_v45, 0.0  ;;  %v843_v0 = vsel %vm637_vm3, %v1686_v24, 0.0 }
 0x137   : > { %803 = vst.msk [vmem:[%s1650_s11 + $0x2c] sm:$0xf] %vm791_vm4, %v770_v29  ;;  %v937_v57 = vadd.f32 %v936_v53, %v935_v55 }
 0x140   : > { %v1704_v5 = vpop.f32.mrf.mxu2 }
 0x141   : > { %v777_v30 = vpack.c.bf16 %v1704_v5, %v1704_v5  ;;  %v1708_v31 = vpop.f32.mrf.mxu3  ;;  %v913_v17 = vmul.f32 %v1704_v5, %v1704_v5 }
 0x142   : > { %v783_v32 = vpack.c.bf16 %v1708_v31, %v1708_v31 }
 0x143   : > { %810 = vst.msk [vmem:[%s1650_s11 + $0x48] sm:$0xf] %vm791_vm4, %v777_v30  ;;  %v946_v30 = vsel %vm637_vm3, %v905_v27, 0.0 }
 0x144   : > { %816 = vst.msk [vmem:[%s1650_s11 + $0x60] sm:$0xf] %vm791_vm4, %v783_v32  ;;  %v906_v32 = vmul.f32 %v1696_v28, %v1696_v28 }
 0x146   : > { %v948_v24 = vsel %vm637_vm3, %v906_v32, 0.0 }
 0x148   : > { %v1717_v36 = vpop.f32.mrf.mxu2 }
 0x149   : > { %v778_v11 = vpack.c.bf16 %v1717_v36, %v1717_v36  ;;  %v1723_v39 = vpop.f32.mrf.mxu3 }
 0x14a   : > { %v784_v41 = vpack.c.bf16 %v1723_v39, %v1723_v39  ;;  %v694_v42 = vpop.f32.mrf.mxu0 }
 0x14b   : > { %811 = vst.msk [vmem:[%s1650_s11 + $0x4c] sm:$0xf] %vm791_vm4, %v778_v11  ;;  %v765_v46 = vpack.c.bf16 %v694_v42, %v694_v42  ;;  %v709_v47 = vpop.f32.mrf.mxu1  ;;  %v901_v9 = vmul.f32 %v694_v42, %v694_v42  ;;  %v835_v54 = vsel %vm637_vm3, %v694_v42, 0.0 }
 0x14c   : > { %817 = vst.msk [vmem:[%s1650_s11 + $0x64] sm:$0xf] %vm791_vm4, %v784_v41  ;;  %v771_v49 = vpack.c.bf16 %v709_v47, %v709_v47  ;;  %v836_v58 = vadd.f32 %v835_v54, %v834_v56  ;;  %v907_v11 = vmul.f32 %v709_v47, %v709_v47  ;;  %v847_v42 = vsel %vm637_vm3, %v709_v47, 0.0 }
 0x14d   : > { %798 = vst.msk [vmem:[%s1650_s11 + $0x18] sm:$0xf] %vm791_vm4, %v765_v46  ;;  %v938_v14 = vsel %vm637_vm3, %v901_v9, 0.0 }
 0x14e   : > { %804 = vst.msk [vmem:[%s1650_s11 + $0x30] sm:$0xf] %vm791_vm4, %v771_v49  ;;  %v939_v3 = vadd.f32 %v938_v14, %v937_v57  ;;  %v950_v44 = vsel %vm637_vm3, %v907_v11, 0.0  ;;  %v911_v14 = vmul.f32 %v1674_v19, %v1674_v19 }
 0x152   : > { %v696_v59 = vpop.f32.mrf.mxu0 }
 0x153   : > { %v766_v62 = vpack.c.bf16 %v696_v59, %v696_v59  ;;  %v837_v63 = vsel %vm637_vm3, %v696_v59, 0.0  ;;  %v902_v1 = vmul.f32 %v696_v59, %v696_v59  ;;  %v711_v2 = vpop.f32.mrf.mxu1 }
 0x154   : > { %v838_v4 = vadd.f32 %v837_v63, %v836_v58  ;;  %v772_v10 = vpack.c.bf16 %v711_v2, %v711_v2  ;;  %v908_v45 = vmul.f32 %v711_v2, %v711_v2  ;;  %v849_v49 = vsel %vm637_vm3, %v711_v2, 0.0 }
 0x155   : > { %799 = vst.msk [vmem:[%s1650_s11 + $0x1c] sm:$0xf] %vm791_vm4, %v766_v62  ;;  %v940_v18 = vsel %vm637_vm3, %v902_v1, 0.0  ;;  %v855_v63 = vsel %vm637_vm3, %v1674_v19, 0.0  ;;  %v912_v1 = vmul.f32 %v1682_v21, %v1682_v21 }
 0x156   : > { %v840_v8 = vadd.f32 %v839_v15, %v838_v4  ;;  %v941_v12 = vadd.f32 %v940_v18, %v939_v3  ;;  %805 = vst.msk [vmem:[%s1650_s11 + $0x34] sm:$0xf] %vm791_vm4, %v772_v10  ;;  %v952_v13 = vsel %vm637_vm3, %v908_v45, 0.0  ;;  %v958_v10 = vsel %vm637_vm3, %v911_v14, 0.0 }
 0x157   : > { %v857_v15 = vsel %vm637_vm3, %v1682_v21, 0.0  ;;  %v960_v19 = vsel %vm637_vm3, %v912_v1, 0.0  ;;  %v861_v21 = vsel %vm637_vm3, %v1717_v36, 0.0  ;;  %v873_v14 = vsel %vm637_vm3, %v1723_v39, 0.0 }
 0x158   : > { %v842_v23 = vadd.f32 %v841_v22, %v840_v8  ;;  %v943_v25 = vadd.f32 %v942_v20, %v941_v12  ;;  %v859_v12 = vsel %vm637_vm3, %v1704_v5, 0.0  ;;  %v914_v20 = vmul.f32 %v1717_v36, %v1717_v36 }
 0x15a   : > { %v945_v26 = vadd.f32 %v944_v60, %v943_v25  ;;  %v844_v29 = vadd.f32 %v843_v0, %v842_v23  ;;  %v962_v25 = vsel %vm637_vm3, %v913_v17, 0.0  ;;  %v964_v0 = vsel %vm637_vm3, %v914_v20, 0.0 }
 0x15c   : > { %v947_v16 = vadd.f32 %v946_v30, %v945_v26  ;;  %v846_v38 = vadd.f32 %v845_v34, %v844_v29 }
 0x15e   : > { %v949_v40 = vadd.f32 %v948_v24, %v947_v16  ;;  %v848_v43 = vadd.f32 %v847_v42, %v846_v38 }
 0x160   : > { %v729_v33 = vpop.f32.mrf.mxu2  ;;  %v951_v6 = vadd.f32 %v950_v44, %v949_v40  ;;  %v850_v47 = vadd.f32 %v849_v49, %v848_v43 }
 0x161   : > { %v779_v35 = vpack.c.bf16 %v729_v33, %v729_v33  ;;  %v1767_v37 = vpop.f32.mrf.mxu3  ;;  %v915_v60 = vmul.f32 %v729_v33, %v729_v33  ;;  %v863_v29 = vsel %vm637_vm3, %v729_v33, 0.0 }
 0x162   : > { %v785_v7 = vpack.c.bf16 %v1767_v37, %v1767_v37  ;;  %v953_v54 = vadd.f32 %v952_v13, %v951_v6  ;;  %v920_v13 = vmul.f32 %v1723_v39, %v1723_v39 }
 0x163   : > { %812 = vst.msk [vmem:[%s1650_s11 + $0x50] sm:$0xf] %vm791_vm4, %v779_v35  ;;  %v966_v16 = vsel %vm637_vm3, %v915_v60, 0.0 }
 0x164   : > { %818 = vst.msk [vmem:[%s1650_s11 + $0x68] sm:$0xf] %vm791_vm4, %v785_v7  ;;  %v714_v41 = vpop.f32.mrf.mxu1 }
 0x165   : > { %v773_v28 = vpack.c.bf16 %v714_v41, %v714_v41  ;;  %v909_v46 = vmul.f32 %v714_v41, %v714_v41  ;;  %v851_v50 = vsel %vm637_vm3, %v714_v41, 0.0 }
 0x166   : > { %v852_v55 = vadd.f32 %v851_v50, %v850_v47 }
 0x167   : > { %806 = vst.msk [vmem:[%s1650_s11 + $0x38] sm:$0xf] %vm791_vm4, %v773_v28  ;;  %v954_v53 = vsel %vm637_vm3, %v909_v46, 0.0  ;;  %v919_v28 = vmul.f32 %v1708_v31, %v1708_v31 }
 0x168   : > { %v731_v48 = vpop.f32.mrf.mxu2  ;;  %v955_v61 = vadd.f32 %v954_v53, %v953_v54 }
 0x169   : > { %v780_v51 = vpack.c.bf16 %v731_v48, %v731_v48  ;;  %v1782_v9 = vpop.f32.mrf.mxu3  ;;  %v916_v34 = vmul.f32 %v731_v48, %v731_v48  ;;  %v865_v36 = vsel %vm637_vm3, %v731_v48, 0.0 }
 0x16a   : > { %v786_v52 = vpack.c.bf16 %v1782_v9, %v1782_v9  ;;  %v877_v39 = vsel %vm637_vm3, %v1782_v9, 0.0 }
 0x16b   : > { %813 = vst.msk [vmem:[%s1650_s11 + $0x54] sm:$0xf] %vm791_vm4, %v780_v51  ;;  %v968_v40 = vsel %vm637_vm3, %v916_v34, 0.0 }
 0x16c   : > { %819 = vst.msk [vmem:[%s1650_s11 + $0x6c] sm:$0xf] %vm791_vm4, %v786_v52  ;;  %v716_v56 = vpop.f32.mrf.mxu1  ;;  %v871_v52 = vsel %vm637_vm3, %v1708_v31, 0.0 }
 0x16d   : > { %v774_v57 = vpack.c.bf16 %v716_v56, %v716_v56  ;;  %v853_v58 = vsel %vm637_vm3, %v716_v56, 0.0  ;;  %v910_v59 = vmul.f32 %v716_v56, %v716_v56  ;;  %v974_v56 = vsel %vm637_vm3, %v919_v28, 0.0 }
 0x16e   : > { %v854_v62 = vadd.f32 %v853_v58, %v852_v55 }
 0x16f   : > { %807 = vst.msk [vmem:[%s1650_s11 + $0x3c] sm:$0xf] %vm791_vm4, %v774_v57  ;;  %v956_v2 = vsel %vm637_vm3, %v910_v59, 0.0  ;;  %v921_v57 = vmul.f32 %v1767_v37, %v1767_v37  ;;  %v976_v59 = vsel %vm637_vm3, %v920_v13, 0.0 }
 0x170   : > { %v856_v3 = vadd.f32 %v855_v63, %v854_v62  ;;  %v957_v4 = vadd.f32 %v956_v2, %v955_v61  ;;  %v875_v61 = vsel %vm637_vm3, %v1767_v37, 0.0  ;;  %v922_v62 = vmul.f32 %v1782_v9, %v1782_v9 }
 0x171   : > { %v978_v2 = vsel %vm637_vm3, %v921_v57, 0.0 }
 0x172   : > { %v858_v18 = vadd.f32 %v857_v15, %v856_v3  ;;  %v959_v8 = vadd.f32 %v958_v10, %v957_v4 }
 0x174   : > { %v860_v22 = vadd.f32 %v859_v12, %v858_v18  ;;  %v961_v23 = vadd.f32 %v960_v19, %v959_v8  ;;  %v980_v18 = vsel %vm637_vm3, %v922_v62, 0.0 }
 0x176   : > { %v963_v26 = vadd.f32 %v962_v25, %v961_v23  ;;  %v862_v27 = vadd.f32 %v861_v21, %v860_v22 }
 0x178   : > { %v734_v5 = vpop.f32.mrf.mxu2  ;;  %v864_v30 = vadd.f32 %v863_v29, %v862_v27  ;;  %v965_v32 = vadd.f32 %v964_v0, %v963_v26 }
 0x179   : > { %v781_v35 = vpack.c.bf16 %v734_v5, %v734_v5  ;;  %v749_v38 = vpop.f32.mrf.mxu3  ;;  %v917_v33 = vmul.f32 %v734_v5, %v734_v5  ;;  %v867_v42 = vsel %vm637_vm3, %v734_v5, 0.0 }
 0x17a   : > { %v967_v7 = vadd.f32 %v966_v16, %v965_v32  ;;  %v787_v24 = vpack.c.bf16 %v749_v38, %v749_v38  ;;  %v866_v11 = vadd.f32 %v865_v36, %v864_v30  ;;  %v923_v3 = vmul.f32 %v749_v38, %v749_v38 }
 0x17b   : > { %814 = vst.msk [vmem:[%s1650_s11 + $0x58] sm:$0xf] %vm791_vm4, %v781_v35  ;;  %v970_v45 = vsel %vm637_vm3, %v917_v33, 0.0  ;;  %v879_v37 = vsel %vm637_vm3, %v749_v38, 0.0 }
 0x17c   : > { %820 = vst.msk [vmem:[%s1650_s11 + $0x70] sm:$0xf] %vm791_vm4, %v787_v24  ;;  %v969_v41 = vadd.f32 %v968_v40, %v967_v7  ;;  %v868_v43 = vadd.f32 %v867_v42, %v866_v11  ;;  %v982_v20 = vsel %vm637_vm3, %v923_v3, 0.0 }
 0x17e   : > { %v971_v50 = vadd.f32 %v970_v45, %v969_v41 }
 0x180   : > { %v736_v44 = vpop.f32.mrf.mxu2 }
 0x181   : > { %v782_v46 = vpack.c.bf16 %v736_v44, %v736_v44  ;;  %v869_v6 = vsel %vm637_vm3, %v736_v44, 0.0  ;;  %v918_v48 = vmul.f32 %v736_v44, %v736_v44  ;;  %v751_v49 = vpop.f32.mrf.mxu3 }
 0x182   : > { %v870_v51 = vadd.f32 %v869_v6, %v868_v43  ;;  %v788_v47 = vpack.c.bf16 %v751_v49, %v751_v49  ;;  %v924_v8 = vmul.f32 %v751_v49, %v751_v49  ;;  %v881_v22 = vsel %vm637_vm3, %v751_v49, 0.0 }
 0x183   : > { %815 = vst.msk [vmem:[%s1650_s11 + $0x5c] sm:$0xf] %vm791_vm4, %v782_v46  ;;  %v972_v53 = vsel %vm637_vm3, %v918_v48, 0.0 }
 0x184   : > { %v872_v54 = vadd.f32 %v871_v52, %v870_v51  ;;  %v973_v55 = vadd.f32 %v972_v53, %v971_v50  ;;  %821 = vst.msk [vmem:[%s1650_s11 + $0x74] sm:$0xf] %vm791_vm4, %v788_v47  ;;  %v984_v21 = vsel %vm637_vm3, %v924_v8, 0.0 }
 0x186   : > { %v874_v31 = vadd.f32 %v873_v14, %v872_v54  ;;  %v975_v58 = vadd.f32 %v974_v56, %v973_v55 }
 0x188   : > { %v876_v63 = vadd.f32 %v875_v61, %v874_v31  ;;  %v977_v1 = vadd.f32 %v976_v59, %v975_v58 }
 0x189   : > { %v754_v4 = vpop.f32.mrf.mxu3 }
 0x18a   : > { %v979_v10 = vadd.f32 %v978_v2, %v977_v1  ;;  %v878_v15 = vadd.f32 %v877_v39, %v876_v63  ;;  %v789_v17 = vpack.c.bf16 %v754_v4, %v754_v4  ;;  %v925_v9 = vmul.f32 %v754_v4, %v754_v4 }
 0x18b   : > { %v883_v60 = vsel %vm637_vm3, %v754_v4, 0.0 }
 0x18c   : > { %v880_v19 = vadd.f32 %v879_v37, %v878_v15  ;;  %v981_v12 = vadd.f32 %v980_v18, %v979_v10  ;;  %822 = vst.msk [vmem:[%s1650_s11 + $0x78] sm:$0xf] %vm791_vm4, %v789_v17  ;;  %v986_v0 = vsel %vm637_vm3, %v925_v9, 0.0 }
 0x18e   : > { %v882_v23 = vadd.f32 %v881_v22, %v880_v19  ;;  %v983_v25 = vadd.f32 %v982_v20, %v981_v12 }
 0x190   : > { %v985_v26 = vadd.f32 %v984_v21, %v983_v25  ;;  %v884_v27 = vadd.f32 %v883_v60, %v882_v23 }
 0x191   : > { %v756_v29 = vpop.f32.mrf.mxu3 }
 0x192   : > { %v987_v5 = vadd.f32 %v986_v0, %v985_v26  ;;  %v790_v30 = vpack.c.bf16 %v756_v29, %v756_v29  ;;  %v885_v32 = vsel %vm637_vm3, %v756_v29, 0.0  ;;  %v926_v16 = vmul.f32 %v756_v29, %v756_v29 }
 0x193   : > { %v886_v34 = vadd.f32 %v885_v32, %v884_v27 }
 0x194   : > { %823 = vst.msk [vmem:[%s1650_s11 + $0x7c] sm:$0xf] %vm791_vm4, %v790_v30  ;;  %v988_v35 = vsel %vm637_vm3, %v926_v16, 0.0 }
 0x195   : > { %v887_v38 = vrot.slane %v886_v34, 4  ;;  %v989_v7 = vadd.f32 %v988_v35, %v987_v5 }
 0x197   : > { %v888_v24 = vadd.f32 %v887_v38, %v886_v34  ;;  %v990_v36 = vrot.slane %v989_v7, 4 }
 0x199   : > { %v889_v11 = vrot.slane %v888_v24, 2  ;;  %v991_v40 = vadd.f32 %v990_v36, %v989_v7 }
 0x19b   : > { %v890_v33 = vadd.f32 %v889_v11, %v888_v24  ;;  %v992_v41 = vrot.slane %v991_v40, 2 }
 0x19d   : > { %v891_v42 = vrot.slane %v890_v33, 1  ;;  %v993_v28 = vadd.f32 %v992_v41, %v991_v40 }
 0x19f   : > { %v892_v43 = vadd.f32 %v891_v42, %v890_v33  ;;  %v994_v44 = vrot.slane %v993_v28, 1 }
 0x1a1   : > { %894 = vst.msk [vmem:[%s249_s14] sm:$0x1] %vm893_vm5, %v892_v43  ;;  %v995_v45 = vadd.f32 %v994_v44, %v993_v28 }
 0x1a3   : > { %996 = vst.msk [vmem:[%s255_s21] sm:$0x1] %vm893_vm5, %v995_v45 }
 0x1a4 PF: > { %s15_s17 = sadd.s32 1, %s1360_s17   ;;  %s1886_s15 = smov %s1356_s16 }
 0x1a5   : > { %p12_p5 = scmp.ge.s32.totalorder %s15_s17, 4   ;;  %s1887_s16 = smov %s1889_s18 }
 0x1a7   :  { %14 = sbr.rel (!%p12_p5) target bundleno = 2 (0x2), region = 83 }

// kernel: _lambda_.3
= control target key start
LH: loop header
LB: loop body
LE: loop exit
PB: predicated region body
PF: predicated region fallthrough
CT: control target
= control target key end

     0   :  { %9 = vsyncpa [#allocation3], 0  ;;  %s3991_s0 = inlined_call_operand.vmem [shape: bf16[2,16,16,64], index: 0, kind: input, shape index: {}, may-alias: {0,1}]   ;;  %s3992_s1 = inlined_call_operand.vmem [shape: bf16[2,16,16,64], index: 1, kind: input, shape index: {}, may-alias: {0,1}]   ;;  %s3993_s2 = inlined_call_operand.vmem [shape: f32[1,64], index: 2, kind: input, shape index: {}]   ;;  %s3994_s3 = inlined_call_operand.vmem [shape: f32[1,64], index: 3, kind: input, shape index: {}]   ;;  %s3995_s4 = inlined_call_operand.hbm [shape: f32[2,8,8,64], index: 4, kind: output, shape index: {}]  }
   0x1   :  { %11 = vsyncpa [#allocation3 + $0x1], 0  ;;  %s1741_s15 = smov 0   ;;  %s1743_s16 = smov 0  }
   0x2   :  { %s1745_s17 = smov 0   ;;  %s1747_s18 = smov 0  }
   0x3   :  { %s1749_s19 = smov 0   ;;  %s1751_s20 = smov 0  }
   0x4 LB: > { %s1474_s21 = sadd.s32 4294967295, %s1712_s20   ;;  %s1475_s22 = sadd.s32 4294967294, %s1712_s20   ;;  %s1712_s20 = sphi %s1751_s20, %s17_s20   ;;  %s1708_s19 = sphi %s1749_s19, %s4888_s19   ;;  %s1704_s18 = sphi %s1747_s18, %s4887_s18   ;;  %s1700_s17 = sphi %s1745_s17, %s4886_s17   ;;  %s1696_s16 = sphi %s1743_s16, %s4885_s16   ;;  %s1692_s15 = sphi %s1741_s15, %s4884_s15  }
   0x5   : > { %s29_s23 = sadd.s32 1, %s1708_s19  ;;  %s144_s24 = sadd.s32 1, %s1700_s17 }
   0x6   : > { %p31_p0 = scmp.ge.s32.totalorder %s29_s23, 2  ;;  %p154_p1 = scmp.ne.s32.totalorder %s1700_s17, %s1696_s16 }
   0x7   : > { %p155_p2 = scmp.eq.s32.totalorder %s1474_s21, 1  ;;  %p160_p3 = scmp.ne.s32.totalorder %s1696_s16, %s1692_s15 }
   0x8   : > { %s4890_s23 = smov (%p31_p0, %s29_s23), 0  ;;  %p161_p5 = scmp.eq.s32.totalorder %s1475_s22, 1 }
   0x9   : > { %p1781_p4 = por %p155_p2, %p154_p1  ;;  %s139_s26 = ssub.s32 %s1708_s19, %s4890_s23 }
   0xa   : > { %p1478_p6 = scmp.ge.s32.totalorder %s1712_s20, 1  ;;  %p142_p7 = scmp.eq.s32.totalorder %s139_s26, 0 }
   0xb   : > { %p1788_p8 = por %p161_p5, %p160_p3  ;;  %p219_p9 = scmp.lt.s32.totalorder %s1712_s20, 3 }
   0xc   : > { %s1794_s28 = scalar_select %p142_p7, %s1700_s17, %s144_s24  }
   0xd   : > { %p220_p10 = pnand %p1478_p6, %p219_p9 }
   0xf   : > { %223 = sbr.rel (%p220_p10) target bundleno = 372 (0x174), region = 36 }
  0x14   : > { %p264_p11 = scmp.lt.s32.totalorder %s1704_s18, 1  ;;  %v1826_v33 = vld [vmem:[%s3993_s2] ss:$0 sm:$0xff]  ;;  %vm710_vm0 = vcmask 1042434   ;;  %vm712_vm1 = vcmask 1043459   ;;  %vm714_vm2 = vcmask 1044484  }
  0x15   : > { %vm716_vm3 = vcmask 1045509   ;;  %vm718_vm4 = vcmask 1046534   ;;  %vm720_vm5 = vcmask 1047559   ;;  %vm828_vm6 = vcmask 1040384   ;;  %s260_s21 = sand.u32 1, %s1696_s16   ;;  %s1491_s24 = sshll.u32 %s1704_s18, 6 }
  0x16   : > { %s1798_s29 = scalar_select %p264_p11, %s1704_s18, 1  ;;  %vm973_vm7 = vcmask 1041409   ;;  %vm1344_vm8 = vcmask 523264  }
  0x17   : > { %s1479_s22 = sshll.u32 %s260_s21, 6  ;;  %s1654_s12 = scalar_lea.hbm %s3995_s4, 128 }
  0x18   : > { %s1489_s30 = sshll.u32 %s1798_s29, 7  ;;  %s1367_s29 = scalar_lea.hbm %s3995_s4, %s1491_s24 }
  0x19   : > { %s1806_s7 = scalar_lea.vmem %s3991_s0, %s1489_s30  ;;  %s286_s14 = scalar_lea.vmem %s3992_s1, %s1489_s30 }
  0x1a   : > { %v1493_v0 = vld [vmem:[%s1806_s7] sm:$0xff]   ;;  %v1560_v1 = vld [vmem:[%s1806_s7 + $0x8] sm:$0xff]   ;;  %v1561_v2 = vld [vmem:[%s1806_s7 + $0x10] sm:$0xff]   ;;  %s262_s30 = scalar_lea.vmem [#allocation2], %s1479_s22  ;;  %s1370_s6 = sshll.u32 %s1367_s29, 4  ;;  %s1371_s6 = int_to_ptr.hbm [resolvable:$true] %s1370_s6 }
  0x1b   : > { %v1494_v3 = vunpack.c.l.bf16 %v1493_v0  ;;  %v1495_v4 = vunpack.c.h.bf16 %v1493_v0  ;;  %v1562_v5 = vld [vmem:[%s1806_s7 + $0x18] sm:$0xff]   ;;  %v1563_v6 = vld [vmem:[%s1806_s7 + $0x20] sm:$0xff]   ;;  %v1564_v7 = vld [vmem:[%s1806_s7 + $0x28] sm:$0xff]   ;;  %v1498_v8 = vunpack.c.l.bf16 %v1560_v1  ;;  %v1499_v9 = vunpack.c.h.bf16 %v1560_v1  ;;  %s1368_s5 = sshll.u32 %s262_s30, 4  ;;  %s1648_s8 = sshra.s32 %s1371_s6, 4  ;;  %s1369_s5 = int_to_ptr.vmem [resolvable:$true] %s1368_s5  ;;  %s1649_s8 = int_to_ptr.hbm [resolvable:$true] %s1648_s8 }
  0x1c   : > { %v1502_v10 = vunpack.c.l.bf16 %v1561_v2  ;;  %v1503_v11 = vunpack.c.h.bf16 %v1561_v2  ;;  %v1565_v12 = vld [vmem:[%s1806_s7 + $0x30] sm:$0xff]   ;;  %v1566_v13 = vld [vmem:[%s1806_s7 + $0x38] sm:$0xff]   ;;  %v1567_v14 = vld [vmem:[%s1806_s7 + $0x40] sm:$0xff]   ;;  %v1506_v15 = vunpack.c.l.bf16 %v1562_v5  ;;  %v1507_v16 = vunpack.c.h.bf16 %v1562_v5  ;;  %s1650_s9 = scalar_lea.hbm %s1649_s8, 64  ;;  %p1655_p1 = scmp.lt.s32.totalorder %s1649_s8, %s3995_s4 }
  0x1d   : > { %v1510_v17 = vunpack.c.l.bf16 %v1563_v6  ;;  %v1511_v18 = vunpack.c.h.bf16 %v1563_v6  ;;  %v1568_v19 = vld [vmem:[%s1806_s7 + $0x48] sm:$0xff]   ;;  %v1569_v20 = vld [vmem:[%s1806_s7 + $0x50] sm:$0xff]   ;;  %v1514_v21 = vunpack.c.l.bf16 %v1564_v7  ;;  %v1515_v22 = vunpack.c.h.bf16 %v1564_v7  ;;  %v1570_v25 = vld [vmem:[%s1806_s7 + $0x58] sm:$0xff]   ;;  %p1651_p12 = scmp.ne.s32.totalorder %s1649_s8, %s1650_s9  ;;  %p1656_p2 = scmp.lt.s32.totalorder %s1654_s12, %s1650_s9 }
  0x1e   : > { %v1518_v23 = vunpack.c.l.bf16 %v1565_v12  ;;  %v1519_v24 = vunpack.c.h.bf16 %v1565_v12  ;;  %v1571_v26 = vld [vmem:[%s1806_s7 + $0x60] sm:$0xff]   ;;  %v1522_v27 = vunpack.c.l.bf16 %v1566_v13  ;;  %v1523_v28 = vunpack.c.h.bf16 %v1566_v13  ;;  %v1572_v31 = vld [vmem:[%s1806_s7 + $0x68] sm:$0xff]   ;;  %v1573_v32 = vld [vmem:[%s1806_s7 + $0x70] sm:$0xff]  }
  0x1f   : > { %v1526_v29 = vunpack.c.l.bf16 %v1567_v14  ;;  %v1527_v30 = vunpack.c.h.bf16 %v1567_v14  ;;  %v1530_v34 = vunpack.c.l.bf16 %v1568_v19  ;;  %v1531_v35 = vunpack.c.h.bf16 %v1568_v19  ;;  %v1574_v38 = vld [vmem:[%s1806_s7 + $0x78] sm:$0xff]   ;;  %s1354_s7 = scalar_lea.sflag [#allocation3], %s260_s21  ;;  %p1652_p13 = pnand %p1651_p12, %p1781_p4 }
  0x20   : > { %v1534_v36 = vunpack.c.l.bf16 %v1569_v20  ;;  %v1535_v37 = vunpack.c.h.bf16 %v1569_v20  ;;  %v1538_v39 = vunpack.c.l.bf16 %v1570_v25  ;;  %v1539_v40 = vunpack.c.h.bf16 %v1570_v25  ;;  %p1657_p3 = por %p1656_p2, %p1655_p1 }
  0x21   : > { %v1542_v41 = vunpack.c.l.bf16 %v1571_v26  ;;  %v1543_v42 = vunpack.c.h.bf16 %v1571_v26  ;;  %v1546_v43 = vunpack.c.l.bf16 %v1572_v31  ;;  %v1547_v44 = vunpack.c.h.bf16 %v1572_v31  ;;  %p1653_p0 = pneg %p1652_p13 }
  0x22   : > { %v1550_v45 = vunpack.c.l.bf16 %v1573_v32  ;;  %v1551_v46 = vunpack.c.h.bf16 %v1573_v32  ;;  %v1554_v47 = vunpack.c.l.bf16 %v1574_v38  ;;  %v1555_v48 = vunpack.c.h.bf16 %v1574_v38 }
  0x23   : > { %v361_v49 = vmul.f32 %v1826_v33, %v1494_v3  ;;  %v362_v50 = vmul.f32 %v1826_v33, %v1495_v4  ;;  %v363_v51 = vmul.f32 %v1826_v33, %v1498_v8  ;;  %v364_v52 = vmul.f32 %v1826_v33, %v1499_v9  ;;  %v1850_v3 = vld [vmem:[%s3994_s3] ss:$0 sm:$0xff]  ;;  %p1658_p5 = pnand %p1657_p3, %p1653_p0 }
  0x24   : > { %v365_v53 = vmul.f32 %v1826_v33, %v1502_v10  ;;  %v366_v54 = vmul.f32 %v1826_v33, %v1503_v11  ;;  %v367_v55 = vmul.f32 %v1826_v33, %v1506_v15  ;;  %v368_v56 = vmul.f32 %v1826_v33, %v1507_v16 }
  0x25   : > { %v369_v57 = vmul.f32 %v1826_v33, %v1510_v17  ;;  %v370_v58 = vmul.f32 %v1826_v33, %v1511_v18  ;;  %v371_v59 = vmul.f32 %v1826_v33, %v1514_v21  ;;  %v372_v60 = vmul.f32 %v1826_v33, %v1515_v22 }
  0x26   : > { %v373_v61 = vmul.f32 %v1826_v33, %v1518_v23  ;;  %v374_v62 = vmul.f32 %v1826_v33, %v1519_v24  ;;  %v375_v63 = vmul.f32 %v1826_v33, %v1522_v27  ;;  %v376_v0 = vmul.f32 %v1826_v33, %v1523_v28 }
  0x27   : > { %v377_v1 = vmul.f32 %v1826_v33, %v1526_v29  ;;  %v378_v2 = vmul.f32 %v1826_v33, %v1527_v30  ;;  %v379_v4 = vmul.f32 %v1826_v33, %v1530_v34  ;;  %v380_v5 = vmul.f32 %v1826_v33, %v1531_v35 }
  0x28   : > { %v381_v6 = vmul.f32 %v1826_v33, %v1534_v36  ;;  %v382_v7 = vmul.f32 %v1826_v33, %v1535_v37  ;;  %v383_v8 = vmul.f32 %v1826_v33, %v1538_v39  ;;  %v384_v9 = vmul.f32 %v1826_v33, %v1539_v40 }
  0x29   : > { %v385_v10 = vmul.f32 %v1826_v33, %v1542_v41  ;;  %v386_v11 = vmul.f32 %v1826_v33, %v1543_v42  ;;  %v387_v12 = vmul.f32 %v1826_v33, %v1546_v43  ;;  %v388_v13 = vmul.f32 %v1826_v33, %v1547_v44 }
  0x2a   : > { %v389_v14 = vmul.f32 %v1826_v33, %v1550_v45  ;;  %v390_v15 = vmul.f32 %v1826_v33, %v1551_v46  ;;  %v391_v16 = vmul.f32 %v1826_v33, %v1554_v47  ;;  %v392_v17 = vmul.f32 %v1826_v33, %v1555_v48 }
  0x2b   : > { %v396_v18 = vadd.f32 %v1850_v3, %v361_v49  ;;  %v397_v19 = vadd.f32 %v1850_v3, %v362_v50  ;;  %v398_v20 = vadd.f32 %v1850_v3, %v363_v51  ;;  %v399_v21 = vadd.f32 %v1850_v3, %v364_v52 }
  0x2c   : > { %v400_v22 = vadd.f32 %v1850_v3, %v365_v53  ;;  %v401_v23 = vadd.f32 %v1850_v3, %v366_v54  ;;  %v402_v24 = vadd.f32 %v1850_v3, %v367_v55  ;;  %v403_v25 = vadd.f32 %v1850_v3, %v368_v56 }
  0x2d   : > { %v404_v26 = vadd.f32 %v1850_v3, %v369_v57  ;;  %v405_v27 = vadd.f32 %v1850_v3, %v370_v58  ;;  %v406_v28 = vadd.f32 %v1850_v3, %v371_v59  ;;  %v407_v29 = vadd.f32 %v1850_v3, %v372_v60 }
  0x2e   : > { %v408_v30 = vadd.f32 %v1850_v3, %v373_v61  ;;  %v409_v31 = vadd.f32 %v1850_v3, %v374_v62  ;;  %v410_v32 = vadd.f32 %v1850_v3, %v375_v63  ;;  %v411_v34 = vadd.f32 %v1850_v3, %v376_v0 }
  0x2f   : > { %v412_v35 = vadd.f32 %v1850_v3, %v377_v1  ;;  %v413_v36 = vadd.f32 %v1850_v3, %v378_v2  ;;  %v414_v37 = vadd.f32 %v1850_v3, %v379_v4  ;;  %v415_v38 = vadd.f32 %v1850_v3, %v380_v5 }
  0x30   : > { %v416_v39 = vadd.f32 %v1850_v3, %v381_v6  ;;  %v417_v40 = vadd.f32 %v1850_v3, %v382_v7  ;;  %v418_v41 = vadd.f32 %v1850_v3, %v383_v8  ;;  %v419_v42 = vadd.f32 %v1850_v3, %v384_v9 }
  0x31   : > { %v420_v43 = vadd.f32 %v1850_v3, %v385_v10  ;;  %v421_v44 = vadd.f32 %v1850_v3, %v386_v11  ;;  %v422_v45 = vadd.f32 %v1850_v3, %v387_v12  ;;  %v423_v46 = vadd.f32 %v1850_v3, %v388_v13  ;;  %v1557_v10 = vld [vmem:[%s286_s14] sm:$0xff]  }
  0x32   : > { %v424_v47 = vadd.f32 %v1850_v3, %v389_v14  ;;  %v425_v48 = vadd.f32 %v1850_v3, %v390_v15  ;;  %v426_v49 = vadd.f32 %v1850_v3, %v391_v16  ;;  %v427_v50 = vadd.f32 %v1850_v3, %v392_v17 }
  0x33   : > { %v1898_v51 = vmax.f32 %v396_v18, 0.0  ;;  %v1900_v52 = vmax.f32 %v397_v19, 0.0  ;;  %v1902_v53 = vmax.f32 %v398_v20, 0.0  ;;  %v1904_v54 = vmax.f32 %v399_v21, 0.0 }
  0x34   : > { %v1906_v55 = vmax.f32 %v400_v22, 0.0  ;;  %v1908_v56 = vmax.f32 %v401_v23, 0.0  ;;  %v1915_v57 = vmax.f32 %v402_v24, 0.0  ;;  %v1917_v58 = vmax.f32 %v403_v25, 0.0 }
  0x35   : > { %4162 = vst [vmem:[#allocation5_spill] sm:$0xff] %v1898_v51  ;;  %v1919_v59 = vmax.f32 %v404_v26, 0.0  ;;  %v1921_v60 = vmax.f32 %v405_v27, 0.0  ;;  %v1923_v61 = vmax.f32 %v406_v28, 0.0  ;;  %v1925_v62 = vmax.f32 %v407_v29, 0.0 }
  0x36   : > { %4163 = vst [vmem:[#allocation6_spill] sm:$0xff] %v1902_v53  ;;  %v1927_v63 = vmax.f32 %v408_v30, 0.0  ;;  %v1929_v0 = vmax.f32 %v409_v31, 0.0  ;;  %v1931_v1 = vmax.f32 %v410_v32, 0.0  ;;  %v1933_v2 = vmax.f32 %v411_v34, 0.0 }
  0x37   : > { %4164 = vst [vmem:[#allocation7_spill] sm:$0xff] %v1921_v60  ;;  %v1935_v4 = vmax.f32 %v412_v35, 0.0  ;;  %v1937_v5 = vmax.f32 %v413_v36, 0.0  ;;  %v1939_v6 = vmax.f32 %v414_v37, 0.0  ;;  %v1941_v7 = vmax.f32 %v415_v38, 0.0 }
  0x38   : > { %4165 = vst [vmem:[#allocation8_spill] sm:$0xff] %v1925_v62  ;;  %v1943_v8 = vmax.f32 %v416_v39, 0.0  ;;  %v1945_v9 = vmax.f32 %v417_v40, 0.0  ;;  %v1947_v11 = vmax.f32 %v418_v41, 0.0  ;;  %v1949_v12 = vmax.f32 %v419_v42, 0.0 }
  0x39   : > { %4166 = vst [vmem:[#allocation9_spill] sm:$0xff] %v1929_v0  ;;  %v1951_v13 = vmax.f32 %v420_v43, 0.0  ;;  %v1953_v14 = vmax.f32 %v421_v44, 0.0  ;;  %v1955_v15 = vmax.f32 %v422_v45, 0.0  ;;  %v1957_v16 = vmax.f32 %v423_v46, 0.0 }
  0x3a   : > { %4167 = vst [vmem:[#allocation10_spill] sm:$0xff] %v1937_v5  ;;  %v1959_v17 = vmax.f32 %v424_v47, 0.0  ;;  %v1961_v18 = vmax.f32 %v425_v48, 0.0  ;;  %v1963_v19 = vmax.f32 %v426_v49, 0.0  ;;  %v1965_v20 = vmax.f32 %v427_v50, 0.0 }
  0x3b   : > { %4168 = vst [vmem:[#allocation11_spill] sm:$0xff] %v1941_v7  ;;  %v1558_v21 = vunpack.c.l.bf16 %v1557_v10  ;;  %v1559_v22 = vunpack.c.h.bf16 %v1557_v10  ;;  %v3996_v23 = vrot.slane %v1898_v51, 2  ;;  %v3997_v24 = vrot.slane %v1898_v51, 4 }
  0x3c   : > { %4169 = vst [vmem:[#allocation12_spill] sm:$0xff] %v1945_v9  ;;  %v3998_v25 = vrot.slane %v1898_v51, 6  ;;  %v3999_v26 = vrot.slane %v1900_v52, 2  ;;  %v4000_v29 = vrot.slane %v1900_v52, 4  ;;  %v4001_v31 = vrot.slane %v1902_v53, 2 }
  0x3d   : > { %4170 = vst [vmem:[#allocation13_spill] sm:$0xff] %v1953_v14  ;;  %v464_v27 = vmul.f32 %v1826_v33, %v1558_v21  ;;  %v465_v28 = vmul.f32 %v1826_v33, %v1559_v22  ;;  %v4002_v32 = vrot.slane %v1902_v53, 4  ;;  %v4003_v34 = vrot.slane %v1902_v53, 6 }
  0x3e   : > { %4171 = vst [vmem:[#allocation14_spill] sm:$0xff] %v1957_v16  ;;  %v4004_v35 = vrot.slane %v1904_v54, 2  ;;  %v4005_v38 = vrot.slane %v1904_v54, 4  ;;  %v4006_v39 = vrot.slane %v1906_v55, 2  ;;  %v4007_v40 = vrot.slane %v1906_v55, 4 }
  0x3f   : > { %4172 = vst [vmem:[#allocation15_spill] sm:$0xff] %v1961_v18  ;;  %v466_v36 = vadd.f32 %v1850_v3, %v464_v27  ;;  %v467_v37 = vadd.f32 %v1850_v3, %v465_v28  ;;  %v4008_v41 = vrot.slane %v1906_v55, 6  ;;  %v4009_v42 = vrot.slane %v1908_v56, 2 }
  0x40   : > { %v4010_v45 = vrot.slane %v1908_v56, 4  ;;  %v4011_v46 = vrot.slane %v1915_v57, 2  ;;  %v4012_v47 = vrot.slane %v1915_v57, 4  ;;  %v4013_v48 = vrot.slane %v1915_v57, 6 }
  0x41   : > { %v1987_v43 = vmax.f32 %v466_v36, 0.0  ;;  %v1989_v44 = vmax.f32 %v467_v37, 0.0  ;;  %v4014_v49 = vrot.slane %v1917_v58, 2  ;;  %v4015_v50 = vrot.slane %v1917_v58, 4 }
  0x42   : > { %v2074_v28 = vperm.slane %v3996_v23, 1  ;;  %v2078_v37 = vperm.slane %v3997_v24, 1  ;;  %v2082_v33 = vperm.slane %v3998_v25, 1  ;;  %v2087_v21 = vperm.slane %v3999_v26, 1 }
  0x43   : > { %4173 = vst [vmem:[#allocation16_spill] sm:$0xff] %v1987_v43  ;;  %v2091_v22 = vperm.slane %v4000_v29, 1  ;;  %v2096_v24 = vperm.slane %v4001_v31, 1  ;;  %v2100_v25 = vperm.slane %v4002_v32, 1  ;;  %v2104_v10 = vperm.slane %v4003_v34, 1 }
  0x44   : > { %4174 = vst [vmem:[#allocation17_spill] sm:$0xff] %v1989_v44  ;;  %v2109_v29 = vperm.slane %v4004_v35, 1  ;;  %v2113_v23 = vperm.slane %v4005_v38, 1  ;;  %v2118_v32 = vperm.slane %v4006_v39, 1  ;;  %v2122_v34 = vperm.slane %v4007_v40, 1 }
  0x45   : > { %4175 = vst [vmem:[#allocation18_spill] sm:$0xff] %v2074_v28  ;;  %v2126_v26 = vperm.slane %v4008_v41, 1  ;;  %v2131_v38 = vperm.slane %v4009_v42, 1  ;;  %v2135_v31 = vperm.slane %v4010_v45, 1  ;;  %v2140_v40 = vperm.slane %v4011_v46, 1 }
  0x46   : > { %4176 = vst [vmem:[#allocation19_spill] sm:$0xff] %v2078_v37  ;;  %v2144_v41 = vperm.slane %v4012_v47, 1  ;;  %v2148_v35 = vperm.slane %v4013_v48, 1  ;;  %v2153_v45 = vperm.slane %v4014_v49, 1  ;;  %v2157_v39 = vperm.slane %v4015_v50, 1 }
  0x47   : > { %4177 = vst [vmem:[#allocation20_spill] sm:$0xff] %v2082_v33  ;;  %v4195_v27 = vrot.slane %v1919_v59, 2  ;;  %v4197_v30 = vrot.slane %v1919_v59, 4  ;;  %v4199_v42 = vrot.slane %v1919_v59, 6  ;;  %v4201_v36 = vrot.slane %v1921_v60, 2 }
  0x48   : > { %4178 = vst [vmem:[#allocation21_spill] sm:$0xff] %v2087_v21  ;;  %v4203_v46 = vrot.slane %v1921_v60, 4  ;;  %v4205_v43 = vrot.slane %v1923_v61, 2  ;;  %v4209_v49 = vrot.slane %v1923_v61, 6  ;;  %v4215_v60 = vrot.slane %v1927_v63, 2 }
  0x49   : > { %4179 = vst [vmem:[#allocation22_spill] sm:$0xff] %v2091_v22  ;;  %v2162_v47 = vperm.slane %v4195_v27, 1  ;;  %v2166_v48 = vperm.slane %v4197_v30, 1  ;;  %v2170_v3 = vperm.slane %v4199_v42, 1  ;;  %v2175_v50 = vperm.slane %v4201_v36, 1 }
  0x4a   : > { %4180 = vst [vmem:[#allocation23_spill] sm:$0xff] %v2096_v24  ;;  %v2179_v44 = vperm.slane %v4203_v46, 1  ;;  %v2184_v30 = vperm.slane %v4205_v43, 1  ;;  %v4213_v27 = vrot.slane %v1925_v62, 4  ;;  %v4219_v36 = vrot.slane %v1927_v63, 6 }
  0x4b   : > { %4181 = vst [vmem:[#allocation24_spill] sm:$0xff] %v2100_v25  ;;  %v4223_v43 = vrot.slane %v1929_v0, 4 }
  0x4c   : > { %4182 = vst [vmem:[#allocation25_spill] sm:$0xff] %v2104_v10 }
  0x4d   : > { %4183 = vst [vmem:[#allocation26_spill] sm:$0xff] %v2109_v29 }
  0x4e   : > { %4184 = vst [vmem:[#allocation27_spill] sm:$0xff] %v2113_v23 }
  0x4f   : > { %4185 = vst [vmem:[#allocation28_spill] sm:$0xff] %v2118_v32 }
  0x50   : > { %4186 = vst [vmem:[#allocation29_spill] sm:$0xff] %v2122_v34 }
  0x51   : > { %4187 = vst [vmem:[#allocation30_spill] sm:$0xff] %v2126_v26 }
  0x52   : > { %4188 = vst [vmem:[#allocation31_spill] sm:$0xff] %v2131_v38 }
  0x53   : > { %4189 = vst [vmem:[#allocation32_spill] sm:$0xff] %v2135_v31  ;;  %v2192_v31 = vperm.slane %v4209_v49, 1 }
  0x54   : > { %4190 = vst [vmem:[#allocation33_spill] sm:$0xff] %v2140_v40 }
  0x55   : > { %4191 = vst [vmem:[#allocation34_spill] sm:$0xff] %v2144_v41 }
  0x56   : > { %4192 = vst [vmem:[#allocation35_spill] sm:$0xff] %v2148_v35 }
  0x57   : > { %4193 = vst [vmem:[#allocation36_spill] sm:$0xff] %v2153_v45 }
  0x58   : > { %4194 = vst [vmem:[#allocation37_spill] sm:$0xff] %v2157_v39  ;;  %v4207_v39 = vrot.slane %v1923_v61, 4 }
  0x59   : > { %4196 = vst [vmem:[#allocation38_spill] sm:$0xff] %v2162_v47 }
  0x5a   : > { %4198 = vst [vmem:[#allocation39_spill] sm:$0xff] %v2166_v48  ;;  %v2188_v42 = vperm.slane %v4207_v39, 1  ;;  %v2206_v39 = vperm.slane %v4215_v60, 1  ;;  %v4233_v60 = vrot.slane %v1933_v2, 4 }
  0x5b   : > { %4200 = vst [vmem:[#allocation40_spill] sm:$0xff] %v2170_v3  ;;  %v4217_v3 = vrot.slane %v1927_v63, 4 }
  0x5c   : > { %4202 = vst [vmem:[#allocation41_spill] sm:$0xff] %v2175_v50  ;;  %v4211_v50 = vrot.slane %v1925_v62, 2  ;;  %v4225_v62 = vrot.slane %v1931_v1, 2 }
  0x5d   : > { %4204 = vst [vmem:[#allocation42_spill] sm:$0xff] %v2179_v44  ;;  %v2201_v44 = vperm.slane %v4213_v27, 1  ;;  %v2210_v49 = vperm.slane %v4217_v3, 1 }
  0x5e   : > { %4206 = vst [vmem:[#allocation43_spill] sm:$0xff] %v2184_v30  ;;  %v2197_v46 = vperm.slane %v4211_v50, 1  ;;  %v2228_v3 = vperm.slane %v4225_v62, 1  ;;  %v4229_v50 = vrot.slane %v1931_v1, 6  ;;  %v4243_v62 = vrot.slane %v1937_v5, 4 }
  0x5f   : > { %4208 = vst [vmem:[#allocation44_spill] sm:$0xff] %v2188_v42 }
  0x60   : > { %4210 = vst [vmem:[#allocation45_spill] sm:$0xff] %v2192_v31  ;;  %v2214_v31 = vperm.slane %v4219_v36, 1 }
  0x61   : > { %4212 = vst [vmem:[#allocation46_spill] sm:$0xff] %v2197_v46  ;;  %v4221_v46 = vrot.slane %v1929_v0, 2  ;;  %v4235_v0 = vrot.slane %v1935_v4, 2 }
  0x62   : > { %4214 = vst [vmem:[#allocation47_spill] sm:$0xff] %v2201_v44  ;;  %v2223_v44 = vperm.slane %v4223_v43, 1 }
  0x63   : > { %4216 = vst [vmem:[#allocation48_spill] sm:$0xff] %v2206_v39  ;;  %v2219_v27 = vperm.slane %v4221_v46, 1  ;;  %v4239_v46 = vrot.slane %v1935_v4, 6 }
  0x64   : > { %4218 = vst [vmem:[#allocation49_spill] sm:$0xff] %v2210_v49  ;;  %v4227_v49 = vrot.slane %v1931_v1, 4 }
  0x65   : > { %4220 = vst [vmem:[#allocation50_spill] sm:$0xff] %v2214_v31  ;;  %v2236_v31 = vperm.slane %v4229_v50, 1 }
  0x66   : > { %4222 = vst [vmem:[#allocation51_spill] sm:$0xff] %v2219_v27  ;;  %v2232_v36 = vperm.slane %v4227_v49, 1  ;;  %v4231_v27 = vrot.slane %v1933_v2, 2  ;;  %v2250_v49 = vperm.slane %v4235_v0, 1  ;;  %v4253_v0 = vrot.slane %v1941_v7, 4 }
  0x67   : > { %4224 = vst [vmem:[#allocation52_spill] sm:$0xff] %v2223_v44  ;;  %v2245_v44 = vperm.slane %v4233_v60, 1 }
  0x68   : > { %4226 = vst [vmem:[#allocation53_spill] sm:$0xff] %v2228_v3  ;;  %v2241_v43 = vperm.slane %v4231_v27, 1  ;;  %v4249_v27 = vrot.slane %v1939_v6, 6 }
  0x69   : > { %4228 = vst [vmem:[#allocation54_spill] sm:$0xff] %v2232_v36  ;;  %v4237_v36 = vrot.slane %v1935_v4, 4 }
  0x6a   : > { %4230 = vst [vmem:[#allocation55_spill] sm:$0xff] %v2236_v31  ;;  %v2258_v31 = vperm.slane %v4239_v46, 1 }
  0x6b   : > { %4232 = vst [vmem:[#allocation56_spill] sm:$0xff] %v2241_v43  ;;  %v2254_v50 = vperm.slane %v4237_v36, 1  ;;  %v4241_v43 = vrot.slane %v1937_v5, 2  ;;  %v4255_v5 = vrot.slane %v1943_v8, 2 }
  0x6c   : > { %4234 = vst [vmem:[#allocation57_spill] sm:$0xff] %v2245_v44  ;;  %v2267_v44 = vperm.slane %v4243_v62, 1 }
  0x6d   : > { %4236 = vst [vmem:[#allocation58_spill] sm:$0xff] %v2250_v49  ;;  %v2263_v60 = vperm.slane %v4241_v43, 1  ;;  %v4245_v49 = vrot.slane %v1939_v6, 2  ;;  %v4259_v43 = vrot.slane %v1943_v8, 6 }
  0x6e   : > { %4238 = vst [vmem:[#allocation59_spill] sm:$0xff] %v2254_v50  ;;  %v4247_v50 = vrot.slane %v1939_v6, 4 }
  0x6f   : > { %4240 = vst [vmem:[#allocation60_spill] sm:$0xff] %v2258_v31  ;;  %v2272_v36 = vperm.slane %v4245_v49, 1  ;;  %v2280_v31 = vperm.slane %v4249_v27, 1  ;;  %v4263_v49 = vrot.slane %v1945_v9, 4 }
  0x70   : > { %4242 = vst [vmem:[#allocation61_spill] sm:$0xff] %v2263_v60  ;;  %v2276_v46 = vperm.slane %v4247_v50, 1  ;;  %v4251_v60 = vrot.slane %v1941_v7, 2  ;;  %v2294_v50 = vperm.slane %v4255_v5, 1  ;;  %v4265_v7 = vrot.slane %v1947_v11, 2 }
  0x71   : > { %4244 = vst [vmem:[#allocation62_spill] sm:$0xff] %v2267_v44  ;;  %v2289_v44 = vperm.slane %v4253_v0, 1  ;;  %v4273_v5 = vrot.slane %v1949_v12, 4 }
  0x72   : > { %4246 = vst [vmem:[#allocation63_spill] sm:$0xff] %v2272_v36  ;;  %v2285_v62 = vperm.slane %v4251_v60, 1  ;;  %v4269_v60 = vrot.slane %v1947_v11, 6 }
  0x73   : > { %4248 = vst [vmem:[#allocation64_spill] sm:$0xff] %v2276_v46  ;;  %v4257_v46 = vrot.slane %v1943_v8, 4 }
  0x74   : > { %4250 = vst [vmem:[#allocation65_spill] sm:$0xff] %v2280_v31  ;;  %v2302_v31 = vperm.slane %v4259_v43, 1 }
  0x75   : > { %4252 = vst [vmem:[#allocation66_spill] sm:$0xff] %v2285_v62  ;;  %v2298_v27 = vperm.slane %v4257_v46, 1  ;;  %v4261_v62 = vrot.slane %v1945_v9, 2  ;;  %v2316_v46 = vperm.slane %v4265_v7, 1  ;;  %v4275_v9 = vrot.slane %v1951_v13, 2 }
  0x76   : > { %4254 = vst [vmem:[#allocation67_spill] sm:$0xff] %v2289_v44  ;;  %v2311_v44 = vperm.slane %v4263_v49, 1  ;;  %v4283_v7 = vrot.slane %v1953_v14, 4 }
  0x77   : > { %4256 = vst [vmem:[#allocation68_spill] sm:$0xff] %v2294_v50  ;;  %v2307_v0 = vperm.slane %v4261_v62, 1  ;;  %v4279_v62 = vrot.slane %v1951_v13, 6 }
  0x78   : > { %4258 = vst [vmem:[#allocation69_spill] sm:$0xff] %v2298_v27  ;;  %v4267_v27 = vrot.slane %v1947_v11, 4 }
  0x79   : > { %4260 = vst [vmem:[#allocation70_spill] sm:$0xff] %v2302_v31  ;;  %v2324_v31 = vperm.slane %v4269_v60, 1 }
  0x7a   : > { %4262 = vst [vmem:[#allocation71_spill] sm:$0xff] %v2307_v0  ;;  %v2320_v43 = vperm.slane %v4267_v27, 1  ;;  %v4271_v0 = vrot.slane %v1949_v12, 2  ;;  %v2338_v27 = vperm.slane %v4275_v9, 1  ;;  %v4293_v9 = vrot.slane %v1957_v16, 4 }
  0x7b   : > { %4264 = vst [vmem:[#allocation72_spill] sm:$0xff] %v2311_v44  ;;  %v2333_v44 = vperm.slane %v4273_v5, 1 }
  0x7c   : > { %4266 = vst [vmem:[#allocation73_spill] sm:$0xff] %v2316_v46  ;;  %v2329_v49 = vperm.slane %v4271_v0, 1  ;;  %v4289_v0 = vrot.slane %v1955_v15, 6 }
  0x7d   : > { %4268 = vst [vmem:[#allocation74_spill] sm:$0xff] %v2320_v43  ;;  %v4277_v43 = vrot.slane %v1951_v13, 4 }
  0x7e   : > { %4270 = vst [vmem:[#allocation75_spill] sm:$0xff] %v2324_v31  ;;  %v2346_v31 = vperm.slane %v4279_v62, 1 }
  0x7f   : > { %4272 = vst [vmem:[#allocation76_spill] sm:$0xff] %v2329_v49  ;;  %v2342_v60 = vperm.slane %v4277_v43, 1  ;;  %v4281_v49 = vrot.slane %v1953_v14, 2  ;;  %v4295_v14 = vrot.slane %v1959_v17, 2 }
  0x80   : > { %4274 = vst [vmem:[#allocation77_spill] sm:$0xff] %v2333_v44  ;;  %v2355_v44 = vperm.slane %v4283_v7, 1 }
  0x81   : > { %4276 = vst [vmem:[#allocation78_spill] sm:$0xff] %v2338_v27  ;;  %v2351_v5 = vperm.slane %v4281_v49, 1  ;;  %v4285_v27 = vrot.slane %v1955_v15, 2  ;;  %v4299_v49 = vrot.slane %v1959_v17, 6 }
  0x82   : > { %4278 = vst [vmem:[#allocation79_spill] sm:$0xff] %v2342_v60  ;;  %v4287_v60 = vrot.slane %v1955_v15, 4 }
  0x83   : > { %4280 = vst [vmem:[#allocation80_spill] sm:$0xff] %v2346_v31  ;;  %v2360_v43 = vperm.slane %v4285_v27, 1  ;;  %v2368_v31 = vperm.slane %v4289_v0, 1  ;;  %v4303_v27 = vrot.slane %v1961_v18, 4 }
  0x84   : > { %4282 = vst [vmem:[#allocation81_spill] sm:$0xff] %v2351_v5  ;;  %v2364_v62 = vperm.slane %v4287_v60, 1  ;;  %v4291_v5 = vrot.slane %v1957_v16, 2  ;;  %v2382_v60 = vperm.slane %v4295_v14, 1  ;;  %v4305_v16 = vrot.slane %v1963_v19, 2 }
  0x85   : > { %4284 = vst [vmem:[#allocation82_spill] sm:$0xff] %v2355_v44  ;;  %v2377_v44 = vperm.slane %v4293_v9, 1 }
  0x86   : > { %4286 = vst [vmem:[#allocation83_spill] sm:$0xff] %v2360_v43  ;;  %v2373_v7 = vperm.slane %v4291_v5, 1  ;;  %v4309_v5 = vrot.slane %v1963_v19, 6 }
  0x87   : > { %4288 = vst [vmem:[#allocation84_spill] sm:$0xff] %v2364_v62  ;;  %v4297_v62 = vrot.slane %v1959_v17, 4 }
  0x88   : > { %4290 = vst [vmem:[#allocation85_spill] sm:$0xff] %v2368_v31  ;;  %v2390_v31 = vperm.slane %v4299_v49, 1 }
  0x89   : > { %4292 = vst [vmem:[#allocation86_spill] sm:$0xff] %v2373_v7  ;;  %v2386_v0 = vperm.slane %v4297_v62, 1  ;;  %v4301_v7 = vrot.slane %v1961_v18, 2  ;;  %v2404_v62 = vperm.slane %v4305_v16, 1 }
  0x8a   : > { %4294 = vst [vmem:[#allocation87_spill] sm:$0xff] %v2377_v44  ;;  %v2399_v44 = vperm.slane %v4303_v27, 1  ;;  %v4311_v27 = vperm.slane %v1898_v51, 1 }
  0x8b   : > { %4296 = vst [vmem:[#allocation88_spill] sm:$0xff] %v2382_v60  ;;  %v2395_v9 = vperm.slane %v4301_v7, 1 }
  0x8c   : > { %4298 = vst [vmem:[#allocation89_spill] sm:$0xff] %v2386_v0  ;;  %v4307_v0 = vrot.slane %v1963_v19, 4  ;;  %v711_v16 = vsel %vm710_vm0, %v2074_v28, %v4311_v27  ;;  %v4314_v27 = vperm.slane %v1915_v57, 1 }
  0x8d   : > { %4300 = vst [vmem:[#allocation90_spill] sm:$0xff] %v2390_v31  ;;  %v2412_v31 = vperm.slane %v4309_v5, 1  ;;  %v713_v5 = vsel %vm712_vm1, %v2078_v37, %v711_v16  ;;  %v4316_v37 = vperm.slane %v1904_v54, 1 }
  0x8e   : > { %4302 = vst [vmem:[#allocation91_spill] sm:$0xff] %v2395_v9  ;;  %v2408_v49 = vperm.slane %v4307_v0, 1  ;;  %v4312_v0 = vperm.slane %v1902_v53, 1  ;;  %v734_v28 = vsel %vm710_vm0, %v2140_v40, %v4314_v27  ;;  %v715_v53 = vsel %vm714_vm2, %v2082_v33, %v713_v5 }
  0x8f   : > { %4304 = vst [vmem:[#allocation92_spill] sm:$0xff] %v2399_v44  ;;  %v4313_v44 = vperm.slane %v1906_v55, 1 }
  0x90   : > { %4306 = vst [vmem:[#allocation93_spill] sm:$0xff] %v2404_v62  ;;  %v722_v14 = vsel %vm710_vm0, %v2096_v24, %v4312_v0  ;;  %v4427_v24 = vrot.slane %v1904_v54, 2 }
  0x91   : > { %4308 = vst [vmem:[#allocation94_spill] sm:$0xff] %v2408_v49  ;;  %v723_v7 = vsel %vm712_vm1, %v2100_v25, %v722_v14  ;;  %v728_v51 = vsel %vm710_vm0, %v2118_v32, %v4313_v44  ;;  %v735_v14 = vsel %vm712_vm1, %v2144_v41, %v734_v28  ;;  %v4315_v25 = vperm.slane %v1900_v52, 1 }
  0x92   : > { %4310 = vst [vmem:[#allocation95_spill] sm:$0xff] %v2412_v31  ;;  %v724_v0 = vsel %vm714_vm2, %v2104_v10, %v723_v7  ;;  %v729_v16 = vsel %vm712_vm1, %v2122_v34, %v728_v51  ;;  %v736_v7 = vsel %vm714_vm2, %v2148_v35, %v735_v14  ;;  %v4317_v10 = vperm.slane %v1908_v56, 1 }
  0x93   : > { %v717_v44 = vsel %vm716_vm3, %v4315_v25, %v715_v53  ;;  %v725_v27 = vsel %vm716_vm3, %v4316_v37, %v724_v0  ;;  %v730_v5 = vsel %vm714_vm2, %v2126_v26, %v729_v16  ;;  %v4318_v25 = vperm.slane %v1917_v58, 1 }
  0x94   : > { %v719_v51 = vsel %vm718_vm4, %v2087_v21, %v717_v44  ;;  %v726_v28 = vsel %vm718_vm4, %v2109_v29, %v725_v27  ;;  %v731_v53 = vsel %vm716_vm3, %v4317_v10, %v730_v5  ;;  %v4319_v0 = vrot.slane %v1965_v20, 2 }
  0x95   : > { %v737_v37 = vsel %vm716_vm3, %v4318_v25, %v736_v7  ;;  %v4321_v14 = vrot.slane %v1965_v20, 4  ;;  %v2473_v44 = vsel %vm720_vm5, %v2091_v22, %v719_v51  ;;  %v2477_v27 = vsel %vm720_vm5, %v2113_v23, %v726_v28 }
  0x96   : > { %v2465_v16 = vperm.slane %v4319_v0, 1  ;;  %v732_v10 = vsel %vm718_vm4, %v2131_v38, %v731_v53  ;;  %v738_v5 = vsel %vm718_vm4, %v2153_v45, %v737_v37  ;;  %v4323_v7 = vperm.slane %v1919_v59, 1  ;;  %v4331_v45 = vld [vmem:[#allocation7_spill] sm:$0xff] }
  0x97   : > { %v2469_v35 = vperm.slane %v4321_v14, 1  ;;  %v4324_v0 = vperm.slane %v1923_v61, 1  ;;  %v4325_v53 = vperm.slane %v1927_v63, 1  ;;  %v4326_v23 = vperm.slane %v1931_v1, 1 }
  0x98   : > { %4320 = vst [vmem:[#allocation96_spill] sm:$0xff] %v2465_v16  ;;  %v740_v25 = vsel %vm710_vm0, %v2162_v47, %v4323_v7  ;;  %v4327_v47 = vld [vmem:[#allocation40_spill] sm:$0xff]  ;;  %v4332_v38 = vperm.slane %v4331_v45, 1 }
  0x99   : > { %4322 = vst [vmem:[#allocation97_spill] sm:$0xff] %v2469_v35  ;;  %v746_v51 = vsel %vm710_vm0, %v2184_v30, %v4324_v0  ;;  %v741_v28 = vsel %vm712_vm1, %v2166_v48, %v740_v25  ;;  %v752_v37 = vsel %vm710_vm0, %v2206_v39, %v4325_v53  ;;  %v758_v7 = vsel %vm710_vm0, %v2228_v3, %v4326_v23  ;;  %v4328_v0 = vld [vmem:[#allocation45_spill] sm:$0xff]  ;;  %v4333_v39 = vld [vmem:[#allocation8_spill] sm:$0xff]  ;;  %v4335_v3 = vld [vmem:[#allocation50_spill] sm:$0xff] }
  0x9a   : > { %v747_v14 = vsel %vm712_vm1, %v2188_v42, %v746_v51  ;;  %v742_v22 = vsel %vm714_vm2, %v4327_v47, %v741_v28  ;;  %v4329_v25 = vld [vmem:[#allocation49_spill] sm:$0xff]  ;;  %v4330_v51 = vld [vmem:[#allocation54_spill] sm:$0xff]  ;;  %v4334_v29 = vperm.slane %v4333_v39, 1  ;;  %v4336_v47 = vld [vmem:[#allocation55_spill] sm:$0xff] }
  0x9b   : > { %v748_v30 = vsel %vm714_vm2, %v4328_v0, %v747_v14  ;;  %v753_v48 = vsel %vm712_vm1, %v4329_v25, %v752_v37  ;;  %v759_v42 = vsel %vm712_vm1, %v4330_v51, %v758_v7  ;;  %v743_v53 = vsel %vm716_vm3, %v4332_v38, %v742_v22  ;;  %v4337_v0 = vld [vmem:[#allocation41_spill] sm:$0xff]  ;;  %v4338_v25 = vld [vmem:[#allocation46_spill] sm:$0xff] }
  0x9c   : > { %v749_v23 = vsel %vm716_vm3, %v4334_v29, %v748_v30  ;;  %v754_v28 = vsel %vm714_vm2, %v4335_v3, %v753_v48  ;;  %v760_v14 = vsel %vm714_vm2, %v4336_v47, %v759_v42  ;;  %v744_v37 = vsel %vm718_vm4, %v4337_v0, %v743_v53  ;;  %v4339_v51 = vld [vmem:[#allocation9_spill] sm:$0xff]  ;;  %v4342_v30 = vld [vmem:[#allocation32_spill] sm:$0xff]  ;;  %v4344_v47 = vld [vmem:[#allocation42_spill] sm:$0xff] }
  0x9d   : > { %v750_v7 = vsel %vm718_vm4, %v4338_v25, %v749_v23  ;;  %v4340_v21 = vperm.slane %v4339_v51, 1  ;;  %v4341_v22 = vperm.slane %v1933_v2, 1  ;;  %v733_v48 = vsel %vm720_vm5, %v4342_v30, %v732_v10  ;;  %v4343_v3 = vld [vmem:[#allocation37_spill] sm:$0xff]  ;;  %v4345_v0 = vld [vmem:[#allocation47_spill] sm:$0xff] }
  0x9e   : > { %v739_v42 = vsel %vm720_vm5, %v4343_v3, %v738_v5  ;;  %v745_v53 = vsel %vm720_vm5, %v4344_v47, %v744_v37  ;;  %v751_v23 = vsel %vm720_vm5, %v4345_v0, %v750_v7  ;;  %v4346_v25 = vld [vmem:[#allocation51_spill] sm:$0xff]  ;;  %v4350_v30 = vperm.slane %v1939_v6, 1  ;;  %v4352_v7 = vld [vmem:[#allocation64_spill] sm:$0xff]  ;;  %v4359_v3 = vld [vmem:[#allocation10_spill] sm:$0xff] }
  0x9f   : > { %v755_v38 = vsel %vm716_vm3, %v4340_v21, %v754_v28  ;;  %v761_v29 = vsel %vm716_vm3, %v4341_v22, %v760_v14  ;;  %v4347_v21 = vld [vmem:[#allocation56_spill] sm:$0xff]  ;;  %v4348_v14 = vperm.slane %v1935_v4, 1  ;;  %v4349_v22 = vld [vmem:[#allocation58_spill] sm:$0xff]  ;;  %v4351_v37 = vld [vmem:[#allocation59_spill] sm:$0xff]  ;;  %v4360_v33 = vperm.slane %v4359_v3, 1 }
  0xa0   : > { %v756_v26 = vsel %vm718_vm4, %v4346_v25, %v755_v38  ;;  %v762_v28 = vsel %vm718_vm4, %v4347_v21, %v761_v29  ;;  %v770_v5 = vsel %vm710_vm0, %v2272_v36, %v4350_v30  ;;  %v4353_v38 = vperm.slane %v1943_v8, 1  ;;  %v4356_v30 = vld [vmem:[#allocation65_spill] sm:$0xff] }
  0xa1   : > { %v764_v10 = vsel %vm710_vm0, %v4349_v22, %v4348_v14  ;;  %v771_v0 = vsel %vm712_vm1, %v4352_v7, %v770_v5  ;;  %v4354_v21 = vperm.slane %v1947_v11, 1  ;;  %v4355_v22 = vld [vmem:[#allocation60_spill] sm:$0xff]  ;;  %v4358_v5 = vld [vmem:[#allocation74_spill] sm:$0xff] }
  0xa2   : > { %v765_v47 = vsel %vm712_vm1, %v4351_v37, %v764_v10  ;;  %v776_v29 = vsel %vm710_vm0, %v2294_v50, %v4353_v38  ;;  %v772_v36 = vsel %vm714_vm2, %v4356_v30, %v771_v0  ;;  %v4357_v10 = vld [vmem:[#allocation69_spill] sm:$0xff]  ;;  %v4361_v50 = vld [vmem:[#allocation11_spill] sm:$0xff] }
  0xa3   : > { %v782_v14 = vsel %vm710_vm0, %v2316_v46, %v4354_v21  ;;  %v766_v25 = vsel %vm714_vm2, %v4355_v22, %v765_v47  ;;  %v777_v37 = vsel %vm712_vm1, %v4357_v10, %v776_v29  ;;  %v4362_v41 = vperm.slane %v4361_v50, 1  ;;  %v4363_v46 = vld [vmem:[#allocation70_spill] sm:$0xff]  ;;  %v4364_v22 = vld [vmem:[#allocation75_spill] sm:$0xff]  ;;  %v4365_v30 = vld [vmem:[#allocation61_spill] sm:$0xff] }
  0xa4   : > { %v783_v7 = vsel %vm712_vm1, %v4358_v5, %v782_v14  ;;  %v767_v38 = vsel %vm716_vm3, %v4360_v33, %v766_v25  ;;  %v778_v47 = vsel %vm714_vm2, %v4363_v46, %v777_v37  ;;  %v4366_v10 = vld [vmem:[#allocation66_spill] sm:$0xff]  ;;  %v4367_v5 = vld [vmem:[#allocation12_spill] sm:$0xff]  ;;  %v4369_v25 = vperm.slane %v1949_v12, 1  ;;  %v4371_v46 = vld [vmem:[#allocation57_spill] sm:$0xff] }
  0xa5   : > { %v773_v21 = vsel %vm716_vm3, %v4362_v41, %v772_v36  ;;  %v784_v0 = vsel %vm714_vm2, %v4364_v22, %v783_v7  ;;  %v768_v29 = vsel %vm718_vm4, %v4365_v30, %v767_v38  ;;  %v4368_v34 = vperm.slane %v4367_v5, 1  ;;  %v4370_v36 = vld [vmem:[#allocation52_spill] sm:$0xff]  ;;  %v4372_v22 = vld [vmem:[#allocation62_spill] sm:$0xff]  ;;  %v4373_v30 = vld [vmem:[#allocation67_spill] sm:$0xff] }
  0xa6   : > { %v774_v14 = vsel %vm718_vm4, %v4366_v10, %v773_v21  ;;  %v785_v41 = vsel %vm716_vm3, %v4369_v25, %v784_v0  ;;  %v757_v37 = vsel %vm720_vm5, %v4370_v36, %v756_v26  ;;  %v763_v7 = vsel %vm720_vm5, %v4371_v46, %v762_v28  ;;  %v4374_v10 = vld [vmem:[#allocation71_spill] sm:$0xff]  ;;  %v4377_v25 = vld [vmem:[#allocation78_spill] sm:$0xff] }
  0xa7   : > { %v779_v33 = vsel %vm716_vm3, %v4368_v34, %v778_v47  ;;  %v769_v38 = vsel %vm720_vm5, %v4372_v22, %v768_v29  ;;  %v775_v21 = vsel %vm720_vm5, %v4373_v30, %v774_v14  ;;  %v4375_v34 = vld [vmem:[#allocation76_spill] sm:$0xff]  ;;  %v4376_v0 = vperm.slane %v1951_v13, 1  ;;  %v4379_v29 = vld [vmem:[#allocation79_spill] sm:$0xff] }
  0xa8   : > { %v780_v40 = vsel %vm718_vm4, %v4374_v10, %v779_v33  ;;  %v786_v47 = vsel %vm718_vm4, %v4375_v34, %v785_v41  ;;  %v4378_v36 = vperm.slane %v1955_v15, 1  ;;  %v4380_v14 = vld [vmem:[#allocation84_spill] sm:$0xff]  ;;  %v4381_v33 = vperm.slane %v1959_v17, 1 }
  0xa9   : > { %v788_v26 = vsel %vm710_vm0, %v4377_v25, %v4376_v0  ;;  %v4382_v34 = vperm.slane %v1963_v19, 1  ;;  %v4383_v25 = vld [vmem:[#allocation80_spill] sm:$0xff] }
  0xaa   : > { %v794_v28 = vsel %vm710_vm0, %v2360_v43, %v4378_v36  ;;  %v789_v22 = vsel %vm712_vm1, %v4379_v29, %v788_v26  ;;  %v800_v41 = vsel %vm710_vm0, %v2382_v60, %v4381_v33  ;;  %v4384_v36 = vld [vmem:[#allocation85_spill] sm:$0xff]  ;;  %v4388_v60 = vld [vmem:[#allocation14_spill] sm:$0xff] }
  0xab   : > { %v795_v30 = vsel %vm712_vm1, %v4380_v14, %v794_v28  ;;  %v806_v0 = vsel %vm710_vm0, %v2404_v62, %v4382_v34  ;;  %v790_v10 = vsel %vm714_vm2, %v4383_v25, %v789_v22  ;;  %v4385_v26 = vld [vmem:[#allocation89_spill] sm:$0xff]  ;;  %v4389_v32 = vperm.slane %v4388_v60, 1  ;;  %v4390_v62 = vld [vmem:[#allocation90_spill] sm:$0xff] }
  0xac   : > { %v796_v43 = vsel %vm714_vm2, %v4384_v36, %v795_v30  ;;  %v801_v29 = vsel %vm712_vm1, %v4385_v26, %v800_v41  ;;  %v807_v28 = vsel %vm712_vm1, %v2408_v49, %v806_v0  ;;  %v4386_v14 = vld [vmem:[#allocation13_spill] sm:$0xff]  ;;  %v4392_v25 = vld [vmem:[#allocation86_spill] sm:$0xff]  ;;  %v4393_v49 = vperm.slane %v1961_v18, 1 }
  0xad   : > { %v4387_v46 = vperm.slane %v4386_v14, 1  ;;  %v797_v34 = vsel %vm716_vm3, %v4389_v32, %v796_v43  ;;  %v802_v22 = vsel %vm714_vm2, %v4390_v62, %v801_v29  ;;  %v808_v30 = vsel %vm714_vm2, %v2412_v31, %v807_v28  ;;  %v4391_v36 = vld [vmem:[#allocation81_spill] sm:$0xff]  ;;  %v4395_v43 = vld [vmem:[#allocation72_spill] sm:$0xff] }
  0xae   : > { %v798_v0 = vsel %vm718_vm4, %v4392_v25, %v797_v34  ;;  %v781_v29 = vsel %vm720_vm5, %v4395_v43, %v780_v40  ;;  %v4396_v62 = vld [vmem:[#allocation77_spill] sm:$0xff]  ;;  %v4397_v25 = vld [vmem:[#allocation82_spill] sm:$0xff]  ;;  %v4399_v31 = vld [vmem:[#allocation92_spill] sm:$0xff] }
  0xaf   : > { %v791_v33 = vsel %vm716_vm3, %v4387_v46, %v790_v10  ;;  %v803_v46 = vsel %vm716_vm3, %v4393_v49, %v802_v22  ;;  %v4394_v10 = vperm.slane %v1965_v20, 1  ;;  %v787_v28 = vsel %vm720_vm5, %v4396_v62, %v786_v47  ;;  %v4398_v49 = vld [vmem:[#allocation87_spill] sm:$0xff] }
  0xb0   : > { %v792_v41 = vsel %vm718_vm4, %v4391_v36, %v791_v33  ;;  %v804_v33 = vsel %vm718_vm4, %v2395_v9, %v803_v46  ;;  %v799_v22 = vsel %vm720_vm5, %v4398_v49, %v798_v0  ;;  %v2669_v47 = vsel %vm828_vm6, 0.0, %v2473_v44 }
  0xb1   : > { %v809_v32 = vsel %vm716_vm3, %v4394_v10, %v808_v30  ;;  %v793_v36 = vsel %vm720_vm5, %v4397_v25, %v792_v41  ;;  %v805_v30 = vsel %vm720_vm5, %v4399_v31, %v804_v33  ;;  %4400 = vst [vmem:[#allocation98_spill] sm:$0xff] %v2669_v47  ;;  %v2673_v46 = vsel %vm828_vm6, 0.0, %v2477_v27  ;;  %v4402_v10 = vld [vmem:[#allocation5_spill] sm:$0xff] }
  0xb2   : > { %v810_v34 = vsel %vm718_vm4, %v2465_v16, %v809_v32  ;;  %4401 = vst [vmem:[#allocation99_spill] sm:$0xff] %v2673_v46  ;;  %v2677_v32 = vsel %vm828_vm6, 0.0, %v733_v48  ;;  %v2680_v0 = vsel %vm828_vm6, 0.0, %v739_v42  ;;  %v2683_v33 = vsel %vm828_vm6, 0.0, %v745_v53 }
  0xb3   : > { %v811_v40 = vsel %vm720_vm5, %v2469_v35, %v810_v34  ;;  %4403 = vst [vmem:[#allocation100_spill] sm:$0xff] %v2677_v32  ;;  %v2686_v34 = vsel %vm828_vm6, 0.0, %v751_v23  ;;  %v2689_v44 = vsel %vm828_vm6, 0.0, %v757_v37  ;;  %v2692_v27 = vsel %vm828_vm6, 0.0, %v763_v7 }
  0xb4   : > { %4404 = vst [vmem:[#allocation101_spill] sm:$0xff] %v2680_v0  ;;  %v2695_v41 = vsel %vm828_vm6, 0.0, %v769_v38  ;;  %v2698_v48 = vsel %vm828_vm6, 0.0, %v775_v21  ;;  %v2701_v42 = vsel %vm828_vm6, 0.0, %v781_v29  ;;  %v2704_v53 = vsel %vm828_vm6, 0.0, %v787_v28 }
  0xb5   : > { %4405 = vst [vmem:[#allocation102_spill] sm:$0xff] %v2683_v33  ;;  %v2707_v23 = vsel %vm828_vm6, 0.0, %v793_v36  ;;  %v2710_v37 = vsel %vm828_vm6, 0.0, %v799_v22  ;;  %v2713_v7 = vsel %vm828_vm6, 0.0, %v805_v30  ;;  %v2716_v38 = vsel %vm828_vm6, 0.0, %v811_v40 }
  0xb6   : > { %4406 = vst [vmem:[#allocation103_spill] sm:$0xff] %v2686_v34  ;;  %v4417_v21 = vrot.slane %v4402_v10, 2  ;;  %v4418_v29 = vrot.slane %v4402_v10, 4  ;;  %v4419_v36 = vrot.slane %v4402_v10, 6  ;;  %v4420_v30 = vrot.slane %v1900_v52, 2 }
  0xb7   : > { %4407 = vst [vmem:[#allocation104_spill] sm:$0xff] %v2689_v44  ;;  %v4421_v40 = vrot.slane %v1900_v52, 4  ;;  %v4428_v9 = vrot.slane %v1904_v54, 4  ;;  %v4440_v33 = vrot.slane %v1917_v58, 2  ;;  %v4445_v46 = vrot.slane %v1919_v59, 2 }
  0xb8   : > { %4408 = vst [vmem:[#allocation105_spill] sm:$0xff] %v2692_v27  ;;  %v2720_v35 = vperm.slane %v4417_v21, 0  ;;  %v2724_v28 = vperm.slane %v4418_v29, 0  ;;  %v2728_v31 = vperm.slane %v4419_v36, 0  ;;  %v2733_v49 = vperm.slane %v4420_v30, 0  ;;  %v4423_v29 = vld [vmem:[#allocation6_spill] sm:$0xff] }
  0xb9   : > { %4409 = vst [vmem:[#allocation106_spill] sm:$0xff] %v2695_v41  ;;  %v2737_v25 = vperm.slane %v4421_v40, 0  ;;  %v4422_v21 = vrot.slane %v1900_v52, 6  ;;  %v4424_v26 = vrot.slane %v4423_v29, 2  ;;  %v4425_v22 = vrot.slane %v4423_v29, 4 }
  0xba   : > { %4410 = vst [vmem:[#allocation107_spill] sm:$0xff] %v2698_v48  ;;  %v4426_v30 = vrot.slane %v4423_v29, 6  ;;  %v4431_v40 = vrot.slane %v1906_v55, 4  ;;  %v4437_v27 = vrot.slane %v1915_v57, 2 }
  0xbb   : > { %4411 = vst [vmem:[#allocation108_spill] sm:$0xff] %v2701_v42  ;;  %v2741_v16 = vperm.slane %v4422_v21, 0  ;;  %v2746_v36 = vperm.slane %v4424_v26, 0  ;;  %v2750_v62 = vperm.slane %v4425_v22, 0  ;;  %v2759_v21 = vperm.slane %v4427_v24, 0 }
  0xbc   : > { %4412 = vst [vmem:[#allocation109_spill] sm:$0xff] %v2704_v53  ;;  %v2754_v43 = vperm.slane %v4426_v30, 0  ;;  %v4429_v26 = vrot.slane %v1904_v54, 6  ;;  %v4432_v24 = vrot.slane %v1906_v55, 6  ;;  %v4433_v42 = vrot.slane %v1908_v56, 2 }
  0xbd   : > { %4413 = vst [vmem:[#allocation110_spill] sm:$0xff] %v2707_v23  ;;  %v2776_v23 = vperm.slane %v4431_v40, 0  ;;  %v4434_v22 = vrot.slane %v1908_v56, 4  ;;  %v4441_v40 = vrot.slane %v1917_v58, 4 }
  0xbe   : > { %4414 = vst [vmem:[#allocation111_spill] sm:$0xff] %v2710_v37  ;;  %v4430_v37 = vrot.slane %v1906_v55, 2  ;;  %v2780_v53 = vperm.slane %v4432_v24, 0  ;;  %v2798_v24 = vperm.slane %v4437_v27, 0  ;;  %v4443_v27 = vrot.slane %v1917_v58, 6 }
  0xbf   : > { %4415 = vst [vmem:[#allocation112_spill] sm:$0xff] %v2713_v7  ;;  %v2767_v7 = vperm.slane %v4429_v26, 0  ;;  %v2785_v26 = vperm.slane %v4433_v42, 0  ;;  %v2789_v48 = vperm.slane %v4434_v22, 0  ;;  %v4439_v42 = vrot.slane %v1915_v57, 6 }
  0xc0   : > { %4416 = vst [vmem:[#allocation113_spill] sm:$0xff] %v2716_v38  ;;  %v2763_v38 = vperm.slane %v4428_v9, 0  ;;  %v2772_v30 = vperm.slane %v4430_v37, 0  ;;  %v4435_v37 = vrot.slane %v1908_v56, 6  ;;  %v4438_v9 = vrot.slane %v1915_v57, 4 }
  0xc1   : > { %v2806_v34 = vperm.slane %v4439_v42, 0  ;;  %v2815_v0 = vperm.slane %v4441_v40, 0  ;;  %v2819_v32 = vperm.slane %v4443_v27, 0  ;;  %v2824_v42 = vperm.slane %v4445_v46, 0 }
  0xc2   : > { %v2793_v41 = vperm.slane %v4435_v37, 0  ;;  %v2802_v44 = vperm.slane %v4438_v9, 0  ;;  %v2811_v37 = vperm.slane %v4440_v33, 0  ;;  %v4447_v22 = vrot.slane %v1919_v59, 4 }
  0xc3   : > { %4442 = vst [vmem:[#allocation114_spill] sm:$0xff] %v2815_v0  ;;  %v4449_v33 = vrot.slane %v1919_v59, 6  ;;  %v4451_v0 = vrot.slane %v4331_v45, 2  ;;  %v4453_v9 = vrot.slane %v4331_v45, 4  ;;  %v4455_v46 = vrot.slane %v4331_v45, 6 }
  0xc4   : > { %4436 = vst [vmem:[#allocation6_spill] sm:$0xff] %v2793_v41  ;;  %v2828_v47 = vperm.slane %v4447_v22, 0  ;;  %v4458_v40 = vrot.slane %v1923_v61, 4  ;;  %v4464_v22 = vrot.slane %v4333_v39, 4 }
  0xc5   : > { %4444 = vst [vmem:[#allocation115_spill] sm:$0xff] %v2819_v32  ;;  %v2832_v41 = vperm.slane %v4449_v33, 0  ;;  %v2837_v27 = vperm.slane %v4451_v0, 0  ;;  %v2841_v32 = vperm.slane %v4453_v9, 0  ;;  %v4460_v0 = vrot.slane %v1923_v61, 6 }
  0xc6   : > { %4446 = vst [vmem:[#allocation116_spill] sm:$0xff] %v2824_v42  ;;  %v2845_v42 = vperm.slane %v4455_v46, 0  ;;  %v4469_v9 = vrot.slane %v1927_v63, 4 }
  0xc7   : > { %4448 = vst [vmem:[#allocation117_spill] sm:$0xff] %v2828_v47  ;;  %v4457_v47 = vrot.slane %v1923_v61, 2 }
  0xc8   : > { %4450 = vst [vmem:[#allocation118_spill] sm:$0xff] %v2832_v41  ;;  %v2854_v41 = vperm.slane %v4458_v40, 0  ;;  %v4475_v40 = vrot.slane %v4339_v51, 4 }
  0xc9   : > { %4452 = vst [vmem:[#allocation119_spill] sm:$0xff] %v2837_v27  ;;  %v2850_v33 = vperm.slane %v4457_v47, 0  ;;  %v2858_v27 = vperm.slane %v4460_v0, 0  ;;  %v4466_v47 = vrot.slane %v4333_v39, 6 }
  0xca   : > { %4454 = vst [vmem:[#allocation120_spill] sm:$0xff] %v2841_v32  ;;  %v4462_v32 = vrot.slane %v4333_v39, 2 }
  0xcb   : > { %4456 = vst [vmem:[#allocation121_spill] sm:$0xff] %v2845_v42  ;;  %v2867_v42 = vperm.slane %v4464_v22, 0  ;;  %v2871_v45 = vperm.slane %v4466_v47, 0  ;;  %v4480_v22 = vrot.slane %v1931_v1, 4 }
  0xcc   : > { %4459 = vst [vmem:[#allocation122_spill] sm:$0xff] %v2854_v41  ;;  %v2863_v46 = vperm.slane %v4462_v32, 0  ;;  %v4468_v41 = vrot.slane %v1927_v63, 2  ;;  %v4471_v32 = vrot.slane %v1927_v63, 6 }
  0xcd   : > { %4461 = vst [vmem:[#allocation123_spill] sm:$0xff] %v2858_v27  ;;  %v2880_v27 = vperm.slane %v4469_v9, 0  ;;  %v4486_v9 = vrot.slane %v1933_v2, 4 }
  0xce   : > { %4463 = vst [vmem:[#allocation124_spill] sm:$0xff] %v2863_v46  ;;  %v2876_v0 = vperm.slane %v4468_v41, 0  ;;  %v2884_v46 = vperm.slane %v4471_v32, 0  ;;  %v4477_v41 = vrot.slane %v4339_v51, 6 }
  0xcf   : > { %4465 = vst [vmem:[#allocation125_spill] sm:$0xff] %v2867_v42  ;;  %v4473_v42 = vrot.slane %v4339_v51, 2 }
  0xd0   : > { %4467 = vst [vmem:[#allocation126_spill] sm:$0xff] %v2871_v45  ;;  %v2893_v45 = vperm.slane %v4475_v40, 0  ;;  %v2897_v39 = vperm.slane %v4477_v41, 0  ;;  %v4492_v40 = vrot.slane %v1935_v4, 4 }
  0xd1   : > { %4470 = vst [vmem:[#allocation127_spill] sm:$0xff] %v2880_v27  ;;  %v2889_v47 = vperm.slane %v4473_v42, 0  ;;  %v4479_v27 = vrot.slane %v1931_v1, 2  ;;  %v4482_v42 = vrot.slane %v1931_v1, 6 }
  0xd2   : > { %4472 = vst [vmem:[#allocation128_spill] sm:$0xff] %v2884_v46  ;;  %v2906_v46 = vperm.slane %v4480_v22, 0  ;;  %v4498_v22 = vrot.slane %v4359_v3, 4 }
  0xd3   : > { %4474 = vst [vmem:[#allocation129_spill] sm:$0xff] %v2889_v47  ;;  %v2902_v32 = vperm.slane %v4479_v27, 0  ;;  %v2910_v47 = vperm.slane %v4482_v42, 0  ;;  %v4488_v27 = vrot.slane %v1933_v2, 6 }
  0xd4   : > { %4476 = vst [vmem:[#allocation130_spill] sm:$0xff] %v2893_v45  ;;  %v4484_v45 = vrot.slane %v1933_v2, 2 }
  0xd5   : > { %4478 = vst [vmem:[#allocation131_spill] sm:$0xff] %v2897_v39  ;;  %v2919_v39 = vperm.slane %v4486_v9, 0  ;;  %v2923_v51 = vperm.slane %v4488_v27, 0  ;;  %v4503_v9 = vrot.slane %v1939_v6, 4 }
  0xd6   : > { %4481 = vst [vmem:[#allocation132_spill] sm:$0xff] %v2906_v46  ;;  %v2915_v41 = vperm.slane %v4484_v45, 0  ;;  %v4490_v46 = vrot.slane %v1935_v4, 2  ;;  %v4494_v45 = vrot.slane %v1935_v4, 6 }
  0xd7   : > { %4483 = vst [vmem:[#allocation133_spill] sm:$0xff] %v2910_v47  ;;  %v2932_v47 = vperm.slane %v4492_v40, 0  ;;  %v4509_v40 = vrot.slane %v4361_v50, 4 }
  0xd8   : > { %4485 = vst [vmem:[#allocation134_spill] sm:$0xff] %v2915_v41  ;;  %v2928_v42 = vperm.slane %v4490_v46, 0  ;;  %v2936_v41 = vperm.slane %v4494_v45, 0  ;;  %v4500_v46 = vrot.slane %v4359_v3, 6 }
  0xd9   : > { %4487 = vst [vmem:[#allocation135_spill] sm:$0xff] %v2919_v39  ;;  %v4496_v39 = vrot.slane %v4359_v3, 2 }
  0xda   : > { %4489 = vst [vmem:[#allocation136_spill] sm:$0xff] %v2923_v51  ;;  %v2945_v51 = vperm.slane %v4498_v22, 0  ;;  %v4514_v22 = vrot.slane %v1943_v8, 4 }
  0xdb   : > { %4491 = vst [vmem:[#allocation137_spill] sm:$0xff] %v2928_v42  ;;  %v2941_v27 = vperm.slane %v4496_v39, 0  ;;  %v2949_v42 = vperm.slane %v4500_v46, 0  ;;  %v4505_v39 = vrot.slane %v1939_v6, 6 }
  0xdc   : > { %4493 = vst [vmem:[#allocation138_spill] sm:$0xff] %v2932_v47  ;;  %v4502_v47 = vrot.slane %v1939_v6, 2 }
  0xdd   : > { %4495 = vst [vmem:[#allocation139_spill] sm:$0xff] %v2936_v41  ;;  %v2958_v41 = vperm.slane %v4503_v9, 0  ;;  %v4520_v9 = vrot.slane %v4367_v5, 4 }
  0xde   : > { %4497 = vst [vmem:[#allocation140_spill] sm:$0xff] %v2941_v27  ;;  %v2954_v45 = vperm.slane %v4502_v47, 0  ;;  %v2962_v27 = vperm.slane %v4505_v39, 0  ;;  %v4511_v47 = vrot.slane %v4361_v50, 6 }
  0xdf   : > { %4499 = vst [vmem:[#allocation141_spill] sm:$0xff] %v2945_v51  ;;  %v4507_v51 = vrot.slane %v4361_v50, 2 }
  0xe0   : > { %4501 = vst [vmem:[#allocation142_spill] sm:$0xff] %v2949_v42  ;;  %v2971_v42 = vperm.slane %v4509_v40, 0  ;;  %v2975_v3 = vperm.slane %v4511_v47, 0  ;;  %v4525_v40 = vrot.slane %v1947_v11, 4 }
  0xe1   : > { %4504 = vst [vmem:[#allocation143_spill] sm:$0xff] %v2958_v41  ;;  %v2967_v46 = vperm.slane %v4507_v51, 0  ;;  %v4513_v41 = vrot.slane %v1943_v8, 2  ;;  %v4516_v51 = vrot.slane %v1943_v8, 6 }
  0xe2   : > { %4506 = vst [vmem:[#allocation144_spill] sm:$0xff] %v2962_v27  ;;  %v2984_v27 = vperm.slane %v4514_v22, 0  ;;  %v4531_v22 = vrot.slane %v1949_v12, 4 }
  0xe3   : > { %4508 = vst [vmem:[#allocation145_spill] sm:$0xff] %v2967_v46  ;;  %v2980_v39 = vperm.slane %v4513_v41, 0  ;;  %v2988_v46 = vperm.slane %v4516_v51, 0  ;;  %v4522_v41 = vrot.slane %v4367_v5, 6 }
  0xe4   : > { %4510 = vst [vmem:[#allocation146_spill] sm:$0xff] %v2971_v42  ;;  %v4518_v42 = vrot.slane %v4367_v5, 2 }
  0xe5   : > { %4512 = vst [vmem:[#allocation147_spill] sm:$0xff] %v2975_v3  ;;  %v2997_v3 = vperm.slane %v4520_v9, 0  ;;  %v3001_v50 = vperm.slane %v4522_v41, 0  ;;  %v4537_v9 = vrot.slane %v1951_v13, 4 }
  0xe6   : > { %4515 = vst [vmem:[#allocation148_spill] sm:$0xff] %v2984_v27  ;;  %v2993_v47 = vperm.slane %v4518_v42, 0  ;;  %v4524_v27 = vrot.slane %v1947_v11, 2  ;;  %v4527_v42 = vrot.slane %v1947_v11, 6 }
  0xe7   : > { %4517 = vst [vmem:[#allocation149_spill] sm:$0xff] %v2988_v46  ;;  %v3010_v46 = vperm.slane %v4525_v40, 0  ;;  %v4543_v40 = vrot.slane %v4386_v14, 4 }
  0xe8   : > { %4519 = vst [vmem:[#allocation150_spill] sm:$0xff] %v2993_v47  ;;  %v3006_v51 = vperm.slane %v4524_v27, 0  ;;  %v3014_v47 = vperm.slane %v4527_v42, 0  ;;  %v4533_v27 = vrot.slane %v1949_v12, 6 }
  0xe9   : > { %4521 = vst [vmem:[#allocation151_spill] sm:$0xff] %v2997_v3  ;;  %v4529_v3 = vrot.slane %v1949_v12, 2 }
  0xea   : > { %4523 = vst [vmem:[#allocation152_spill] sm:$0xff] %v3001_v50  ;;  %v3023_v50 = vperm.slane %v4531_v22, 0  ;;  %v3027_v5 = vperm.slane %v4533_v27, 0  ;;  %v4548_v22 = vrot.slane %v1955_v15, 4 }
  0xeb   : > { %4526 = vst [vmem:[#allocation153_spill] sm:$0xff] %v3010_v46  ;;  %v3019_v41 = vperm.slane %v4529_v3, 0  ;;  %v4535_v46 = vrot.slane %v1951_v13, 2  ;;  %v4539_v3 = vrot.slane %v1951_v13, 6 }
  0xec   : > { %4528 = vst [vmem:[#allocation154_spill] sm:$0xff] %v3014_v47  ;;  %v3036_v47 = vperm.slane %v4537_v9, 0  ;;  %v4554_v9 = vrot.slane %v4388_v60, 4 }
  0xed   : > { %4530 = vst [vmem:[#allocation155_spill] sm:$0xff] %v3019_v41  ;;  %v3032_v42 = vperm.slane %v4535_v46, 0  ;;  %v3040_v41 = vperm.slane %v4539_v3, 0  ;;  %v4545_v46 = vrot.slane %v4386_v14, 6 }
  0xee   : > { %4532 = vst [vmem:[#allocation156_spill] sm:$0xff] %v3023_v50  ;;  %v4541_v50 = vrot.slane %v4386_v14, 2 }
  0xef   : > { %4534 = vst [vmem:[#allocation157_spill] sm:$0xff] %v3027_v5  ;;  %v3049_v5 = vperm.slane %v4543_v40, 0  ;;  %v4559_v40 = vrot.slane %v1959_v17, 4 }
  0xf0   : > { %4536 = vst [vmem:[#allocation158_spill] sm:$0xff] %v3032_v42  ;;  %v3045_v27 = vperm.slane %v4541_v50, 0  ;;  %v3053_v42 = vperm.slane %v4545_v46, 0  ;;  %v4550_v50 = vrot.slane %v1955_v15, 6 }
  0xf1   : > { %4538 = vst [vmem:[#allocation159_spill] sm:$0xff] %v3036_v47  ;;  %v4547_v47 = vrot.slane %v1955_v15, 2 }
  0xf2   : > { %4540 = vst [vmem:[#allocation160_spill] sm:$0xff] %v3040_v41  ;;  %v3062_v41 = vperm.slane %v4548_v22, 0  ;;  %v4565_v22 = vrot.slane %v1961_v18, 4 }
  0xf3   : > { %4542 = vst [vmem:[#allocation161_spill] sm:$0xff] %v3045_v27  ;;  %v3058_v3 = vperm.slane %v4547_v47, 0  ;;  %v3066_v27 = vperm.slane %v4550_v50, 0  ;;  %v4556_v47 = vrot.slane %v4388_v60, 6 }
  0xf4   : > { %4544 = vst [vmem:[#allocation162_spill] sm:$0xff] %v3049_v5  ;;  %v4552_v5 = vrot.slane %v4388_v60, 2 }
  0xf5   : > { %4546 = vst [vmem:[#allocation163_spill] sm:$0xff] %v3053_v42  ;;  %v3075_v42 = vperm.slane %v4554_v9, 0  ;;  %v3079_v14 = vperm.slane %v4556_v47, 0  ;;  %v4570_v9 = vrot.slane %v1963_v19, 4 }
  0xf6   : > { %4549 = vst [vmem:[#allocation164_spill] sm:$0xff] %v3062_v41  ;;  %v3071_v46 = vperm.slane %v4552_v5, 0  ;;  %v4558_v41 = vrot.slane %v1959_v17, 2  ;;  %v4561_v5 = vrot.slane %v1959_v17, 6 }
  0xf7   : > { %4551 = vst [vmem:[#allocation165_spill] sm:$0xff] %v3066_v27  ;;  %v3088_v27 = vperm.slane %v4559_v40, 0  ;;  %v4573_v40 = vperm.slane %v4402_v10, 0 }
  0xf8   : > { %4553 = vst [vmem:[#allocation166_spill] sm:$0xff] %v3071_v46  ;;  %v3084_v50 = vperm.slane %v4558_v41, 0  ;;  %v3092_v46 = vperm.slane %v4561_v5, 0  ;;  %v4567_v41 = vrot.slane %v1961_v18, 6 }
  0xf9   : > { %4555 = vst [vmem:[#allocation167_spill] sm:$0xff] %v3075_v42  ;;  %v4563_v42 = vrot.slane %v1961_v18, 2  ;;  %v4576_v18 = vperm.slane %v1915_v57, 0 }
  0xfa   : > { %4557 = vst [vmem:[#allocation168_spill] sm:$0xff] %v3079_v14  ;;  %v3101_v14 = vperm.slane %v4565_v22, 0  ;;  %v3105_v60 = vperm.slane %v4567_v41, 0 }
  0xfb   : > { %4560 = vst [vmem:[#allocation169_spill] sm:$0xff] %v3088_v27  ;;  %v3097_v47 = vperm.slane %v4563_v42, 0  ;;  %v4569_v27 = vrot.slane %v1963_v19, 2  ;;  %v4571_v42 = vrot.slane %v1963_v19, 6 }
  0xfc   : > { %4562 = vst [vmem:[#allocation170_spill] sm:$0xff] %v3092_v46  ;;  %v3114_v46 = vperm.slane %v4570_v9, 0 }
  0xfd   : > { %4564 = vst [vmem:[#allocation171_spill] sm:$0xff] %v3097_v47  ;;  %v3110_v5 = vperm.slane %v4569_v27, 0  ;;  %v3118_v47 = vperm.slane %v4571_v42, 0  ;;  %v974_v27 = vsel %vm973_vm7, %v2720_v35, %v4573_v40  ;;  %v4575_v42 = vperm.slane %v1906_v55, 0 }
  0xfe   : > { %4566 = vst [vmem:[#allocation172_spill] sm:$0xff] %v3101_v14  ;;  %v4572_v14 = vrot.slane %v1965_v20, 2  ;;  %v975_v10 = vsel %vm710_vm0, %v2724_v28, %v974_v27 }
  0xff   : > { %4568 = vst [vmem:[#allocation173_spill] sm:$0xff] %v3105_v60  ;;  %v4574_v60 = vperm.slane %v4423_v29, 0  ;;  %v988_v22 = vsel %vm973_vm7, %v2772_v30, %v4575_v42  ;;  %v4581_v42 = vrot.slane %v1965_v20, 4 }
 0x100   : > { %v3123_v41 = vperm.slane %v4572_v14, 0  ;;  %v995_v14 = vsel %vm973_vm7, %v2798_v24, %v4576_v18  ;;  %v989_v40 = vsel %vm710_vm0, %v2776_v23, %v988_v22  ;;  %v4578_v23 = vperm.slane %v1904_v54, 0 }
 0x101   : > { %v981_v9 = vsel %vm973_vm7, %v2746_v36, %v4574_v60  ;;  %v996_v60 = vsel %vm710_vm0, %v2802_v44, %v995_v14  ;;  %v976_v36 = vsel %vm712_vm1, %v2728_v31, %v975_v10  ;;  %v990_v18 = vsel %vm712_vm1, %v2780_v53, %v989_v40 }
 0x102   : > { %v982_v35 = vsel %vm710_vm0, %v2750_v62, %v981_v9  ;;  %v997_v28 = vsel %vm712_vm1, %v2806_v34, %v996_v60  ;;  %v4577_v62 = vperm.slane %v1900_v52, 0  ;;  %v4579_v22 = vperm.slane %v1908_v56, 0 }
 0x103   : > { %v983_v30 = vsel %vm712_vm1, %v2754_v43, %v982_v35  ;;  %v4580_v43 = vperm.slane %v1917_v58, 0  ;;  %v3179_v14 = vperm.slane %v4581_v42, 0  ;;  %v4582_v35 = vrot.slane %v1965_v20, 6  ;;  %v4596_v42 = vld [vmem:[#allocation128_spill] sm:$0xff] }
 0x104   : > { %v977_v24 = vsel %vm714_vm2, %v4577_v62, %v976_v36  ;;  %v984_v44 = vsel %vm714_vm2, %v4578_v23, %v983_v30  ;;  %v991_v31 = vsel %vm714_vm2, %v4579_v22, %v990_v18  ;;  %v4584_v36 = vld [vmem:[#allocation114_spill] sm:$0xff]  ;;  %v4585_v18 = vperm.slane %v1919_v59, 0  ;;  %v4590_v23 = vld [vmem:[#allocation117_spill] sm:$0xff] }
 0x105   : > { %v998_v10 = vsel %vm714_vm2, %v4580_v43, %v997_v28  ;;  %v978_v53 = vsel %vm716_vm3, %v2733_v49, %v977_v24  ;;  %v985_v34 = vsel %vm716_vm3, %v2759_v21, %v984_v44  ;;  %v992_v27 = vsel %vm716_vm3, %v2785_v26, %v991_v31  ;;  %v4591_v22 = vld [vmem:[#allocation122_spill] sm:$0xff]  ;;  %v4592_v43 = vld [vmem:[#allocation127_spill] sm:$0xff] }
 0x106   : > { %v999_v9 = vsel %vm716_vm3, %v2811_v37, %v998_v10  ;;  %v3183_v40 = vperm.slane %v4582_v35, 0  ;;  %v979_v49 = vsel %vm718_vm4, %v2737_v25, %v978_v53  ;;  %v986_v21 = vsel %vm718_vm4, %v2763_v38, %v985_v34  ;;  %v4586_v25 = vld [vmem:[#allocation116_spill] sm:$0xff]  ;;  %v4594_v34 = vld [vmem:[#allocation118_spill] sm:$0xff]  ;;  %v4597_v35 = vld [vmem:[#allocation133_spill] sm:$0xff] }
 0x107   : > { %v3191_v26 = vsel %vm720_vm5, %v2741_v16, %v979_v49  ;;  %v3195_v37 = vsel %vm720_vm5, %v2767_v7, %v986_v21  ;;  %v993_v60 = vsel %vm718_vm4, %v2789_v48, %v992_v27  ;;  %v1000_v30 = vsel %vm718_vm4, %v4584_v36, %v999_v9  ;;  %v4595_v27 = vld [vmem:[#allocation123_spill] sm:$0xff] }
 0x108   : > { %4583 = vst [vmem:[#allocation174_spill] sm:$0xff] %v3191_v26  ;;  %v1002_v28 = vsel %vm973_vm7, %v4586_v25, %v4585_v18  ;;  %v4587_v38 = vperm.slane %v1923_v61, 0  ;;  %v4588_v62 = vperm.slane %v1927_v63, 0  ;;  %v4589_v48 = vperm.slane %v1931_v1, 0  ;;  %v4598_v21 = vld [vmem:[#allocation7_spill] sm:$0xff]  ;;  %v4600_v25 = vld [vmem:[#allocation8_spill] sm:$0xff] }
 0x109   : > { %v1003_v44 = vsel %vm710_vm0, %v4590_v23, %v1002_v28  ;;  %v4599_v36 = vperm.slane %v4598_v21, 0  ;;  %v4601_v28 = vperm.slane %v4600_v25, 0  ;;  %v4605_v23 = vld [vmem:[#allocation119_spill] sm:$0xff]  ;;  %v4709_v26 = vrot.slane %v1904_v54, 6 }
 0x10a   : > { %v1009_v16 = vsel %vm973_vm7, %v2850_v33, %v4587_v38  ;;  %v1016_v7 = vsel %vm973_vm7, %v2876_v0, %v4588_v62  ;;  %v1023_v24 = vsel %vm973_vm7, %v2902_v32, %v4589_v48  ;;  %v4593_v33 = vld [vmem:[#allocation132_spill] sm:$0xff]  ;;  %v1004_v0 = vsel %vm712_vm1, %v4594_v34, %v1003_v44  ;;  %v4609_v34 = vld [vmem:[#allocation6_spill] sm:$0xff] }
 0x10b   : > { %v1010_v31 = vsel %vm710_vm0, %v4591_v22, %v1009_v16  ;;  %v1017_v10 = vsel %vm710_vm0, %v4592_v43, %v1016_v7  ;;  %v1024_v53 = vsel %vm710_vm0, %v4593_v33, %v1023_v24  ;;  %v1005_v18 = vsel %vm714_vm2, %v4599_v36, %v1004_v0  ;;  %v4602_v16 = vld [vmem:[#allocation9_spill] sm:$0xff]  ;;  %v4606_v22 = vld [vmem:[#allocation124_spill] sm:$0xff]  ;;  %v4608_v33 = vld [vmem:[#allocation134_spill] sm:$0xff] }
 0x10c   : > { %v1011_v9 = vsel %vm712_vm1, %v4595_v27, %v1010_v31  ;;  %v1018_v32 = vsel %vm712_vm1, %v4596_v42, %v1017_v10  ;;  %v1025_v49 = vsel %vm712_vm1, %v4597_v35, %v1024_v53  ;;  %v4603_v62 = vperm.slane %v4602_v16, 0  ;;  %v4607_v43 = vld [vmem:[#allocation129_spill] sm:$0xff]  ;;  %v4611_v27 = vld [vmem:[#allocation115_spill] sm:$0xff]  ;;  %v4613_v42 = vld [vmem:[#allocation120_spill] sm:$0xff] }
 0x10d   : > { %v1012_v38 = vsel %vm714_vm2, %v4601_v28, %v1011_v9  ;;  %v4604_v48 = vperm.slane %v1933_v2, 0  ;;  %v1006_v44 = vsel %vm716_vm3, %v4605_v23, %v1005_v18  ;;  %v3255_v0 = vsel %vm720_vm5, %v4609_v34, %v993_v60  ;;  %v4614_v35 = vld [vmem:[#allocation125_spill] sm:$0xff]  ;;  %v4617_v28 = vld [vmem:[#allocation126_spill] sm:$0xff] }
 0x10e   : > { %v1019_v7 = vsel %vm714_vm2, %v4603_v62, %v1018_v32  ;;  %v1013_v31 = vsel %vm716_vm3, %v4606_v22, %v1012_v38  ;;  %4610 = vst [vmem:[#allocation114_spill] sm:$0xff] %v3255_v0  ;;  %v3259_v9 = vsel %vm720_vm5, %v4611_v27, %v1000_v30  ;;  %v1007_v32 = vsel %vm718_vm4, %v4613_v42, %v1006_v44  ;;  %v4615_v36 = vld [vmem:[#allocation121_spill] sm:$0xff]  ;;  %v4619_v60 = vld [vmem:[#allocation130_spill] sm:$0xff]  ;;  %v4627_v27 = vld [vmem:[#allocation143_spill] sm:$0xff] }
 0x10f   : > { %v1026_v24 = vsel %vm714_vm2, %v4604_v48, %v1025_v49  ;;  %v1020_v10 = vsel %vm716_vm3, %v4607_v43, %v1019_v7  ;;  %4612 = vst [vmem:[#allocation116_spill] sm:$0xff] %v3259_v9  ;;  %v1014_v49 = vsel %vm718_vm4, %v4614_v35, %v1013_v31  ;;  %v3267_v18 = vsel %vm720_vm5, %v4615_v36, %v1007_v32  ;;  %v4620_v7 = vld [vmem:[#allocation135_spill] sm:$0xff]  ;;  %v4628_v32 = vld [vmem:[#allocation148_spill] sm:$0xff]  ;;  %v4737_v0 = vld [vmem:[#allocation30_spill] sm:$0xff] }
 0x110   : > { %v1027_v53 = vsel %vm716_vm3, %v4608_v33, %v1026_v24  ;;  %4616 = vst [vmem:[#allocation117_spill] sm:$0xff] %v3267_v18  ;;  %v3271_v38 = vsel %vm720_vm5, %v4617_v28, %v1014_v49  ;;  %v1021_v62 = vsel %vm718_vm4, %v4619_v60, %v1020_v10  ;;  %v4621_v48 = vperm.slane %v1935_v4, 0  ;;  %v4622_v24 = vld [vmem:[#allocation137_spill] sm:$0xff]  ;;  %v4630_v36 = vld [vmem:[#allocation139_spill] sm:$0xff]  ;;  %v4631_v28 = vld [vmem:[#allocation144_spill] sm:$0xff] }
 0x111   : > { %4618 = vst [vmem:[#allocation122_spill] sm:$0xff] %v3271_v38  ;;  %v1028_v30 = vsel %vm718_vm4, %v4620_v7, %v1027_v53  ;;  %v4623_v44 = vperm.slane %v1939_v6, 0  ;;  %v4624_v31 = vperm.slane %v1943_v8, 0  ;;  %v4625_v10 = vperm.slane %v1947_v11, 0  ;;  %v4626_v53 = vld [vmem:[#allocation138_spill] sm:$0xff]  ;;  %v4632_v7 = vld [vmem:[#allocation149_spill] sm:$0xff] }
 0x112   : > { %v1030_v23 = vsel %vm973_vm7, %v4622_v24, %v4621_v48  ;;  %v4633_v48 = vld [vmem:[#allocation154_spill] sm:$0xff]  ;;  %v4711_v38 = vrot.slane %v1917_v58, 6  ;;  %v4729_v18 = vperm.slane %v1915_v57, 1  ;;  %v4731_v9 = vld [vmem:[#allocation19_spill] sm:$0xff] }
 0x113   : > { %v1037_v22 = vsel %vm973_vm7, %v2954_v45, %v4623_v44  ;;  %v1044_v43 = vsel %vm973_vm7, %v2980_v39, %v4624_v31  ;;  %v1051_v33 = vsel %vm973_vm7, %v3006_v51, %v4625_v10  ;;  %v1031_v34 = vsel %vm710_vm0, %v4626_v53, %v1030_v23  ;;  %v4629_v45 = vld [vmem:[#allocation153_spill] sm:$0xff]  ;;  %v4634_v23 = vld [vmem:[#allocation10_spill] sm:$0xff]  ;;  %v4636_v31 = vld [vmem:[#allocation11_spill] sm:$0xff] }
 0x114   : > { %v1038_v42 = vsel %vm710_vm0, %v4627_v27, %v1037_v22  ;;  %v1045_v35 = vsel %vm710_vm0, %v4628_v32, %v1044_v43  ;;  %v1052_v49 = vsel %vm710_vm0, %v4629_v45, %v1051_v33  ;;  %v1032_v39 = vsel %vm712_vm1, %v4630_v36, %v1031_v34  ;;  %v4638_v33 = vld [vmem:[#allocation12_spill] sm:$0xff]  ;;  %v4642_v45 = vld [vmem:[#allocation145_spill] sm:$0xff]  ;;  %v4643_v36 = vld [vmem:[#allocation150_spill] sm:$0xff] }
 0x115   : > { %v1039_v60 = vsel %vm712_vm1, %v4631_v28, %v1038_v42  ;;  %v1046_v51 = vsel %vm712_vm1, %v4632_v7, %v1045_v35  ;;  %v1053_v24 = vsel %vm712_vm1, %v4633_v48, %v1052_v49  ;;  %v4635_v44 = vperm.slane %v4634_v23, 0  ;;  %v4641_v32 = vld [vmem:[#allocation140_spill] sm:$0xff]  ;;  %v4644_v28 = vld [vmem:[#allocation155_spill] sm:$0xff] }
 0x116   : > { %v4637_v43 = vperm.slane %v4636_v31, 0  ;;  %v4639_v53 = vperm.slane %v4638_v33, 0  ;;  %v4640_v27 = vperm.slane %v1949_v12, 0  ;;  %v4645_v7 = vld [vmem:[#allocation131_spill] sm:$0xff] }
 0x117   : > { %v1033_v22 = vsel %vm714_vm2, %v4635_v44, %v1032_v39  ;;  %v3331_v48 = vsel %vm720_vm5, %v4645_v7, %v1021_v62  ;;  %v4655_v62 = vld [vmem:[#allocation151_spill] sm:$0xff] }
 0x118   : > { %v1040_v10 = vsel %vm714_vm2, %v4637_v43, %v1039_v60  ;;  %v1047_v34 = vsel %vm714_vm2, %v4639_v53, %v1046_v51  ;;  %v1054_v42 = vsel %vm714_vm2, %v4640_v27, %v1053_v24  ;;  %v1034_v35 = vsel %vm716_vm3, %v4641_v32, %v1033_v22  ;;  %4646 = vst [vmem:[#allocation127_spill] sm:$0xff] %v3331_v48  ;;  %v4647_v51 = vld [vmem:[#allocation136_spill] sm:$0xff]  ;;  %v4649_v24 = vld [vmem:[#allocation141_spill] sm:$0xff]  ;;  %v4650_v43 = vld [vmem:[#allocation146_spill] sm:$0xff] }
 0x119   : > { %v1041_v49 = vsel %vm716_vm3, %v4642_v45, %v1040_v10  ;;  %v1048_v39 = vsel %vm716_vm3, %v4643_v36, %v1047_v34  ;;  %v1055_v60 = vsel %vm716_vm3, %v4644_v28, %v1054_v42  ;;  %v3335_v44 = vsel %vm720_vm5, %v4647_v51, %v1028_v30  ;;  %v4651_v53 = vld [vmem:[#allocation142_spill] sm:$0xff]  ;;  %v4653_v27 = vld [vmem:[#allocation147_spill] sm:$0xff]  ;;  %v4656_v45 = vld [vmem:[#allocation156_spill] sm:$0xff] }
 0x11a   : > { %4648 = vst [vmem:[#allocation132_spill] sm:$0xff] %v3335_v44  ;;  %v1035_v22 = vsel %vm718_vm4, %v4649_v24, %v1034_v35  ;;  %v1042_v10 = vsel %vm718_vm4, %v4650_v43, %v1041_v49  ;;  %v1049_v32 = vsel %vm718_vm4, %v4655_v62, %v1048_v39  ;;  %v1056_v30 = vsel %vm718_vm4, %v4656_v45, %v1055_v60  ;;  %v4658_v35 = vld [vmem:[#allocation158_spill] sm:$0xff]  ;;  %v4665_v45 = vld [vmem:[#allocation160_spill] sm:$0xff] }
 0x11b   : > { %v3343_v34 = vsel %vm720_vm5, %v4651_v53, %v1035_v22  ;;  %v3347_v42 = vsel %vm720_vm5, %v4653_v27, %v1042_v10  ;;  %v4657_v36 = vperm.slane %v1951_v13, 0  ;;  %v4659_v49 = vperm.slane %v1955_v15, 0  ;;  %v4662_v22 = vld [vmem:[#allocation159_spill] sm:$0xff]  ;;  %v4663_v10 = vld [vmem:[#allocation164_spill] sm:$0xff]  ;;  %v4664_v27 = vld [vmem:[#allocation169_spill] sm:$0xff] }
 0x11c   : > { %4652 = vst [vmem:[#allocation118_spill] sm:$0xff] %v3343_v34  ;;  %v4660_v51 = vperm.slane %v1959_v17, 0  ;;  %v4661_v39 = vperm.slane %v1963_v19, 0  ;;  %v4712_v48 = vrot.slane %v4598_v21, 6  ;;  %v4713_v44 = vrot.slane %v4600_v25, 6 }
 0x11d   : > { %4654 = vst [vmem:[#allocation123_spill] sm:$0xff] %v3347_v42  ;;  %v1058_v28 = vsel %vm973_vm7, %v4658_v35, %v4657_v36  ;;  %v1065_v7 = vsel %vm973_vm7, %v3058_v3, %v4659_v49  ;;  %v4666_v36 = vld [vmem:[#allocation165_spill] sm:$0xff]  ;;  %v4667_v49 = vld [vmem:[#allocation170_spill] sm:$0xff]  ;;  %v4714_v34 = vrot.slane %v4602_v16, 6 }
 0x11e   : > { %v1072_v24 = vsel %vm973_vm7, %v3084_v50, %v4660_v51  ;;  %v1079_v60 = vsel %vm973_vm7, %v3110_v5, %v4661_v39  ;;  %v1059_v43 = vsel %vm710_vm0, %v4662_v22, %v1058_v28  ;;  %v1066_v53 = vsel %vm710_vm0, %v4663_v10, %v1065_v7  ;;  %v4668_v51 = vld [vmem:[#allocation13_spill] sm:$0xff] }
 0x11f   : > { %v1073_v62 = vsel %vm710_vm0, %v4664_v27, %v1072_v24  ;;  %v1080_v3 = vsel %vm710_vm0, %v3114_v46, %v1079_v60  ;;  %v1060_v50 = vsel %vm712_vm1, %v4665_v45, %v1059_v43  ;;  %v1067_v35 = vsel %vm712_vm1, %v4666_v36, %v1066_v53  ;;  %v4670_v24 = vld [vmem:[#allocation14_spill] sm:$0xff]  ;;  %v4672_v60 = vld [vmem:[#allocation15_spill] sm:$0xff] }
 0x120   : > { %v1074_v5 = vsel %vm712_vm1, %v4667_v49, %v1073_v62  ;;  %v1081_v28 = vsel %vm712_vm1, %v3118_v47, %v1080_v3  ;;  %v4669_v7 = vperm.slane %v4668_v51, 0  ;;  %v4671_v22 = vperm.slane %v4670_v24, 0  ;;  %v4675_v62 = vld [vmem:[#allocation161_spill] sm:$0xff]  ;;  %v4676_v47 = vld [vmem:[#allocation166_spill] sm:$0xff]  ;;  %v4677_v36 = vld [vmem:[#allocation171_spill] sm:$0xff] }
 0x121   : > { %v4673_v10 = vperm.slane %v4672_v60, 0  ;;  %v4674_v53 = vperm.slane %v1965_v20, 0  ;;  %v4678_v49 = vld [vmem:[#allocation162_spill] sm:$0xff] }
 0x122   : > { %v1061_v39 = vsel %vm714_vm2, %v4669_v7, %v1060_v50  ;;  %v1068_v46 = vsel %vm714_vm2, %v4671_v22, %v1067_v35 }
 0x123   : > { %v1075_v43 = vsel %vm714_vm2, %v4673_v10, %v1074_v5  ;;  %v1082_v27 = vsel %vm714_vm2, %v4674_v53, %v1081_v28  ;;  %v1062_v45 = vsel %vm716_vm3, %v4675_v62, %v1061_v39  ;;  %v1069_v3 = vsel %vm716_vm3, %v4676_v47, %v1068_v46  ;;  %v4679_v5 = vld [vmem:[#allocation167_spill] sm:$0xff]  ;;  %v4680_v10 = vld [vmem:[#allocation172_spill] sm:$0xff] }
 0x124   : > { %v1076_v50 = vsel %vm716_vm3, %v4677_v36, %v1075_v43  ;;  %v1083_v35 = vsel %vm716_vm3, %v3123_v41, %v1082_v27  ;;  %v1063_v7 = vsel %vm718_vm4, %v4678_v49, %v1062_v45  ;;  %v1070_v22 = vsel %vm718_vm4, %v4679_v5, %v1069_v3  ;;  %v4681_v53 = vld [vmem:[#allocation152_spill] sm:$0xff]  ;;  %v4683_v43 = vld [vmem:[#allocation157_spill] sm:$0xff]  ;;  %v4685_v41 = vld [vmem:[#allocation163_spill] sm:$0xff] }
 0x125   : > { %v1077_v28 = vsel %vm718_vm4, %v4680_v10, %v1076_v50  ;;  %v1084_v39 = vsel %vm718_vm4, %v3179_v14, %v1083_v35  ;;  %v3415_v46 = vsel %vm720_vm5, %v4681_v53, %v1049_v32  ;;  %v3419_v62 = vsel %vm720_vm5, %v4683_v43, %v1056_v30  ;;  %v4687_v45 = vld [vmem:[#allocation168_spill] sm:$0xff]  ;;  %v4689_v3 = vld [vmem:[#allocation173_spill] sm:$0xff]  ;;  %v4693_v50 = vld [vmem:[#allocation99_spill] sm:$0xff] }
 0x126   : > { %4682 = vst [vmem:[#allocation128_spill] sm:$0xff] %v3415_v46  ;;  %v3423_v27 = vsel %vm720_vm5, %v4685_v41, %v1063_v7  ;;  %v3427_v47 = vsel %vm720_vm5, %v4687_v45, %v1070_v22  ;;  %v3431_v36 = vsel %vm720_vm5, %v4689_v3, %v1077_v28  ;;  %v3435_v14 = vsel %vm720_vm5, %v3183_v40, %v1084_v39  ;;  %v4694_v49 = vld [vmem:[#allocation100_spill] sm:$0xff]  ;;  %v4722_v22 = vld [vmem:[#allocation5_spill] sm:$0xff]  ;;  %v4726_v41 = vld [vmem:[#allocation23_spill] sm:$0xff] }
 0x127   : > { %4684 = vst [vmem:[#allocation133_spill] sm:$0xff] %v3419_v62  ;;  %v4708_v35 = vrot.slane %v1900_v52, 6  ;;  %v1119_v46 = vperm.slane %v4709_v26, 1  ;;  %v4710_v32 = vrot.slane %v1908_v56, 6  ;;  %v4715_v26 = vrot.slane %v1933_v2, 6  ;;  %v4728_v53 = vld [vmem:[#allocation28_spill] sm:$0xff] }
 0x128   : > { %4686 = vst [vmem:[#allocation7_spill] sm:$0xff] %v3423_v27  ;;  %v1121_v27 = vperm.slane %v4711_v38, 1  ;;  %v4717_v38 = vrot.slane %v4636_v31, 6  ;;  %v4718_v45 = vrot.slane %v4638_v33, 6  ;;  %v4719_v39 = vrot.slane %v1949_v12, 6  ;;  %v4730_v10 = vld [vmem:[#allocation33_spill] sm:$0xff] }
 0x129   : > { %4688 = vst [vmem:[#allocation8_spill] sm:$0xff] %v3427_v47  ;;  %v1118_v42 = vperm.slane %v4708_v35, 1  ;;  %v1120_v62 = vperm.slane %v4710_v32, 1  ;;  %v3479_v47 = vperm.slane %v4712_v48, 1  ;;  %v3487_v35 = vperm.slane %v4714_v34, 1  ;;  %v4732_v5 = vld [vmem:[#allocation24_spill] sm:$0xff] }
 0x12a   : > { %4690 = vst [vmem:[#allocation9_spill] sm:$0xff] %v3431_v36  ;;  %v3483_v36 = vperm.slane %v4713_v44, 1  ;;  %v4716_v32 = vrot.slane %v4634_v23, 6  ;;  %v3499_v48 = vperm.slane %v4717_v38, 1  ;;  %v3503_v44 = vperm.slane %v4718_v45, 1  ;;  %v4724_v38 = vld [vmem:[#allocation18_spill] sm:$0xff] }
 0x12b   : > { %4691 = vst [vmem:[#allocation119_spill] sm:$0xff] %v3435_v14  ;;  %v3491_v14 = vperm.slane %v4715_v26, 1  ;;  %v3507_v34 = vperm.slane %v4719_v39, 1  ;;  %v4720_v43 = vrot.slane %v4668_v51, 6  ;;  %v4721_v28 = vrot.slane %v4670_v24, 6 }
 0x12c   : > { %v3495_v30 = vperm.slane %v4716_v32, 1  ;;  %v4723_v7 = vperm.slane %v4722_v22, 1  ;;  %v4725_v45 = vperm.slane %v4423_v29, 1  ;;  %v4727_v39 = vperm.slane %v1906_v55, 1  ;;  %v4733_v29 = vld [vmem:[#allocation29_spill] sm:$0xff] }
 0x12d   : > { %v3511_v26 = vperm.slane %v4720_v43, 1  ;;  %v3515_v32 = vperm.slane %v4721_v28, 1  ;;  %v1155_v28 = vsel %vm973_vm7, %v4730_v10, %v4729_v18  ;;  %v4738_v10 = vld [vmem:[#allocation35_spill] sm:$0xff] }
 0x12e   : > { %v1134_v3 = vsel %vm973_vm7, %v4724_v38, %v4723_v7  ;;  %v1141_v40 = vsel %vm973_vm7, %v4726_v41, %v4725_v45  ;;  %v1148_v43 = vsel %vm973_vm7, %v4728_v53, %v4727_v39  ;;  %v4734_v41 = vld [vmem:[#allocation34_spill] sm:$0xff]  ;;  %v4735_v45 = vld [vmem:[#allocation20_spill] sm:$0xff]  ;;  %v4736_v39 = vld [vmem:[#allocation25_spill] sm:$0xff] }
 0x12f   : > { %v1135_v22 = vsel %vm710_vm0, %v4731_v9, %v1134_v3  ;;  %v1142_v7 = vsel %vm710_vm0, %v4732_v5, %v1141_v40  ;;  %v1149_v38 = vsel %vm710_vm0, %v4733_v29, %v1148_v43  ;;  %v1156_v55 = vsel %vm710_vm0, %v4734_v41, %v1155_v28  ;;  %v4744_v41 = vld [vmem:[#allocation26_spill] sm:$0xff] }
 0x130   : > { %v1136_v53 = vsel %vm712_vm1, %v4735_v45, %v1135_v22  ;;  %v1143_v57 = vsel %vm712_vm1, %v4736_v39, %v1142_v7  ;;  %v1150_v18 = vsel %vm712_vm1, %v4737_v0, %v1149_v38  ;;  %v1157_v9 = vsel %vm712_vm1, %v4738_v10, %v1156_v55  ;;  %v4743_v0 = vld [vmem:[#allocation21_spill] sm:$0xff]  ;;  %v4745_v55 = vld [vmem:[#allocation31_spill] sm:$0xff] }
 0x131   : > { %v4739_v5 = vperm.slane %v1900_v52, 1  ;;  %v4740_v3 = vperm.slane %v1904_v54, 1  ;;  %v4741_v28 = vperm.slane %v1908_v56, 1  ;;  %v4742_v7 = vperm.slane %v1917_v58, 1  ;;  %v4746_v54 = vld [vmem:[#allocation36_spill] sm:$0xff] }
 0x132   : > { %v4747_v56 = vrot.slane %v4672_v60, 6  ;;  %v4748_v58 = vrot.slane %v1965_v20, 6 }
 0x133   : > { %v1137_v40 = vsel %vm714_vm2, %v4739_v5, %v1136_v53  ;;  %v1144_v43 = vsel %vm714_vm2, %v4740_v3, %v1143_v57  ;;  %v1151_v22 = vsel %vm714_vm2, %v4741_v28, %v1150_v18  ;;  %v1158_v29 = vsel %vm714_vm2, %v4742_v7, %v1157_v9  ;;  %v4749_v18 = vld [vmem:[#allocation22_spill] sm:$0xff]  ;;  %v4750_v9 = vld [vmem:[#allocation27_spill] sm:$0xff] }
 0x134   : > { %v1138_v38 = vsel %vm716_vm3, %v4743_v0, %v1137_v40  ;;  %v1145_v52 = vsel %vm716_vm3, %v4744_v41, %v1144_v43  ;;  %v1152_v45 = vsel %vm716_vm3, %v4745_v55, %v1151_v22  ;;  %v1159_v53 = vsel %vm716_vm3, %v4746_v54, %v1158_v29  ;;  %v4751_v43 = vld [vmem:[#allocation32_spill] sm:$0xff]  ;;  %v4752_v22 = vld [vmem:[#allocation37_spill] sm:$0xff]  ;;  %v4754_v0 = vld [vmem:[#allocation38_spill] sm:$0xff] }
 0x135   : > { %v3571_v39 = vperm.slane %v4747_v56, 1  ;;  %v3575_v57 = vperm.slane %v4748_v58, 1  ;;  %v1139_v10 = vsel %vm718_vm4, %v4749_v18, %v1138_v38  ;;  %v1146_v5 = vsel %vm718_vm4, %v4750_v9, %v1145_v52  ;;  %v4756_v52 = vld [vmem:[#allocation43_spill] sm:$0xff]  ;;  %v4760_v56 = vld [vmem:[#allocation53_spill] sm:$0xff]  ;;  %v4762_v18 = vld [vmem:[#allocation44_spill] sm:$0xff] }
 0x136   : > { %v3582_v40 = vsel %vm720_vm5, %v1118_v42, %v1139_v10  ;;  %v3585_v3 = vsel %vm720_vm5, %v1119_v46, %v1146_v5  ;;  %v1153_v28 = vsel %vm718_vm4, %v4751_v43, %v1152_v45  ;;  %v1160_v7 = vsel %vm718_vm4, %v4752_v22, %v1159_v53  ;;  %v4758_v46 = vld [vmem:[#allocation48_spill] sm:$0xff]  ;;  %v4761_v58 = vld [vmem:[#allocation39_spill] sm:$0xff]  ;;  %v4764_v5 = vld [vmem:[#allocation54_spill] sm:$0xff] }
 0x137   : > { %v4753_v29 = vperm.slane %v1919_v59, 1  ;;  %v4755_v41 = vperm.slane %v1923_v61, 1  ;;  %v4757_v55 = vperm.slane %v1927_v63, 1  ;;  %v4759_v45 = vperm.slane %v1931_v1, 1  ;;  %v4763_v61 = vld [vmem:[#allocation49_spill] sm:$0xff]  ;;  %v4765_v43 = vld [vmem:[#allocation40_spill] sm:$0xff] }
 0x139   : > { %v1162_v38 = vsel %vm973_vm7, %v4754_v0, %v4753_v29  ;;  %v1169_v42 = vsel %vm973_vm7, %v4756_v52, %v4755_v41  ;;  %v1176_v54 = vsel %vm973_vm7, %v4758_v46, %v4757_v55  ;;  %v1183_v53 = vsel %vm973_vm7, %v4760_v56, %v4759_v45  ;;  %v4766_v29 = vld [vmem:[#allocation45_spill] sm:$0xff]  ;;  %v4767_v0 = vld [vmem:[#allocation50_spill] sm:$0xff]  ;;  %v4768_v52 = vld [vmem:[#allocation55_spill] sm:$0xff] }
 0x13a   : > { %v1163_v59 = vsel %vm710_vm0, %v4761_v58, %v1162_v38  ;;  %v1170_v10 = vsel %vm710_vm0, %v4762_v18, %v1169_v42  ;;  %v1177_v9 = vsel %vm710_vm0, %v4763_v61, %v1176_v54  ;;  %v1184_v63 = vsel %vm710_vm0, %v4764_v5, %v1183_v53  ;;  %v4775_v61 = vld [vmem:[#allocation51_spill] sm:$0xff] }
 0x13b   : > { %v1164_v22 = vsel %vm712_vm1, %v4765_v43, %v1163_v59  ;;  %v1171_v1 = vsel %vm712_vm1, %v4766_v29, %v1170_v10  ;;  %v1178_v41 = vsel %vm712_vm1, %v4767_v0, %v1177_v9  ;;  %v1185_v38 = vsel %vm712_vm1, %v4768_v52, %v1184_v63  ;;  %v4773_v59 = vld [vmem:[#allocation41_spill] sm:$0xff]  ;;  %v4774_v10 = vld [vmem:[#allocation46_spill] sm:$0xff] }
 0x13c   : > { %v4769_v42 = vperm.slane %v4598_v21, 1  ;;  %v4770_v46 = vperm.slane %v4600_v25, 1  ;;  %v4771_v45 = vperm.slane %v4602_v16, 1  ;;  %v4772_v53 = vperm.slane %v1933_v2, 1  ;;  %v4776_v25 = vld [vmem:[#allocation56_spill] sm:$0xff]  ;;  %v4777_v2 = vld [vmem:[#allocation42_spill] sm:$0xff] }
 0x13d   : > { %v3644_v16 = vsel %vm720_vm5, %v1120_v62, %v1153_v28  ;;  %v3647_v63 = vsel %vm720_vm5, %v1121_v27, %v1160_v7  ;;  %v4780_v28 = vld [vmem:[#allocation57_spill] sm:$0xff]  ;;  %v4781_v7 = vperm.slane %v1935_v4, 1  ;;  %v4782_v52 = vld [vmem:[#allocation58_spill] sm:$0xff] }
 0x13e   : > { %v1165_v55 = vsel %vm714_vm2, %v4769_v42, %v1164_v22  ;;  %v1172_v54 = vsel %vm714_vm2, %v4770_v46, %v1171_v1  ;;  %v1179_v56 = vsel %vm714_vm2, %v4771_v45, %v1178_v41  ;;  %v1186_v58 = vsel %vm714_vm2, %v4772_v53, %v1185_v38  ;;  %v4778_v22 = vld [vmem:[#allocation47_spill] sm:$0xff]  ;;  %v4779_v41 = vld [vmem:[#allocation52_spill] sm:$0xff] }
 0x13f   : > { %v1166_v18 = vsel %vm716_vm3, %v4773_v59, %v1165_v55  ;;  %v1173_v21 = vsel %vm716_vm3, %v4774_v10, %v1172_v54  ;;  %v1180_v9 = vsel %vm716_vm3, %v4775_v61, %v1179_v56  ;;  %v1187_v5 = vsel %vm716_vm3, %v4776_v25, %v1186_v58  ;;  %v4784_v55 = vld [vmem:[#allocation63_spill] sm:$0xff]  ;;  %v4788_v56 = vld [vmem:[#allocation73_spill] sm:$0xff]  ;;  %v4790_v59 = vld [vmem:[#allocation64_spill] sm:$0xff] }
 0x140   : > { %v1167_v43 = vsel %vm718_vm4, %v4777_v2, %v1166_v18  ;;  %v1174_v29 = vsel %vm718_vm4, %v4778_v22, %v1173_v21  ;;  %v1181_v62 = vsel %vm718_vm4, %v4779_v41, %v1180_v9  ;;  %v1188_v27 = vsel %vm718_vm4, %v4780_v28, %v1187_v5  ;;  %v4789_v58 = vld [vmem:[#allocation59_spill] sm:$0xff]  ;;  %v4792_v21 = vld [vmem:[#allocation74_spill] sm:$0xff]  ;;  %v4793_v61 = vld [vmem:[#allocation60_spill] sm:$0xff] }
 0x141   : > { %v3655_v1 = vsel %vm720_vm5, %v3479_v47, %v1167_v43  ;;  %v3659_v0 = vsel %vm720_vm5, %v3483_v36, %v1174_v29  ;;  %v1190_v38 = vsel %vm973_vm7, %v4782_v52, %v4781_v7  ;;  %v4783_v42 = vperm.slane %v1939_v6, 1  ;;  %v4786_v36 = vld [vmem:[#allocation68_spill] sm:$0xff]  ;;  %v4791_v6 = vld [vmem:[#allocation69_spill] sm:$0xff]  ;;  %v4795_v5 = vld [vmem:[#allocation70_spill] sm:$0xff] }
 0x142   : > { %v4785_v46 = vperm.slane %v1943_v8, 1  ;;  %v4787_v45 = vperm.slane %v1947_v11, 1  ;;  %v1191_v4 = vsel %vm710_vm0, %v4789_v58, %v1190_v38  ;;  %v4794_v25 = vld [vmem:[#allocation65_spill] sm:$0xff]  ;;  %v4796_v43 = vld [vmem:[#allocation75_spill] sm:$0xff]  ;;  %v4797_v29 = vperm.slane %v4634_v23, 1 }
 0x143   : > { %v1197_v47 = vsel %vm973_vm7, %v4784_v55, %v4783_v42  ;;  %v1192_v9 = vsel %vm712_vm1, %v4793_v61, %v1191_v4  ;;  %v4798_v28 = vperm.slane %v4636_v31, 1  ;;  %v4799_v52 = vperm.slane %v4638_v33, 1  ;;  %v4804_v31 = vld [vmem:[#allocation76_spill] sm:$0xff]  ;;  %v4806_v4 = vld [vmem:[#allocation67_spill] sm:$0xff] }
 0x144   : > { %v1204_v54 = vsel %vm973_vm7, %v4786_v36, %v4785_v46  ;;  %v1211_v53 = vsel %vm973_vm7, %v4788_v56, %v4787_v45  ;;  %v1198_v18 = vsel %vm710_vm0, %v4790_v59, %v1197_v47  ;;  %v1193_v41 = vsel %vm714_vm2, %v4797_v29, %v1192_v9  ;;  %v4801_v47 = vld [vmem:[#allocation61_spill] sm:$0xff]  ;;  %v4802_v36 = vld [vmem:[#allocation66_spill] sm:$0xff]  ;;  %v4812_v9 = vld [vmem:[#allocation83_spill] sm:$0xff] }
 0x145   : > { %v1205_v10 = vsel %vm710_vm0, %v4791_v6, %v1204_v54  ;;  %v1212_v8 = vsel %vm710_vm0, %v4792_v21, %v1211_v53  ;;  %v1199_v11 = vsel %vm712_vm1, %v4794_v25, %v1198_v18  ;;  %v4800_v42 = vperm.slane %v1949_v12, 1  ;;  %v4803_v54 = vld [vmem:[#allocation71_spill] sm:$0xff]  ;;  %v4805_v53 = vld [vmem:[#allocation62_spill] sm:$0xff]  ;;  %v4818_v29 = vld [vmem:[#allocation84_spill] sm:$0xff] }
 0x146   : > { %v1206_v2 = vsel %vm712_vm1, %v4795_v5, %v1205_v10  ;;  %v1213_v22 = vsel %vm712_vm1, %v4796_v43, %v1212_v8  ;;  %v1200_v7 = vsel %vm714_vm2, %v4798_v28, %v1199_v11  ;;  %v1194_v46 = vsel %vm716_vm3, %v4801_v47, %v1193_v41  ;;  %v4807_v10 = vld [vmem:[#allocation72_spill] sm:$0xff]  ;;  %v4808_v8 = vld [vmem:[#allocation77_spill] sm:$0xff] }
 0x147   : > { %v1207_v38 = vsel %vm714_vm2, %v4799_v52, %v1206_v2  ;;  %v1214_v55 = vsel %vm714_vm2, %v4800_v42, %v1213_v22  ;;  %v1201_v23 = vsel %vm716_vm3, %v4802_v36, %v1200_v7  ;;  %v1182_v33 = vsel %vm720_vm5, %v3487_v35, %v1181_v62  ;;  %v4810_v62 = vld [vmem:[#allocation78_spill] sm:$0xff]  ;;  %v4814_v11 = vld [vmem:[#allocation88_spill] sm:$0xff]  ;;  %v4816_v2 = vld [vmem:[#allocation93_spill] sm:$0xff] }
 0x148   : > { %v1208_v45 = vsel %vm716_vm3, %v4803_v54, %v1207_v38  ;;  %v1215_v56 = vsel %vm716_vm3, %v4804_v31, %v1214_v55  ;;  %v1189_v12 = vsel %vm720_vm5, %v3491_v14, %v1188_v27  ;;  %v1195_v58 = vsel %vm718_vm4, %v4805_v53, %v1194_v46  ;;  %v4817_v22 = vld [vmem:[#allocation79_spill] sm:$0xff]  ;;  %v4820_v7 = vld [vmem:[#allocation94_spill] sm:$0xff]  ;;  %v4821_v52 = vld [vmem:[#allocation80_spill] sm:$0xff] }
 0x149   : > { %v1202_v59 = vsel %vm718_vm4, %v4806_v4, %v1201_v23  ;;  %v1196_v18 = vsel %vm720_vm5, %v3495_v30, %v1195_v58  ;;  %v1209_v21 = vsel %vm718_vm4, %v4807_v10, %v1208_v45  ;;  %v1216_v35 = vsel %vm718_vm4, %v4808_v8, %v1215_v56  ;;  %v4822_v42 = vld [vmem:[#allocation85_spill] sm:$0xff]  ;;  %v4823_v55 = vld [vmem:[#allocation90_spill] sm:$0xff]  ;;  %v4824_v46 = vld [vmem:[#allocation95_spill] sm:$0xff] }
 0x14a   : > { %v1203_v6 = vsel %vm720_vm5, %v3499_v48, %v1202_v59  ;;  %v4809_v14 = vperm.slane %v1951_v13, 1  ;;  %v4811_v61 = vperm.slane %v1955_v15, 1  ;;  %v4813_v30 = vperm.slane %v1959_v17, 1  ;;  %v4819_v15 = vld [vmem:[#allocation89_spill] sm:$0xff]  ;;  %v4830_v8 = vld [vmem:[#allocation86_spill] sm:$0xff] }
 0x14b   : > { %v4815_v5 = vperm.slane %v1963_v19, 1  ;;  %v4825_v23 = vperm.slane %v4668_v51, 1  ;;  %v4826_v45 = vperm.slane %v4670_v24, 1  ;;  %v4827_v56 = vperm.slane %v4672_v60, 1  ;;  %v4829_v59 = vld [vmem:[#allocation81_spill] sm:$0xff]  ;;  %v4832_v24 = vld [vmem:[#allocation96_spill] sm:$0xff] }
 0x14c   : > { %v1218_v27 = vsel %vm973_vm7, %v4810_v62, %v4809_v14  ;;  %v1225_v25 = vsel %vm973_vm7, %v4812_v9, %v4811_v61  ;;  %v1232_v48 = vsel %vm973_vm7, %v4814_v11, %v4813_v30  ;;  %v4828_v58 = vperm.slane %v1965_v20, 1  ;;  %v4831_v14 = vld [vmem:[#allocation91_spill] sm:$0xff]  ;;  %v4833_v61 = vld [vmem:[#allocation82_spill] sm:$0xff]  ;;  %v4836_v11 = vld [vmem:[#allocation97_spill] sm:$0xff] }
 0x14d   : > { %v1239_v43 = vsel %vm973_vm7, %v4816_v2, %v4815_v5  ;;  %v1219_v13 = vsel %vm710_vm0, %v4817_v22, %v1218_v27  ;;  %v1226_v41 = vsel %vm710_vm0, %v4818_v29, %v1225_v25  ;;  %v1233_v28 = vsel %vm710_vm0, %v4819_v15, %v1232_v48  ;;  %v4834_v9 = vld [vmem:[#allocation87_spill] sm:$0xff]  ;;  %v4835_v25 = vld [vmem:[#allocation92_spill] sm:$0xff] }
 0x14e   : > { %v1240_v17 = vsel %vm710_vm0, %v4820_v7, %v1239_v43  ;;  %v1220_v38 = vsel %vm712_vm1, %v4821_v52, %v1219_v13  ;;  %v1227_v19 = vsel %vm712_vm1, %v4822_v42, %v1226_v41  ;;  %v1234_v47 = vsel %vm712_vm1, %v4823_v55, %v1233_v28  ;;  %v4841_v41 = vld [vmem:[#allocation116_spill] sm:$0xff]  ;;  %v4844_v28 = vld [vmem:[#allocation117_spill] sm:$0xff] }
 0x14f   : > { %v1241_v36 = vsel %vm712_vm1, %v4824_v46, %v1240_v17  ;;  %v1221_v54 = vsel %vm714_vm2, %v4825_v23, %v1220_v38  ;;  %v1228_v31 = vsel %vm714_vm2, %v4826_v45, %v1227_v19  ;;  %v1235_v53 = vsel %vm714_vm2, %v4827_v56, %v1234_v47  ;;  %v4852_v19 = vld [vmem:[#allocation105_spill] sm:$0xff]  ;;  %v4855_v46 = vld [vmem:[#allocation106_spill] sm:$0xff]  ;;  %v4859_v45 = vld [vmem:[#allocation123_spill] sm:$0xff] }
 0x150   : > { %v1242_v4 = vsel %vm714_vm2, %v4828_v58, %v1241_v36  ;;  %v1222_v10 = vsel %vm716_vm3, %v4829_v59, %v1221_v54  ;;  %v1229_v51 = vsel %vm716_vm3, %v4830_v8, %v1228_v31  ;;  %v1236_v62 = vsel %vm716_vm3, %v4831_v14, %v1235_v53  ;;  %v4856_v36 = vld [vmem:[#allocation118_spill] sm:$0xff]  ;;  %v4858_v54 = vld [vmem:[#allocation107_spill] sm:$0xff]  ;;  %v4861_v56 = vld [vmem:[#allocation108_spill] sm:$0xff] }
 0x151   : > { %v1243_v27 = vsel %vm716_vm3, %v4832_v24, %v1242_v4  ;;  %v1223_v60 = vsel %vm718_vm4, %v4833_v61, %v1222_v10  ;;  %v1230_v20 = vsel %vm718_vm4, %v4834_v9, %v1229_v51  ;;  %v1237_v30 = vsel %vm718_vm4, %v4835_v25, %v1236_v62  ;;  %v4862_v53 = vld [vmem:[#allocation128_spill] sm:$0xff]  ;;  %v4864_v4 = vld [vmem:[#allocation109_spill] sm:$0xff]  ;;  %v4867_v8 = vld [vmem:[#allocation110_spill] sm:$0xff] }
 0x152   : > { %v1244_v48 = vsel %vm718_vm4, %v4836_v11, %v1243_v27  ;;  %v1210_v5 = vsel %vm720_vm5, %v3503_v44, %v1209_v21  ;;  %v1217_v2 = vsel %vm720_vm5, %v3507_v34, %v1216_v35  ;;  %v1224_v43 = vsel %vm720_vm5, %v3511_v26, %v1223_v60  ;;  %v4838_v34 = vld [vmem:[#allocation114_spill] sm:$0xff]  ;;  %v4865_v59 = vld [vmem:[#allocation133_spill] sm:$0xff]  ;;  %v4868_v51 = vld [vmem:[#allocation7_spill] sm:$0xff] }
 0x153   : > { %v1231_v22 = vsel %vm720_vm5, %v3515_v32, %v1230_v20  ;;  %v1238_v13 = vsel %vm720_vm5, %v3571_v39, %v1237_v30  ;;  %v3805_v29 = vsel %vm720_vm5, %v3575_v57, %v1244_v48  ;;  %v4837_v44 = vmax.f32 %v4693_v50, %v3195_v37  ;;  %v4840_v32 = vld [vmem:[#allocation101_spill] sm:$0xff]  ;;  %v4843_v57 = vld [vmem:[#allocation102_spill] sm:$0xff]  ;;  %v4846_v37 = vld [vmem:[#allocation103_spill] sm:$0xff] }
 0x154   : > { %v4839_v26 = vmax.f32 %v4694_v49, %v4838_v34  ;;  %v4842_v39 = vmax.f32 %v4840_v32, %v4841_v41  ;;  %v4845_v7 = vmax.f32 %v4843_v57, %v4844_v28  ;;  %v4847_v50 = vld [vmem:[#allocation122_spill] sm:$0xff]  ;;  %v4849_v49 = vld [vmem:[#allocation104_spill] sm:$0xff]  ;;  %v4860_v31 = vmax.f32 %v4858_v54, %v4859_v45  ;;  %v4870_v62 = vld [vmem:[#allocation111_spill] sm:$0xff] }
 0x155   : > { %v3811_v21 = vmax.f32 %v4837_v44, %v3585_v3  ;;  %v4848_v3 = vmax.f32 %v4846_v37, %v4847_v50  ;;  %v4863_v58 = vmax.f32 %v4861_v56, %v4862_v53  ;;  %v4866_v10 = vmax.f32 %v4864_v4, %v4865_v59  ;;  %v4871_v24 = vld [vmem:[#allocation8_spill] sm:$0xff]  ;;  %v4874_v60 = vld [vmem:[#allocation9_spill] sm:$0xff] }
 0x156   : > { %v3817_v35 = vmax.f32 %v4839_v26, %v3644_v16  ;;  %v3823_v15 = vmax.f32 %v4842_v39, %v3647_v63  ;;  %v3829_v17 = vmax.f32 %v4845_v7, %v3655_v1  ;;  %v4850_v16 = vld [vmem:[#allocation127_spill] sm:$0xff]  ;;  %v4853_v63 = vld [vmem:[#allocation132_spill] sm:$0xff]  ;;  %v4857_v1 = vmax.f32 %v4855_v46, %v4856_v36 }
 0x157   : > { %v3835_v52 = vmax.f32 %v4848_v3, %v3659_v0  ;;  %v4851_v38 = vmax.f32 %v4849_v49, %v4850_v16  ;;  %v4854_v55 = vmax.f32 %v4852_v19, %v4853_v63  ;;  %v3855_v0 = vmax.f32 %v4860_v31, %v1203_v6  ;;  %v4873_v61 = vld [vmem:[#allocation112_spill] sm:$0xff] }
 0x158   : > { %v3850_v23 = vmax.f32 %v4857_v1, %v1196_v18  ;;  %v4869_v14 = vmax.f32 %v4867_v8, %v4868_v51  ;;  %v4872_v27 = vmax.f32 %v4870_v62, %v4871_v24  ;;  %v4875_v9 = vmax.f32 %v4873_v61, %v4874_v60  ;;  %v4876_v25 = vld [vmem:[#allocation16_spill] sm:$0xff] }
 0x159   : > { %v3840_v42 = vmax.f32 %v4851_v38, %v1182_v33  ;;  %v3845_v47 = vmax.f32 %v4854_v55, %v1189_v12  ;;  %v3860_v33 = vmax.f32 %v4863_v58, %v1210_v5  ;;  %v3865_v12 = vmax.f32 %v4866_v10, %v1217_v2  ;;  %v4877_v5 = vld [vmem:[#allocation17_spill] sm:$0xff] }
 0x15a   : > { %v3870_v18 = vmax.f32 %v4869_v14, %v1224_v43  ;;  %v3875_v6 = vmax.f32 %v4872_v27, %v1231_v22  ;;  %v3880_v20 = vmax.f32 %v4875_v9, %v1238_v13  ;;  %v1280_v30 = vrot.slane %v4876_v25, 2  ;;  %v4878_v9 = vld [vmem:[#allocation98_spill] sm:$0xff] }
 0x15b   : > { %v1281_v11 = vrot.slane %v4876_v25, 4  ;;  %v1282_v48 = vrot.slane %v4876_v25, 6  ;;  %v1283_v2 = vrot.slane %v4877_v5, 2  ;;  %v1284_v43 = vrot.slane %v4877_v5, 4 }
 0x15c   : > { %v1285_v44 = vrot.slane %v4877_v5, 6  ;;  %v1286_v22 = vperm.slane %v4876_v25, 1  ;;  %v1290_v34 = vperm.slane %v4877_v5, 1  ;;  %v1287_v26 = vperm.slane %v1280_v30, 1 }
 0x15d   : > { %v1288_v13 = vperm.slane %v1281_v11, 1  ;;  %v1289_v32 = vperm.slane %v1282_v48, 1  ;;  %v1291_v41 = vperm.slane %v1283_v2, 1  ;;  %v1292_v39 = vperm.slane %v1284_v43, 1 }
 0x15e   : > { %v1301_v57 = vperm.slane %v4876_v25, 0  ;;  %v1302_v28 = vperm.slane %v1280_v30, 0  ;;  %v1303_v7 = vperm.slane %v1281_v11, 0  ;;  %v1293_v37 = vsel %vm710_vm0, %v1287_v26, %v1286_v22 }
 0x15f   : > { %v1304_v50 = vperm.slane %v1282_v48, 0  ;;  %v1305_v3 = vperm.slane %v4877_v5, 0  ;;  %v1306_v49 = vperm.slane %v1283_v2, 0  ;;  %v1294_v16 = vsel %vm712_vm1, %v1288_v13, %v1293_v37  ;;  %v4882_v2 = vld [vmem:[#allocation119_spill] sm:$0xff] }
 0x160   : > { %v1307_v38 = vperm.slane %v1284_v43, 0  ;;  %v1308_v19 = vperm.slane %v1285_v44, 0  ;;  %v1309_v63 = vsel %vm973_vm7, %v1302_v28, %v1301_v57  ;;  %v1295_v55 = vsel %vm714_vm2, %v1289_v32, %v1294_v16 }
 0x161   : > { %v1310_v46 = vsel %vm710_vm0, %v1303_v7, %v1309_v63  ;;  %v1318_v36 = vperm.slane %v1285_v44, 1  ;;  %v1319_v1 = vsel %vm973_vm7, %v1287_v26, %v1286_v22  ;;  %v1296_v54 = vsel %vm716_vm3, %v1290_v34, %v1295_v55 }
 0x162   : > { %v1311_v45 = vsel %vm712_vm1, %v1304_v50, %v1310_v46  ;;  %v1320_v31 = vsel %vm710_vm0, %v1288_v13, %v1319_v1  ;;  %v1329_v56 = vmax.f32 %v3811_v21, %v3817_v35  ;;  %v1297_v53 = vsel %vm718_vm4, %v1291_v41, %v1296_v54 }
 0x163   : > { %v1312_v58 = vsel %vm714_vm2, %v1305_v3, %v1311_v45  ;;  %v1321_v4 = vsel %vm712_vm1, %v1289_v32, %v1320_v31  ;;  %v1330_v59 = vmax.f32 %v3823_v15, %v3829_v17  ;;  %v1298_v10 = vsel %vm720_vm5, %v1292_v39, %v1297_v53 }
 0x164   : > { %v1313_v8 = vsel %vm716_vm3, %v1306_v49, %v1312_v58  ;;  %v1322_v51 = vsel %vm714_vm2, %v1290_v34, %v1321_v4  ;;  %v1331_v35 = vmax.f32 %v3835_v52, %v3840_v42  ;;  %v1300_v14 = vsel %vm828_vm6, 0.0, %v1298_v10  ;;  %v4879_v42 = vld [vmem:[#allocation174_spill] sm:$0xff] }
 0x165   : > { %v1314_v62 = vsel %vm718_vm4, %v1307_v38, %v1313_v8  ;;  %v1323_v24 = vsel %vm716_vm3, %v1291_v41, %v1322_v51  ;;  %v1332_v17 = vmax.f32 %v3845_v47, %v3850_v23  ;;  %v1333_v60 = vmax.f32 %v3855_v0, %v3860_v33  ;;  %v4881_v23 = vld [vmem:[#allocation113_spill] sm:$0xff] }
 0x166   : > { %v1315_v27 = vsel %vm720_vm5, %v1308_v19, %v1314_v62  ;;  %v1324_v61 = vsel %vm718_vm4, %v1292_v39, %v1323_v24  ;;  %v4880_v25 = vmax.f32 %v4878_v9, %v4879_v42  ;;  %v1337_v5 = vmax.f32 %v1329_v56, %v3823_v15 }
 0x167   : > { %v1317_v11 = vmax.f32 %v1300_v14, %v1315_v27  ;;  %v1325_v48 = vsel %vm720_vm5, %v1318_v36, %v1324_v61  ;;  %v4883_v43 = vmax.f32 %v4881_v23, %v4882_v2  ;;  %v1334_v22 = vmax.f32 %v3865_v12, %v3870_v18 }
 0x168   : > { %v1262_v30 = vmax.f32 %v4880_v25, %v3582_v40  ;;  %v1338_v33 = vmax.f32 %v1330_v59, %v3835_v52  ;;  %v1339_v34 = vmax.f32 %v1331_v35, %v3845_v47  ;;  %v1335_v15 = vmax.f32 %v3875_v6, %v3880_v20  ;;  %1346 = vst.msk [vmem:[%s262_s30 + $0x8] sm:$0xff] %vm1344_vm8, %v1337_v5 }
 0x169   : > { %v1277_v44 = vmax.f32 %v4883_v43, %v3805_v29  ;;  %v1327_v40 = vmax.f32 %v1317_v11, %v1325_v48  ;;  %v1340_v26 = vmax.f32 %v1332_v17, %v3855_v0  ;;  %v1341_v29 = vmax.f32 %v1333_v60, %v3865_v12 }
 0x16a   : > { %1347 = vst.msk [vmem:[%s262_s30 + $0x10] sm:$0xff] %vm1344_vm8, %v1338_v33  ;;  %v1342_v47 = vmax.f32 %v1334_v22, %v3875_v6 }
 0x16b   : > { %v1328_v52 = vmax.f32 %v1327_v40, %v1262_v30  ;;  %1348 = vst.msk [vmem:[%s262_s30 + $0x18] sm:$0xff] %vm1344_vm8, %v1339_v34  ;;  %v1343_v0 = vmax.f32 %v1335_v15, %v1277_v44 }
 0x16c   : > { %1349 = vst.msk [vmem:[%s262_s30 + $0x20] sm:$0xff] %vm1344_vm8, %v1340_v26 }
 0x16d   : > { %v1336_v18 = vmax.f32 %v1328_v52, %v3811_v21  ;;  %1350 = vst.msk [vmem:[%s262_s30 + $0x28] sm:$0xff] %vm1344_vm8, %v1341_v29 }
 0x16e   : > { %1351 = vst.msk [vmem:[%s262_s30 + $0x30] sm:$0xff] %vm1344_vm8, %v1342_v47 }
 0x16f   : > { %1345 = vst.msk [vmem:[%s262_s30] sm:$0xff] %vm1344_vm8, %v1336_v18 }
 0x170   : > { %1352 = vst.msk [vmem:[%s262_s30 + $0x38] sm:$0xff] %vm1344_vm8, %v1343_v0 }
 0x171   : > { %1661 = shalt.err (!%p1658_p5)
}
 0x172   : > { %s1714_s21 = smov 128   ;;  %s1715_s22 = smov 8  }
 0x173   : > { %1575 = dma.vmem_to_hbm [thread:$0]  (%p1781_p4), %s1369_s5, 1024, %s1371_s6, %s1354_s7, %s1714_s21, %s1714_s21, %s1715_s22  }
 0x174 PF: > { %p1581_p6 = scmp.ge.s32.totalorder %s1712_s20, 2  ;;  %s1385_s24 = sand.u32 1, %s1692_s15  }
 0x175   : > { %s1386_s18 = scalar_lea.sflag [#allocation3], %s1385_s24 }
 0x176   : > { %p1578_p7 = pnand %p1581_p6, %p1788_p8 }
 0x178   : > { %p1579_p9 = pneg %p1578_p7 }
 0x17a   : > { %1687 = dma.done.wait (%p1579_p9), %s1386_s18, 1024  }
 0x17b   : > { %1689 = vsyncadd (%p1579_p9), %s1386_s18, 4294966272  ;;  %s17_s20 = sadd.s32 1, %s1712_s20   ;;  %s4884_s15 = smov %s1696_s16 }
 0x17c   : > { %p14_p10 = scmp.ge.s32.totalorder %s17_s20, 4   ;;  %s4885_s16 = smov %s1700_s17 }
 0x17d   : > { %s4886_s17 = smov %s1794_s28  ;;  %s4887_s18 = smov %s1708_s19 }
 0x17e   : > { %s4888_s19 = smov %s4890_s23  ;;  %16 = sbr.rel (!%p14_p10) target bundleno = 4 (0x4), region = 74 }
 0x183   :  { %1392 = vsyncpa [#allocation3], 1 }
 0x184   :  { %1394 = vsyncpa [#allocation3 + $0x1], 1 }

</bundles_post_ra>
